<compile_context>
chip_gen: v5e
topology: v5e:2x2
jax: 0.10.0
libtpu: 0.0.40
codegen_flags: <defaults>
</compile_context>

<pallas_src>
import functools

import jax
import jax.numpy as jnp
from jax import lax
from jax.experimental import pallas as pl
from jax.experimental.pallas import tpu as pltpu

EPS = 1e-5
LANE = 128


def _round_up(x, m):
    return (x + m - 1) // m * m


def _pad_last(a, target):
    pad = target - a.shape[-1]
    if pad == 0:
        return a
    return jnp.pad(a, [(0, 0)] * (a.ndim - 1) + [(0, pad)])


# ---------------------------------------------------------------------------
# Kernel 1: per-channel sum / sum-of-squares (BatchNorm batch statistics),
#           tiled over rows with cross-tile accumulation.
# ---------------------------------------------------------------------------

def _bn_stats_kernel(x_ref, sum_ref, sq_ref):
    @pl.when(pl.program_id(0) == 0)
    def _init():
        sum_ref[...] = jnp.zeros_like(sum_ref)
        sq_ref[...] = jnp.zeros_like(sq_ref)

    x = x_ref[...]
    sum_ref[...] += jnp.sum(x, axis=0, keepdims=True)
    sq_ref[...] += jnp.sum(x * x, axis=0, keepdims=True)


def batch_channel_stats(x2d, rows_valid, block_rows=1024):
    """Per-channel (mean, biased var) over axis 0 of an (M, C) array."""
    M, C = x2d.shape
    tm = min(block_rows, _round_up(M, 8))
    Mp = _round_up(M, tm)
    if Mp != M:
        # zero rows do not perturb the sums; we divide by the true row count.
        x2d = jnp.pad(x2d, ((0, Mp - M), (0, 0)))
    s, ss = pl.pallas_call(
        _bn_stats_kernel,
        grid=(Mp // tm,),
        in_specs=[pl.BlockSpec((tm, C), lambda i: (i, 0))],
        out_specs=(pl.BlockSpec((1, C), lambda i: (0, 0)),
                   pl.BlockSpec((1, C), lambda i: (0, 0))),
        out_shape=(jax.ShapeDtypeStruct((1, C), jnp.float32),
                   jax.ShapeDtypeStruct((1, C), jnp.float32)),
        compiler_params=pltpu.CompilerParams(
            dimension_semantics=("arbitrary",)),
    )(x2d)
    mean = s[0] / rows_valid
    var = ss[0] / rows_valid - mean * mean
    return mean, var


# ---------------------------------------------------------------------------
# Fused BN+ReLU -> 3x3 dilated conv kernels (patch tile built in VMEM).
# ---------------------------------------------------------------------------

def _window(pad_ref, y0, x0, ho, wo, stride):
    if stride == 1:
        return pad_ref[pl.ds(y0, ho), pl.ds(x0, wo), :]
    return pad_ref[pl.ds(y0, ho, stride), pl.ds(x0, wo, stride), :]


def _patch_tile(pad_ref, ho, wo, stride, dilation):
    """(ho*wo, 9*C) im2col tile from the zero-padded VMEM activation slab."""
    wins = [_window(pad_ref, ky * dilation, kx * dilation, ho, wo, stride)
            for ky in range(3) for kx in range(3)]
    patches = jnp.concatenate(wins, axis=-1)            # (ho, wo, 9*C)
    return patches.reshape(ho * wo, patches.shape[-1])


def _conv1_kernel(x_ref, scale_ref, shift_ref, w_ref, b_ref, wsc_ref, bsc_ref,
                  out_ref, short_ref, pad_ref,
                  *, Ho, Wo, stride, dilation, mxu_dtype):
    H, W, Cin = x_ref.shape
    d = dilation
    # BatchNorm (precomputed batch scale/shift) + ReLU, f32 on the VPU.
    y = jnp.maximum(x_ref[...] * scale_ref[...] + shift_ref[...], 0.0)
    # Conv zero-padding applies to the *post* BN+ReLU activations.
    pad_ref[...] = jnp.zeros_like(pad_ref)
    pad_ref[d:d + H, d:d + W, :] = y
    patches = _patch_tile(pad_ref, Ho, Wo, stride, d).astype(mxu_dtype)
    out_ref[...] = (
        jnp.dot(patches, w_ref[...], preferred_element_type=jnp.float32)
        + b_ref[...])
    # Fused 1x1 strided shortcut conv: its input is exactly the centre-tap
    # columns of the conv1 patch tile (valid because padding == dilation).
    centre = patches[:, 4 * Cin:5 * Cin]
    short_ref[...] = (
        jnp.dot(centre, wsc_ref[...], preferred_element_type=jnp.float32)
        + bsc_ref[...])


def _conv2_kernel(x_ref, scale_ref, shift_ref, w_ref, b_ref, res_ref,
                  out_ref, pad_ref, *, dilation, mxu_dtype):
    H, W, _ = x_ref.shape
    C = pad_ref.shape[-1]          # real (unpadded) channel count
    d = dilation
    y = jnp.maximum(x_ref[:, :, :C] * scale_ref[...] + shift_ref[...], 0.0)
    pad_ref[...] = jnp.zeros_like(pad_ref)
    pad_ref[d:d + H, d:d + W, :] = y
    patches = _patch_tile(pad_ref, H, W, 1, d).astype(mxu_dtype)
    out_ref[...] = (
        jnp.dot(patches, w_ref[...], preferred_element_type=jnp.float32)
        + b_ref[...] + res_ref[...])                      # residual add fused


def conv1_with_shortcut(x_nhwc, scale, shift, w_mat, bias, w_sc, b_sc,
                        stride, dilation, mxu_dtype):
    N, H, W, Cin = x_nhwc.shape
    Cp = w_mat.shape[-1]
    d = dilation
    Ho = (H - 1) // stride + 1
    Wo = (W - 1) // stride + 1
    const2 = lambda n: (0, 0)
    out_sds = jax.ShapeDtypeStruct((N, Ho * Wo, Cp), jnp.float32)
    kernel = functools.partial(_conv1_kernel, Ho=Ho, Wo=Wo, stride=stride,
                               dilation=d, mxu_dtype=mxu_dtype)
    return pl.pallas_call(
        kernel,
        grid=(N,),
        in_specs=[
            pl.BlockSpec((None, H, W, Cin), lambda n: (n, 0, 0, 0)),
            pl.BlockSpec((1, Cin), const2),         # BN1 scale   (resident)
            pl.BlockSpec((1, Cin), const2),         # BN1 shift   (resident)
            pl.BlockSpec(w_mat.shape, const2),      # conv1 W     (resident)
            pl.BlockSpec((1, Cp), const2),          # conv1 bias  (resident)
            pl.BlockSpec(w_sc.shape, const2),       # shortcut W  (resident)
            pl.BlockSpec((1, Cp), const2),          # shortcut b  (resident)
        ],
        out_specs=(pl.BlockSpec((None, Ho * Wo, Cp), lambda n: (n, 0, 0)),
                   pl.BlockSpec((None, Ho * Wo, Cp), lambda n: (n, 0, 0))),
        out_shape=(out_sds, out_sds),
        scratch_shapes=[pltpu.VMEM((H + 2 * d, W + 2 * d, Cin), jnp.float32)],
        compiler_params=pltpu.CompilerParams(
            dimension_semantics=("parallel",)),
    )(x_nhwc, scale, shift, w_mat, bias, w_sc, b_sc)


def conv2_with_residual(x_nhwc, scale, shift, w_mat, bias, residual,
                        dilation, mxu_dtype):
    N, H, W, Cp_in = x_nhwc.shape
    C = scale.shape[-1]            # real channel count of the conv2 input
    Cp = w_mat.shape[-1]
    d = dilation
    const2 = lambda n: (0, 0)
    kernel = functools.partial(_conv2_kernel, dilation=d, mxu_dtype=mxu_dtype)
    return pl.pallas_call(
        kernel,
        grid=(N,),
        in_specs=[
            pl.BlockSpec((None, H, W, Cp_in), lambda n: (n, 0, 0, 0)),
            pl.BlockSpec((1, C), const2),           # BN2 scale   (resident)
            pl.BlockSpec((1, C), const2),           # BN2 shift   (resident)
            pl.BlockSpec(w_mat.shape, const2),      # conv2 W     (resident)
            pl.BlockSpec((1, Cp), const2),          # conv2 bias  (resident)
            pl.BlockSpec((None, H * W, Cp), lambda n: (n, 0, 0)),  # residual
        ],
        out_specs=pl.BlockSpec((None, H * W, Cp), lambda n: (n, 0, 0)),
        out_shape=jax.ShapeDtypeStruct((N, H * W, Cp), jnp.float32),
        scratch_shapes=[pltpu.VMEM((H + 2 * d, W + 2 * d, C), jnp.float32)],
        compiler_params=pltpu.CompilerParams(
            dimension_semantics=("parallel",)),
    )(x_nhwc, scale, shift, w_mat, bias, residual)


# ---------------------------------------------------------------------------
# Forward pass glue.
# ---------------------------------------------------------------------------

@functools.partial(jax.jit, static_argnames=("stride", "dilation", "mxu_dtype"))
def res_block_forward(x_nchw, params, stride, dilation,
                      mxu_dtype=jnp.bfloat16):
    N, Cin, H, W = x_nchw.shape
    Cout = params["w1"].shape[-1]
    if not (Cin != Cout or stride > 1):
        # TODO(synk): identity-shortcut ResBlock variant (never reached from
        # DownBlock, which always uses stride=2).
        raise NotImplementedError("identity-shortcut ResBlock not implemented")
    Cp = _round_up(Cout, LANE)
    d = dilation

    x_nhwc = jnp.transpose(x_nchw, (0, 2, 3, 1)).astype(jnp.float32)

    # BN1 batch statistics (tiled Pallas reduction) -> per-channel affine.
    mean1, var1 = batch_channel_stats(x_nhwc.reshape(N * H * W, Cin), N * H * W)
    scale1 = (params["bn1_gamma"] * lax.rsqrt(var1 + EPS)).reshape(1, Cin)
    shift1 = (params["bn1_beta"] - mean1 * scale1[0]).reshape(1, Cin)

    # Lane-dense (channel-padded) weights; MXU operands in mxu_dtype, bias f32.
    w1 = _pad_last(params["w1"].reshape(9 * Cin, Cout), Cp).astype(mxu_dtype)
    b1 = _pad_last(params["b1"].reshape(1, Cout), Cp).astype(jnp.float32)
    wsc = _pad_last(params["w_sc"].reshape(Cin, Cout), Cp).astype(mxu_dtype)
    bsc = _pad_last(params["b_sc"].reshape(1, Cout), Cp).astype(jnp.float32)

    # Fused BN1+ReLU -> conv1 (+ fused 1x1 strided shortcut).
    out1, short = conv1_with_shortcut(x_nhwc, scale1, shift1, w1, b1, wsc, bsc,
                                      stride, d, mxu_dtype)
    Ho = (H - 1) // stride + 1
    Wo = (W - 1) // stride + 1

    # BN2 batch statistics on the conv1 output (padded channels are all-zero
    # and are simply ignored below).
    mean2, var2 = batch_channel_stats(out1.reshape(N * Ho * Wo, Cp),
                                      N * Ho * Wo)
    scale2 = (params["bn2_gamma"] * lax.rsqrt(var2[:Cout] + EPS)).reshape(1, Cout)
    shift2 = (params["bn2_beta"] - mean2[:Cout] * scale2[0]).reshape(1, Cout)

    w2 = _pad_last(params["w2"].reshape(9 * Cout, Cout), Cp).astype(mxu_dtype)
    b2 = _pad_last(params["b2"].reshape(1, Cout), Cp).astype(jnp.float32)

    # Fused BN2+ReLU -> conv2 (+ fused residual add).
    out2 = conv2_with_residual(out1.reshape(N, Ho, Wo, Cp), scale2, shift2,
                               w2, b2, short, d, mxu_dtype)

    y = out2.reshape(N, Ho, Wo, Cp)[..., :Cout]
    return jnp.transpose(y, (0, 3, 1, 2))


def down_block_forward(x_nchw, params, dilation, mxu_dtype=jnp.bfloat16):
    # DownBlock == ResBlock with stride 2.
    return res_block_forward(x_nchw, params, stride=2, dilation=dilation,
                             mxu_dtype=mxu_dtype)


# ---------------------------------------------------------------------------
# Pure-JAX reference (training-mode BatchNorm, same as the PyTorch forward).
# ---------------------------------------------------------------------------

def reference_forward(x, params, stride, dilation):
    def bn_relu_ref(x, g, b):
        mean = x.mean(axis=(0, 2, 3), keepdims=True)
        var = ((x - mean) ** 2).mean(axis=(0, 2, 3), keepdims=True)
        y = (x - mean) / jnp.sqrt(var + EPS) * g.reshape(1, -1, 1, 1) \
            + b.reshape(1, -1, 1, 1)
        return jnp.maximum(y, 0.0)

    def conv(x, w_hwio, b, s, d, pad):
        w_oihw = jnp.transpose(w_hwio, (3, 2, 0, 1))
        y = lax.conv_general_dilated(x, w_oihw, (s, s),
                                     [(pad, pad), (pad, pad)],
                                     rhs_dilation=(d, d),
                                     dimension_numbers=("NCHW", "OIHW", "NCHW"))
        return y + b.reshape(1, -1, 1, 1)

    br1 = bn_relu_ref(x, params["bn1_gamma"], params["bn1_beta"])
    r = conv(br1, params["w1"], params["b1"], stride, dilation, dilation)
    r = conv(bn_relu_ref(r, params["bn2_gamma"], params["bn2_beta"]),
             params["w2"], params["b2"], 1, dilation, dilation)
    xs = conv(br1, params["w_sc"], params["b_sc"], stride, 1, 0)
    return xs + r


# ---------------------------------------------------------------------------

if __name__ == "__main__":
    N, Cin, H, W = 2, 4, 16, 16
    Cout, dilation = 8, 1          # DownBlock(4, 8, dilation=1); stride is 2.

    key = jax.random.PRNGKey(0)
    ks = jax.random.split(key, 11)
    params = {
        "bn1_gamma": 1.0 + 0.1 * jax.random.normal(ks[0], (Cin,), jnp.float32),
        "bn1_beta":  0.1 * jax.random.normal(ks[1], (Cin,), jnp.float32),
        "w1": 0.1 * jax.random.normal(ks[2], (3, 3, Cin, Cout), jnp.float32),
        "b1": 0.1 * jax.random.normal(ks[3], (Cout,), jnp.float32),
        "bn2_gamma": 1.0 + 0.1 * jax.random.normal(ks[4], (Cout,), jnp.float32),
        "bn2_beta":  0.1 * jax.random.normal(ks[5], (Cout,), jnp.float32),
        "w2": 0.1 * jax.random.normal(ks[6], (3, 3, Cout, Cout), jnp.float32),
        "b2": 0.1 * jax.random.normal(ks[7], (Cout,), jnp.float32),
        "w_sc": 0.1 * jax.random.normal(ks[8], (1, 1, Cin, Cout), jnp.float32),
        "b_sc": 0.1 * jax.random.normal(ks[9], (Cout,), jnp.float32),
    }
    x = jax.random.normal(ks[10], (N, Cin, H, W), jnp.float32)

    ref = jax.block_until_ready(
        reference_forward(x, params, stride=2, dilation=dilation))

    # Parity configuration (f32 MXU operands).
    out_f32 = jax.block_until_ready(
        down_block_forward(x, params, dilation, mxu_dtype=jnp.float32))
    assert out_f32.shape == ref.shape, (out_f32.shape, ref.shape)
    err_f32 = float(jnp.max(jnp.abs(out_f32 - ref)))
    assert err_f32 < 2e-2, f"f32 max abs err {err_f32}"

    # Performance configuration (bf16 MXU operands, f32 accumulation).
    out_bf16 = jax.block_until_ready(down_block_forward(x, params, dilation))
    err_bf16 = float(jnp.max(jnp.abs(out_bf16 - ref)))
    assert err_bf16 < 1e-1, f"bf16 max abs err {err_bf16}"

    print("KERNEL_OK")
</pallas_src>

<mosaic_0001>
module attributes {stable_mosaic.version = 11 : i64} {
  func.func @_bn_stats_kernel(%arg0: i32, %arg1: memref<512x4xf32, #tpu.memory_space<vmem>>, %arg2: memref<1x4xf32, #tpu.memory_space<vmem>>, %arg3: memref<1x4xf32, #tpu.memory_space<vmem>>) attributes {dimension_semantics = [#tpu.dimension_semantics<arbitrary>], iteration_bounds = array<i64: 1>, scalar_prefetch = 0 : i64, scratch_operands = 0 : i64, tpu.core_type = #tpu.core_type<tc>, window_params = [{transform_indices = @transform_0, window_bounds = array<i64: 512, 4>}, {pipeline_mode = #tpu.pipeline_mode<synchronous>, transform_indices = @transform_1, window_bounds = array<i64: 1, 4>}, {pipeline_mode = #tpu.pipeline_mode<synchronous>, transform_indices = @transform_2, window_bounds = array<i64: 1, 4>}]} {
    %c0_i32 = arith.constant 0 : i32
    %0 = arith.cmpi eq, %arg0, %c0_i32 : i32
    %1 = arith.extui %0 : i1 to i32
    %c0_i32_0 = arith.constant 0 : i32
    %2 = arith.cmpi ne, %1, %c0_i32_0 : i32
    scf.if %2 {
      %cst_11 = arith.constant 0.000000e+00 : f32
      %15 = vector.broadcast %cst_11 : f32 to vector<1x4xf32>
      %c0_12 = arith.constant 0 : index
      %c0_13 = arith.constant 0 : index
      %16 = vector.load %arg2[%c0_12, %c0_13] : memref<1x4xf32, #tpu.memory_space<vmem>>, vector<1x4xf32>
      tpu.vector_store %arg2[%c0_12, %c0_13], %15 {strides = array<i32>} : memref<1x4xf32, #tpu.memory_space<vmem>>, vector<1x4xf32>,
      %cst_14 = arith.constant 0.000000e+00 : f32
      %17 = vector.broadcast %cst_14 : f32 to vector<1x4xf32>
      %c0_15 = arith.constant 0 : index
      %c0_16 = arith.constant 0 : index
      %18 = vector.load %arg3[%c0_15, %c0_16] : memref<1x4xf32, #tpu.memory_space<vmem>>, vector<1x4xf32>
      tpu.vector_store %arg3[%c0_15, %c0_16], %17 {strides = array<i32>} : memref<1x4xf32, #tpu.memory_space<vmem>>, vector<1x4xf32>,
    } else {
    }
    %c0 = arith.constant 0 : index
    %c0_1 = arith.constant 0 : index
    %3 = vector.load %arg1[%c0, %c0_1] : memref<512x4xf32, #tpu.memory_space<vmem>>, vector<512x4xf32>
    %c0_2 = arith.constant 0 : index
    %c0_3 = arith.constant 0 : index
    %4 = vector.load %arg2[%c0_2, %c0_3] : memref<1x4xf32, #tpu.memory_space<vmem>>, vector<1x4xf32>
    %cst = arith.constant dense<0.000000e+00> : vector<4xf32>
    %5 = vector.multi_reduction <add>, %3, %cst [0] : vector<512x4xf32> to vector<4xf32>
    %6 = vector.shape_cast %5 : vector<4xf32> to vector<1x4xf32>
    %7 = arith.addf %4, %6 : vector<1x4xf32>
    %c0_4 = arith.constant 0 : index
    %c0_5 = arith.constant 0 : index
    %8 = vector.load %arg2[%c0_4, %c0_5] : memref<1x4xf32, #tpu.memory_space<vmem>>, vector<1x4xf32>
    tpu.vector_store %arg2[%c0_4, %c0_5], %7 {strides = array<i32>} : memref<1x4xf32, #tpu.memory_space<vmem>>, vector<1x4xf32>,
    %c0_6 = arith.constant 0 : index
    %c0_7 = arith.constant 0 : index
    %9 = vector.load %arg3[%c0_6, %c0_7] : memref<1x4xf32, #tpu.memory_space<vmem>>, vector<1x4xf32>
    %10 = arith.mulf %3, %3 : vector<512x4xf32>
    %cst_8 = arith.constant dense<0.000000e+00> : vector<4xf32>
    %11 = vector.multi_reduction <add>, %10, %cst_8 [0] : vector<512x4xf32> to vector<4xf32>
    %12 = vector.shape_cast %11 : vector<4xf32> to vector<1x4xf32>
    %13 = arith.addf %9, %12 : vector<1x4xf32>
    %c0_9 = arith.constant 0 : index
    %c0_10 = arith.constant 0 : index
    %14 = vector.load %arg3[%c0_9, %c0_10] : memref<1x4xf32, #tpu.memory_space<vmem>>, vector<1x4xf32>
    tpu.vector_store %arg3[%c0_9, %c0_10], %13 {strides = array<i32>} : memref<1x4xf32, #tpu.memory_space<vmem>>, vector<1x4xf32>,
    return
  }
  func.func @transform_0(%arg0: i32) -> (i32, i32) {
    %c0_i32 = arith.constant 0 : i32
    %c0_i32_0 = arith.constant 0 : i32
    return %arg0, %c0_i32 : i32, i32
  }
  func.func @transform_1(%arg0: i32) -> (i32, i32) {
    %c0_i32 = arith.constant 0 : i32
    %c0_i32_0 = arith.constant 0 : i32
    %c0_i32_1 = arith.constant 0 : i32
    return %c0_i32, %c0_i32_0 : i32, i32
  }
  func.func @transform_2(%arg0: i32) -> (i32, i32) {
    %c0_i32 = arith.constant 0 : i32
    %c0_i32_0 = arith.constant 0 : i32
    %c0_i32_1 = arith.constant 0 : i32
    return %c0_i32, %c0_i32_0 : i32, i32
  }
}

module attributes {stable_mosaic.version = 11 : i64} {
  func.func @_bn_stats_kernel(%arg0: i32, %arg1: memref<128x128xf32, #tpu.memory_space<vmem>>, %arg2: memref<1x128xf32, #tpu.memory_space<vmem>>, %arg3: memref<1x128xf32, #tpu.memory_space<vmem>>) attributes {dimension_semantics = [#tpu.dimension_semantics<arbitrary>], iteration_bounds = array<i64: 1>, scalar_prefetch = 0 : i64, scratch_operands = 0 : i64, tpu.core_type = #tpu.core_type<tc>, window_params = [{transform_indices = @transform_0, window_bounds = array<i64: 128, 128>}, {pipeline_mode = #tpu.pipeline_mode<synchronous>, transform_indices = @transform_1, window_bounds = array<i64: 1, 128>}, {pipeline_mode = #tpu.pipeline_mode<synchronous>, transform_indices = @transform_2, window_bounds = array<i64: 1, 128>}]} {
    %c0_i32 = arith.constant 0 : i32
    %0 = arith.cmpi eq, %arg0, %c0_i32 : i32
    %1 = arith.extui %0 : i1 to i32
    %c0_i32_0 = arith.constant 0 : i32
    %2 = arith.cmpi ne, %1, %c0_i32_0 : i32
    scf.if %2 {
      %cst_11 = arith.constant 0.000000e+00 : f32
      %15 = vector.broadcast %cst_11 : f32 to vector<1x128xf32>
      %c0_12 = arith.constant 0 : index
      %c0_13 = arith.constant 0 : index
      %16 = vector.load %arg2[%c0_12, %c0_13] : memref<1x128xf32, #tpu.memory_space<vmem>>, vector<1x128xf32>
      tpu.vector_store %arg2[%c0_12, %c0_13], %15 {strides = array<i32>} : memref<1x128xf32, #tpu.memory_space<vmem>>, vector<1x128xf32>,
      %cst_14 = arith.constant 0.000000e+00 : f32
      %17 = vector.broadcast %cst_14 : f32 to vector<1x128xf32>
      %c0_15 = arith.constant 0 : index
      %c0_16 = arith.constant 0 : index
      %18 = vector.load %arg3[%c0_15, %c0_16] : memref<1x128xf32, #tpu.memory_space<vmem>>, vector<1x128xf32>
      tpu.vector_store %arg3[%c0_15, %c0_16], %17 {strides = array<i32>} : memref<1x128xf32, #tpu.memory_space<vmem>>, vector<1x128xf32>,
    } else {
    }
    %c0 = arith.constant 0 : index
    %c0_1 = arith.constant 0 : index
    %3 = vector.load %arg1[%c0, %c0_1] : memref<128x128xf32, #tpu.memory_space<vmem>>, vector<128x128xf32>
    %c0_2 = arith.constant 0 : index
    %c0_3 = arith.constant 0 : index
    %4 = vector.load %arg2[%c0_2, %c0_3] : memref<1x128xf32, #tpu.memory_space<vmem>>, vector<1x128xf32>
    %cst = arith.constant dense<0.000000e+00> : vector<128xf32>
    %5 = vector.multi_reduction <add>, %3, %cst [0] : vector<128x128xf32> to vector<128xf32>
    %6 = vector.shape_cast %5 : vector<128xf32> to vector<1x128xf32>
    %7 = arith.addf %4, %6 : vector<1x128xf32>
    %c0_4 = arith.constant 0 : index
    %c0_5 = arith.constant 0 : index
    %8 = vector.load %arg2[%c0_4, %c0_5] : memref<1x128xf32, #tpu.memory_space<vmem>>, vector<1x128xf32>
    tpu.vector_store %arg2[%c0_4, %c0_5], %7 {strides = array<i32>} : memref<1x128xf32, #tpu.memory_space<vmem>>, vector<1x128xf32>,
    %c0_6 = arith.constant 0 : index
    %c0_7 = arith.constant 0 : index
    %9 = vector.load %arg3[%c0_6, %c0_7] : memref<1x128xf32, #tpu.memory_space<vmem>>, vector<1x128xf32>
    %10 = arith.mulf %3, %3 : vector<128x128xf32>
    %cst_8 = arith.constant dense<0.000000e+00> : vector<128xf32>
    %11 = vector.multi_reduction <add>, %10, %cst_8 [0] : vector<128x128xf32> to vector<128xf32>
    %12 = vector.shape_cast %11 : vector<128xf32> to vector<1x128xf32>
    %13 = arith.addf %9, %12 : vector<1x128xf32>
    %c0_9 = arith.constant 0 : index
    %c0_10 = arith.constant 0 : index
    %14 = vector.load %arg3[%c0_9, %c0_10] : memref<1x128xf32, #tpu.memory_space<vmem>>, vector<1x128xf32>
    tpu.vector_store %arg3[%c0_9, %c0_10], %13 {strides = array<i32>} : memref<1x128xf32, #tpu.memory_space<vmem>>, vector<1x128xf32>,
    return
  }
  func.func @transform_0(%arg0: i32) -> (i32, i32) {
    %c0_i32 = arith.constant 0 : i32
    %c0_i32_0 = arith.constant 0 : i32
    return %arg0, %c0_i32 : i32, i32
  }
  func.func @transform_1(%arg0: i32) -> (i32, i32) {
    %c0_i32 = arith.constant 0 : i32
    %c0_i32_0 = arith.constant 0 : i32
    %c0_i32_1 = arith.constant 0 : i32
    return %c0_i32, %c0_i32_0 : i32, i32
  }
  func.func @transform_2(%arg0: i32) -> (i32, i32) {
    %c0_i32 = arith.constant 0 : i32
    %c0_i32_0 = arith.constant 0 : i32
    %c0_i32_1 = arith.constant 0 : i32
    return %c0_i32, %c0_i32_0 : i32, i32
  }
}

module attributes {stable_mosaic.version = 11 : i64} {
  func.func @_conv1_kernel(%arg0: i32, %arg1: memref<1x16x16x4xf32, #tpu.memory_space<vmem>>, %arg2: memref<1x4xf32, #tpu.memory_space<vmem>>, %arg3: memref<1x4xf32, #tpu.memory_space<vmem>>, %arg4: memref<36x128xf32, #tpu.memory_space<vmem>>, %arg5: memref<1x128xf32, #tpu.memory_space<vmem>>, %arg6: memref<4x128xf32, #tpu.memory_space<vmem>>, %arg7: memref<1x128xf32, #tpu.memory_space<vmem>>, %arg8: memref<1x64x128xf32, #tpu.memory_space<vmem>>, %arg9: memref<1x64x128xf32, #tpu.memory_space<vmem>>, %arg10: memref<18x18x4xf32, #tpu.memory_space<vmem>>) attributes {dimension_semantics = [#tpu.dimension_semantics<parallel>], iteration_bounds = array<i64: 2>, scalar_prefetch = 0 : i64, scratch_operands = 1 : i64, tpu.core_type = #tpu.core_type<tc>, window_params = [{transform_indices = @transform_0, window_bounds = array<i64: 1, 16, 16, 4>}, {pipeline_mode = #tpu.pipeline_mode<synchronous>, transform_indices = @transform_1, window_bounds = array<i64: 1, 4>}, {pipeline_mode = #tpu.pipeline_mode<synchronous>, transform_indices = @transform_2, window_bounds = array<i64: 1, 4>}, {pipeline_mode = #tpu.pipeline_mode<synchronous>, transform_indices = @transform_3, window_bounds = array<i64: 36, 128>}, {pipeline_mode = #tpu.pipeline_mode<synchronous>, transform_indices = @transform_4, window_bounds = array<i64: 1, 128>}, {pipeline_mode = #tpu.pipeline_mode<synchronous>, transform_indices = @transform_5, window_bounds = array<i64: 4, 128>}, {pipeline_mode = #tpu.pipeline_mode<synchronous>, transform_indices = @transform_6, window_bounds = array<i64: 1, 128>}, {transform_indices = @transform_7, window_bounds = array<i64: 1, 64, 128>}, {transform_indices = @transform_8, window_bounds = array<i64: 1, 64, 128>}]} {
    %c0 = arith.constant 0 : index
    %c0_0 = arith.constant 0 : index
    %c0_1 = arith.constant 0 : index
    %c0_2 = arith.constant 0 : index
    %0 = vector.load %arg1[%c0, %c0_0, %c0_1, %c0_2] : memref<1x16x16x4xf32, #tpu.memory_space<vmem>>, vector<1x16x16x4xf32>
    %1 = vector.shape_cast %0 : vector<1x16x16x4xf32> to vector<16x16x4xf32>
    %c0_3 = arith.constant 0 : index
    %c0_4 = arith.constant 0 : index
    %2 = vector.load %arg2[%c0_3, %c0_4] : memref<1x4xf32, #tpu.memory_space<vmem>>, vector<1x4xf32>
    %3 = vector.shape_cast %2 : vector<1x4xf32> to vector<1x1x4xf32>
    %4 = vector.broadcast %3 : vector<1x1x4xf32> to vector<16x16x4xf32>
    %5 = arith.mulf %1, %4 : vector<16x16x4xf32>
    %c0_5 = arith.constant 0 : index
    %c0_6 = arith.constant 0 : index
    %6 = vector.load %arg3[%c0_5, %c0_6] : memref<1x4xf32, #tpu.memory_space<vmem>>, vector<1x4xf32>
    %7 = vector.shape_cast %6 : vector<1x4xf32> to vector<1x1x4xf32>
    %8 = vector.broadcast %7 : vector<1x1x4xf32> to vector<16x16x4xf32>
    %9 = arith.addf %5, %8 : vector<16x16x4xf32>
    %cst = arith.constant 0.000000e+00 : f32
    %10 = vector.broadcast %cst : f32 to vector<16x16x4xf32>
    %11 = arith.maximumf %9, %10 : vector<16x16x4xf32>
    %cst_7 = arith.constant 0.000000e+00 : f32
    %12 = vector.broadcast %cst_7 : f32 to vector<18x18x4xf32>
    %c0_8 = arith.constant 0 : index
    %c0_9 = arith.constant 0 : index
    %c0_10 = arith.constant 0 : index
    %13 = vector.load %arg10[%c0_8, %c0_9, %c0_10] : memref<18x18x4xf32, #tpu.memory_space<vmem>>, vector<18x18x4xf32>
    tpu.vector_store %arg10[%c0_8, %c0_9, %c0_10], %12 {strides = array<i32>} : memref<18x18x4xf32, #tpu.memory_space<vmem>>, vector<18x18x4xf32>,
    %c1 = arith.constant 1 : index
    %c1_11 = arith.constant 1 : index
    %c0_12 = arith.constant 0 : index
    %14 = vector.load %arg10[%c1, %c1_11, %c0_12] : memref<18x18x4xf32, #tpu.memory_space<vmem>>, vector<16x16x4xf32>
    tpu.vector_store %arg10[%c1, %c1_11, %c0_12], %11 {strides = array<i32>} : memref<18x18x4xf32, #tpu.memory_space<vmem>>, vector<16x16x4xf32>,
    %c0_13 = arith.constant 0 : index
    %c0_14 = arith.constant 0 : index
    %c0_15 = arith.constant 0 : index
    %15 = tpu.strided_load %arg10[%c0_13, %c0_14, %c0_15] {strides = array<i32: 2, 2, 1>} : memref<18x18x4xf32, #tpu.memory_space<vmem>>, vector<8x8x4xf32>
    %c0_16 = arith.constant 0 : index
    %c1_17 = arith.constant 1 : index
    %c0_18 = arith.constant 0 : index
    %16 = tpu.strided_load %arg10[%c0_16, %c1_17, %c0_18] {strides = array<i32: 2, 2, 1>} : memref<18x18x4xf32, #tpu.memory_space<vmem>>, vector<8x8x4xf32>
    %c0_19 = arith.constant 0 : index
    %c2 = arith.constant 2 : index
    %c0_20 = arith.constant 0 : index
    %17 = tpu.strided_load %arg10[%c0_19, %c2, %c0_20] {strides = array<i32: 2, 2, 1>} : memref<18x18x4xf32, #tpu.memory_space<vmem>>, vector<8x8x4xf32>
    %c1_21 = arith.constant 1 : index
    %c0_22 = arith.constant 0 : index
    %c0_23 = arith.constant 0 : index
    %18 = tpu.strided_load %arg10[%c1_21, %c0_22, %c0_23] {strides = array<i32: 2, 2, 1>} : memref<18x18x4xf32, #tpu.memory_space<vmem>>, vector<8x8x4xf32>
    %c1_24 = arith.constant 1 : index
    %c1_25 = arith.constant 1 : index
    %c0_26 = arith.constant 0 : index
    %19 = tpu.strided_load %arg10[%c1_24, %c1_25, %c0_26] {strides = array<i32: 2, 2, 1>} : memref<18x18x4xf32, #tpu.memory_space<vmem>>, vector<8x8x4xf32>
    %c1_27 = arith.constant 1 : index
    %c2_28 = arith.constant 2 : index
    %c0_29 = arith.constant 0 : index
    %20 = tpu.strided_load %arg10[%c1_27, %c2_28, %c0_29] {strides = array<i32: 2, 2, 1>} : memref<18x18x4xf32, #tpu.memory_space<vmem>>, vector<8x8x4xf32>
    %c2_30 = arith.constant 2 : index
    %c0_31 = arith.constant 0 : index
    %c0_32 = arith.constant 0 : index
    %21 = tpu.strided_load %arg10[%c2_30, %c0_31, %c0_32] {strides = array<i32: 2, 2, 1>} : memref<18x18x4xf32, #tpu.memory_space<vmem>>, vector<8x8x4xf32>
    %c2_33 = arith.constant 2 : index
    %c1_34 = arith.constant 1 : index
    %c0_35 = arith.constant 0 : index
    %22 = tpu.strided_load %arg10[%c2_33, %c1_34, %c0_35] {strides = array<i32: 2, 2, 1>} : memref<18x18x4xf32, #tpu.memory_space<vmem>>, vector<8x8x4xf32>
    %c2_36 = arith.constant 2 : index
    %c2_37 = arith.constant 2 : index
    %c0_38 = arith.constant 0 : index
    %23 = tpu.strided_load %arg10[%c2_36, %c2_37, %c0_38] {strides = array<i32: 2, 2, 1>} : memref<18x18x4xf32, #tpu.memory_space<vmem>>, vector<8x8x4xf32>
    %24 = tpu.concatenate %15, %16, %17, %18, %19, %20, %21, %22, %23 in 2 : vector<8x8x4xf32>, vector<8x8x4xf32>, vector<8x8x4xf32>, vector<8x8x4xf32>, vector<8x8x4xf32>, vector<8x8x4xf32>, vector<8x8x4xf32>, vector<8x8x4xf32>, vector<8x8x4xf32> -> vector<8x8x36xf32>
    %25 = vector.shape_cast %24 : vector<8x8x36xf32> to vector<64x36xf32>
    %c0_39 = arith.constant 0 : index
    %c0_40 = arith.constant 0 : index
    %26 = vector.load %arg4[%c0_39, %c0_40] : memref<36x128xf32, #tpu.memory_space<vmem>>, vector<36x128xf32>
    %cst_41 = arith.constant dense<0.000000e+00> : vector<64x128xf32>
    %27 = tpu.matmul %25, %26, %cst_41 {dimension_numbers = #tpu.dot_dimension_numbers<[1], [0], [0], [1], [0, 0, 1, 1], [], []>} : vector<64x36xf32>, vector<36x128xf32>, vector<64x128xf32> -> vector<64x128xf32>
    %c0_42 = arith.constant 0 : index
    %c0_43 = arith.constant 0 : index
    %28 = vector.load %arg5[%c0_42, %c0_43] : memref<1x128xf32, #tpu.memory_space<vmem>>, vector<1x128xf32>
    %29 = vector.broadcast %28 : vector<1x128xf32> to vector<64x128xf32>
    %30 = arith.addf %27, %29 : vector<64x128xf32>
    %c0_44 = arith.constant 0 : index
    %c0_45 = arith.constant 0 : index
    %c0_46 = arith.constant 0 : index
    %31 = vector.load %arg8[%c0_44, %c0_45, %c0_46] : memref<1x64x128xf32, #tpu.memory_space<vmem>>, vector<1x64x128xf32>
    %32 = vector.shape_cast %31 : vector<1x64x128xf32> to vector<64x128xf32>
    %33 = vector.shape_cast %30 : vector<64x128xf32> to vector<1x64x128xf32>
    tpu.vector_store %arg8[%c0_44, %c0_45, %c0_46], %33 {strides = array<i32>} : memref<1x64x128xf32, #tpu.memory_space<vmem>>, vector<1x64x128xf32>,
    %34 = vector.extract_strided_slice %25 {offsets = [0, 16], sizes = [64, 4], strides = [1, 1]} : vector<64x36xf32> to vector<64x4xf32>
    %c0_47 = arith.constant 0 : index
    %c0_48 = arith.constant 0 : index
    %35 = vector.load %arg6[%c0_47, %c0_48] : memref<4x128xf32, #tpu.memory_space<vmem>>, vector<4x128xf32>
    %cst_49 = arith.constant dense<0.000000e+00> : vector<64x128xf32>
    %36 = tpu.matmul %34, %35, %cst_49 {dimension_numbers = #tpu.dot_dimension_numbers<[1], [0], [0], [1], [0, 0, 1, 1], [], []>} : vector<64x4xf32>, vector<4x128xf32>, vector<64x128xf32> -> vector<64x128xf32>
    %c0_50 = arith.constant 0 : index
    %c0_51 = arith.constant 0 : index
    %37 = vector.load %arg7[%c0_50, %c0_51] : memref<1x128xf32, #tpu.memory_space<vmem>>, vector<1x128xf32>
    %38 = vector.broadcast %37 : vector<1x128xf32> to vector<64x128xf32>
    %39 = arith.addf %36, %38 : vector<64x128xf32>
    %c0_52 = arith.constant 0 : index
    %c0_53 = arith.constant 0 : index
    %c0_54 = arith.constant 0 : index
    %40 = vector.load %arg9[%c0_52, %c0_53, %c0_54] : memref<1x64x128xf32, #tpu.memory_space<vmem>>, vector<1x64x128xf32>
    %41 = vector.shape_cast %40 : vector<1x64x128xf32> to vector<64x128xf32>
    %42 = vector.shape_cast %39 : vector<64x128xf32> to vector<1x64x128xf32>
    tpu.vector_store %arg9[%c0_52, %c0_53, %c0_54], %42 {strides = array<i32>} : memref<1x64x128xf32, #tpu.memory_space<vmem>>, vector<1x64x128xf32>,
    return
  }
  func.func @transform_0(%arg0: i32) -> (i32, i32, i32, i32) {
    %c0_i32 = arith.constant 0 : i32
    %c0_i32_0 = arith.constant 0 : i32
    %c0_i32_1 = arith.constant 0 : i32
    %c0_i32_2 = arith.constant 0 : i32
    return %arg0, %c0_i32, %c0_i32_0, %c0_i32_1 : i32, i32, i32, i32
  }
  func.func @transform_1(%arg0: i32) -> (i32, i32) {
    %c0_i32 = arith.constant 0 : i32
    %c0_i32_0 = arith.constant 0 : i32
    %c0_i32_1 = arith.constant 0 : i32
    return %c0_i32, %c0_i32_0 : i32, i32
  }
  func.func @transform_2(%arg0: i32) -> (i32, i32) {
    %c0_i32 = arith.constant 0 : i32
    %c0_i32_0 = arith.constant 0 : i32
    %c0_i32_1 = arith.constant 0 : i32
    return %c0_i32, %c0_i32_0 : i32, i32
  }
  func.func @transform_3(%arg0: i32) -> (i32, i32) {
    %c0_i32 = arith.constant 0 : i32
    %c0_i32_0 = arith.constant 0 : i32
    %c0_i32_1 = arith.constant 0 : i32
    return %c0_i32, %c0_i32_0 : i32, i32
  }
  func.func @transform_4(%arg0: i32) -> (i32, i32) {
    %c0_i32 = arith.constant 0 : i32
    %c0_i32_0 = arith.constant 0 : i32
    %c0_i32_1 = arith.constant 0 : i32
    return %c0_i32, %c0_i32_0 : i32, i32
  }
  func.func @transform_5(%arg0: i32) -> (i32, i32) {
    %c0_i32 = arith.constant 0 : i32
    %c0_i32_0 = arith.constant 0 : i32
    %c0_i32_1 = arith.constant 0 : i32
    return %c0_i32, %c0_i32_0 : i32, i32
  }
  func.func @transform_6(%arg0: i32) -> (i32, i32) {
    %c0_i32 = arith.constant 0 : i32
    %c0_i32_0 = arith.constant 0 : i32
    %c0_i32_1 = arith.constant 0 : i32
    return %c0_i32, %c0_i32_0 : i32, i32
  }
  func.func @transform_7(%arg0: i32) -> (i32, i32, i32) {
    %c0_i32 = arith.constant 0 : i32
    %c0_i32_0 = arith.constant 0 : i32
    %c0_i32_1 = arith.constant 0 : i32
    return %arg0, %c0_i32, %c0_i32_0 : i32, i32, i32
  }
  func.func @transform_8(%arg0: i32) -> (i32, i32, i32) {
    %c0_i32 = arith.constant 0 : i32
    %c0_i32_0 = arith.constant 0 : i32
    %c0_i32_1 = arith.constant 0 : i32
    return %arg0, %c0_i32, %c0_i32_0 : i32, i32, i32
  }
}

module attributes {stable_mosaic.version = 11 : i64} {
  func.func @_conv2_kernel(%arg0: i32, %arg1: memref<1x8x8x128xf32, #tpu.memory_space<vmem>>, %arg2: memref<1x8xf32, #tpu.memory_space<vmem>>, %arg3: memref<1x8xf32, #tpu.memory_space<vmem>>, %arg4: memref<72x128xf32, #tpu.memory_space<vmem>>, %arg5: memref<1x128xf32, #tpu.memory_space<vmem>>, %arg6: memref<1x64x128xf32, #tpu.memory_space<vmem>>, %arg7: memref<1x64x128xf32, #tpu.memory_space<vmem>>, %arg8: memref<10x10x8xf32, #tpu.memory_space<vmem>>) attributes {dimension_semantics = [#tpu.dimension_semantics<parallel>], iteration_bounds = array<i64: 2>, scalar_prefetch = 0 : i64, scratch_operands = 1 : i64, tpu.core_type = #tpu.core_type<tc>, window_params = [{transform_indices = @transform_0, window_bounds = array<i64: 1, 8, 8, 128>}, {pipeline_mode = #tpu.pipeline_mode<synchronous>, transform_indices = @transform_1, window_bounds = array<i64: 1, 8>}, {pipeline_mode = #tpu.pipeline_mode<synchronous>, transform_indices = @transform_2, window_bounds = array<i64: 1, 8>}, {pipeline_mode = #tpu.pipeline_mode<synchronous>, transform_indices = @transform_3, window_bounds = array<i64: 72, 128>}, {pipeline_mode = #tpu.pipeline_mode<synchronous>, transform_indices = @transform_4, window_bounds = array<i64: 1, 128>}, {transform_indices = @transform_5, window_bounds = array<i64: 1, 64, 128>}, {transform_indices = @transform_6, window_bounds = array<i64: 1, 64, 128>}]} {
    %c0 = arith.constant 0 : index
    %c0_0 = arith.constant 0 : index
    %c0_1 = arith.constant 0 : index
    %c0_2 = arith.constant 0 : index
    %0 = vector.load %arg1[%c0, %c0_0, %c0_1, %c0_2] : memref<1x8x8x128xf32, #tpu.memory_space<vmem>>, vector<1x8x8x8xf32>
    %1 = vector.shape_cast %0 : vector<1x8x8x8xf32> to vector<8x8x8xf32>
    %c0_3 = arith.constant 0 : index
    %c0_4 = arith.constant 0 : index
    %2 = vector.load %arg2[%c0_3, %c0_4] : memref<1x8xf32, #tpu.memory_space<vmem>>, vector<1x8xf32>
    %3 = vector.shape_cast %2 : vector<1x8xf32> to vector<1x1x8xf32>
    %4 = vector.broadcast %3 : vector<1x1x8xf32> to vector<8x8x8xf32>
    %5 = arith.mulf %1, %4 : vector<8x8x8xf32>
    %c0_5 = arith.constant 0 : index
    %c0_6 = arith.constant 0 : index
    %6 = vector.load %arg3[%c0_5, %c0_6] : memref<1x8xf32, #tpu.memory_space<vmem>>, vector<1x8xf32>
    %7 = vector.shape_cast %6 : vector<1x8xf32> to vector<1x1x8xf32>
    %8 = vector.broadcast %7 : vector<1x1x8xf32> to vector<8x8x8xf32>
    %9 = arith.addf %5, %8 : vector<8x8x8xf32>
    %cst = arith.constant 0.000000e+00 : f32
    %10 = vector.broadcast %cst : f32 to vector<8x8x8xf32>
    %11 = arith.maximumf %9, %10 : vector<8x8x8xf32>
    %cst_7 = arith.constant 0.000000e+00 : f32
    %12 = vector.broadcast %cst_7 : f32 to vector<10x10x8xf32>
    %c0_8 = arith.constant 0 : index
    %c0_9 = arith.constant 0 : index
    %c0_10 = arith.constant 0 : index
    %13 = vector.load %arg8[%c0_8, %c0_9, %c0_10] : memref<10x10x8xf32, #tpu.memory_space<vmem>>, vector<10x10x8xf32>
    tpu.vector_store %arg8[%c0_8, %c0_9, %c0_10], %12 {strides = array<i32>} : memref<10x10x8xf32, #tpu.memory_space<vmem>>, vector<10x10x8xf32>,
    %c1 = arith.constant 1 : index
    %c1_11 = arith.constant 1 : index
    %c0_12 = arith.constant 0 : index
    %14 = vector.load %arg8[%c1, %c1_11, %c0_12] : memref<10x10x8xf32, #tpu.memory_space<vmem>>, vector<8x8x8xf32>
    tpu.vector_store %arg8[%c1, %c1_11, %c0_12], %11 {strides = array<i32>} : memref<10x10x8xf32, #tpu.memory_space<vmem>>, vector<8x8x8xf32>,
    %c0_13 = arith.constant 0 : index
    %c0_14 = arith.constant 0 : index
    %c0_15 = arith.constant 0 : index
    %15 = vector.load %arg8[%c0_13, %c0_14, %c0_15] : memref<10x10x8xf32, #tpu.memory_space<vmem>>, vector<8x8x8xf32>
    %c0_16 = arith.constant 0 : index
    %c1_17 = arith.constant 1 : index
    %c0_18 = arith.constant 0 : index
    %16 = vector.load %arg8[%c0_16, %c1_17, %c0_18] : memref<10x10x8xf32, #tpu.memory_space<vmem>>, vector<8x8x8xf32>
    %c0_19 = arith.constant 0 : index
    %c2 = arith.constant 2 : index
    %c0_20 = arith.constant 0 : index
    %17 = vector.load %arg8[%c0_19, %c2, %c0_20] : memref<10x10x8xf32, #tpu.memory_space<vmem>>, vector<8x8x8xf32>
    %c1_21 = arith.constant 1 : index
    %c0_22 = arith.constant 0 : index
    %c0_23 = arith.constant 0 : index
    %18 = vector.load %arg8[%c1_21, %c0_22, %c0_23] : memref<10x10x8xf32, #tpu.memory_space<vmem>>, vector<8x8x8xf32>
    %c1_24 = arith.constant 1 : index
    %c1_25 = arith.constant 1 : index
    %c0_26 = arith.constant 0 : index
    %19 = vector.load %arg8[%c1_24, %c1_25, %c0_26] : memref<10x10x8xf32, #tpu.memory_space<vmem>>, vector<8x8x8xf32>
    %c1_27 = arith.constant 1 : index
    %c2_28 = arith.constant 2 : index
    %c0_29 = arith.constant 0 : index
    %20 = vector.load %arg8[%c1_27, %c2_28, %c0_29] : memref<10x10x8xf32, #tpu.memory_space<vmem>>, vector<8x8x8xf32>
    %c2_30 = arith.constant 2 : index
    %c0_31 = arith.constant 0 : index
    %c0_32 = arith.constant 0 : index
    %21 = vector.load %arg8[%c2_30, %c0_31, %c0_32] : memref<10x10x8xf32, #tpu.memory_space<vmem>>, vector<8x8x8xf32>
    %c2_33 = arith.constant 2 : index
    %c1_34 = arith.constant 1 : index
    %c0_35 = arith.constant 0 : index
    %22 = vector.load %arg8[%c2_33, %c1_34, %c0_35] : memref<10x10x8xf32, #tpu.memory_space<vmem>>, vector<8x8x8xf32>
    %c2_36 = arith.constant 2 : index
    %c2_37 = arith.constant 2 : index
    %c0_38 = arith.constant 0 : index
    %23 = vector.load %arg8[%c2_36, %c2_37, %c0_38] : memref<10x10x8xf32, #tpu.memory_space<vmem>>, vector<8x8x8xf32>
    %24 = tpu.concatenate %15, %16, %17, %18, %19, %20, %21, %22, %23 in 2 : vector<8x8x8xf32>, vector<8x8x8xf32>, vector<8x8x8xf32>, vector<8x8x8xf32>, vector<8x8x8xf32>, vector<8x8x8xf32>, vector<8x8x8xf32>, vector<8x8x8xf32>, vector<8x8x8xf32> -> vector<8x8x72xf32>
    %25 = vector.shape_cast %24 : vector<8x8x72xf32> to vector<64x72xf32>
    %c0_39 = arith.constant 0 : index
    %c0_40 = arith.constant 0 : index
    %26 = vector.load %arg4[%c0_39, %c0_40] : memref<72x128xf32, #tpu.memory_space<vmem>>, vector<72x128xf32>
    %cst_41 = arith.constant dense<0.000000e+00> : vector<64x128xf32>
    %27 = tpu.matmul %25, %26, %cst_41 {dimension_numbers = #tpu.dot_dimension_numbers<[1], [0], [0], [1], [0, 0, 1, 1], [], []>} : vector<64x72xf32>, vector<72x128xf32>, vector<64x128xf32> -> vector<64x128xf32>
    %c0_42 = arith.constant 0 : index
    %c0_43 = arith.constant 0 : index
    %28 = vector.load %arg5[%c0_42, %c0_43] : memref<1x128xf32, #tpu.memory_space<vmem>>, vector<1x128xf32>
    %29 = vector.broadcast %28 : vector<1x128xf32> to vector<64x128xf32>
    %30 = arith.addf %27, %29 : vector<64x128xf32>
    %c0_44 = arith.constant 0 : index
    %c0_45 = arith.constant 0 : index
    %c0_46 = arith.constant 0 : index
    %31 = vector.load %arg6[%c0_44, %c0_45, %c0_46] : memref<1x64x128xf32, #tpu.memory_space<vmem>>, vector<1x64x128xf32>
    %32 = vector.shape_cast %31 : vector<1x64x128xf32> to vector<64x128xf32>
    %33 = arith.addf %30, %32 : vector<64x128xf32>
    %c0_47 = arith.constant 0 : index
    %c0_48 = arith.constant 0 : index
    %c0_49 = arith.constant 0 : index
    %34 = vector.load %arg7[%c0_47, %c0_48, %c0_49] : memref<1x64x128xf32, #tpu.memory_space<vmem>>, vector<1x64x128xf32>
    %35 = vector.shape_cast %34 : vector<1x64x128xf32> to vector<64x128xf32>
    %36 = vector.shape_cast %33 : vector<64x128xf32> to vector<1x64x128xf32>
    tpu.vector_store %arg7[%c0_47, %c0_48, %c0_49], %36 {strides = array<i32>} : memref<1x64x128xf32, #tpu.memory_space<vmem>>, vector<1x64x128xf32>,
    return
  }
  func.func @transform_0(%arg0: i32) -> (i32, i32, i32, i32) {
    %c0_i32 = arith.constant 0 : i32
    %c0_i32_0 = arith.constant 0 : i32
    %c0_i32_1 = arith.constant 0 : i32
    %c0_i32_2 = arith.constant 0 : i32
    return %arg0, %c0_i32, %c0_i32_0, %c0_i32_1 : i32, i32, i32, i32
  }
  func.func @transform_1(%arg0: i32) -> (i32, i32) {
    %c0_i32 = arith.constant 0 : i32
    %c0_i32_0 = arith.constant 0 : i32
    %c0_i32_1 = arith.constant 0 : i32
    return %c0_i32, %c0_i32_0 : i32, i32
  }
  func.func @transform_2(%arg0: i32) -> (i32, i32) {
    %c0_i32 = arith.constant 0 : i32
    %c0_i32_0 = arith.constant 0 : i32
    %c0_i32_1 = arith.constant 0 : i32
    return %c0_i32, %c0_i32_0 : i32, i32
  }
  func.func @transform_3(%arg0: i32) -> (i32, i32) {
    %c0_i32 = arith.constant 0 : i32
    %c0_i32_0 = arith.constant 0 : i32
    %c0_i32_1 = arith.constant 0 : i32
    return %c0_i32, %c0_i32_0 : i32, i32
  }
  func.func @transform_4(%arg0: i32) -> (i32, i32) {
    %c0_i32 = arith.constant 0 : i32
    %c0_i32_0 = arith.constant 0 : i32
    %c0_i32_1 = arith.constant 0 : i32
    return %c0_i32, %c0_i32_0 : i32, i32
  }
  func.func @transform_5(%arg0: i32) -> (i32, i32, i32) {
    %c0_i32 = arith.constant 0 : i32
    %c0_i32_0 = arith.constant 0 : i32
    %c0_i32_1 = arith.constant 0 : i32
    return %arg0, %c0_i32, %c0_i32_0 : i32, i32, i32
  }
  func.func @transform_6(%arg0: i32) -> (i32, i32, i32) {
    %c0_i32 = arith.constant 0 : i32
    %c0_i32_0 = arith.constant 0 : i32
    %c0_i32_1 = arith.constant 0 : i32
    return %arg0, %c0_i32, %c0_i32_0 : i32, i32, i32
  }
}

</mosaic_0001>

<bundles_post_ra>
// kernel: res_block_forward.6
= control target key start
LH: loop header
LB: loop body
LE: loop exit
PB: predicated region body
PF: predicated region fallthrough
CT: control target
= control target key end

     0   :  { %v105_v0 = vmov 0.0   ;;  %s187_s1 = inlined_call_operand.vmem [shape: f32[1,128], index: 1, kind: output, shape index: {0}]   ;;  %s188_s2 = inlined_call_operand.vmem [shape: f32[1,128], index: 2, kind: output, shape index: {1}]   ;;  %s189_s0 = inlined_call_operand.vmem [shape: f32[128,128], index: 0, kind: input, shape index: {}]  }
   0x1   :  { %14 = vst [vmem:[%s187_s1] sm:$0x1] %v105_v0  ;;  %v16_v1 = vld [vmem:[%s189_s0] sm:$0xff]  ;;  %v17_v2 = vld [vmem:[%s189_s0 + $0x8] sm:$0xff]  ;;  %v18_v3 = vld [vmem:[%s189_s0 + $0x10] sm:$0xff] }
   0x2   :  { %15 = vst [vmem:[%s188_s2] sm:$0x1] %v105_v0  ;;  %v19_v4 = vld [vmem:[%s189_s0 + $0x18] sm:$0xff]  ;;  %v33_v5 = vadd.f32 %v17_v2, %v16_v1  ;;  %v57_v6 = vmul.f32 %v16_v1, %v16_v1  ;;  %v58_v7 = vmul.f32 %v17_v2, %v17_v2  ;;  %v59_v8 = vmul.f32 %v18_v3, %v18_v3  ;;  %v20_v9 = vld [vmem:[%s189_s0 + $0x20] sm:$0xff]  ;;  %v21_v13 = vld [vmem:[%s189_s0 + $0x28] sm:$0xff] }
   0x3   :  { %v60_v11 = vmul.f32 %v19_v4, %v19_v4  ;;  %v61_v15 = vmul.f32 %v20_v9, %v20_v9  ;;  %v22_v17 = vld [vmem:[%s189_s0 + $0x30] sm:$0xff]  ;;  %v62_v19 = vmul.f32 %v21_v13, %v21_v13  ;;  %v23_v21 = vld [vmem:[%s189_s0 + $0x38] sm:$0xff]  ;;  %v24_v25 = vld [vmem:[%s189_s0 + $0x40] sm:$0xff] }
   0x4   :  { %v34_v10 = vadd.f32 %v33_v5, %v18_v3  ;;  %v73_v12 = vadd.f32 %v58_v7, %v57_v6  ;;  %v63_v23 = vmul.f32 %v22_v17, %v22_v17  ;;  %v64_v27 = vmul.f32 %v23_v21, %v23_v21  ;;  %v25_v29 = vld [vmem:[%s189_s0 + $0x48] sm:$0xff]  ;;  %v26_v33 = vld [vmem:[%s189_s0 + $0x50] sm:$0xff]  ;;  %v27_v37 = vld [vmem:[%s189_s0 + $0x58] sm:$0xff] }
   0x5   :  { %v65_v31 = vmul.f32 %v24_v25, %v24_v25  ;;  %v66_v35 = vmul.f32 %v25_v29, %v25_v29  ;;  %v67_v39 = vmul.f32 %v26_v33, %v26_v33  ;;  %v28_v41 = vld [vmem:[%s189_s0 + $0x60] sm:$0xff]  ;;  %v68_v43 = vmul.f32 %v27_v37, %v27_v37  ;;  %v29_v45 = vld [vmem:[%s189_s0 + $0x68] sm:$0xff]  ;;  %v30_v49 = vld [vmem:[%s189_s0 + $0x70] sm:$0xff] }
   0x6   :  { %v35_v14 = vadd.f32 %v34_v10, %v19_v4  ;;  %v74_v16 = vadd.f32 %v73_v12, %v59_v8  ;;  %v69_v47 = vmul.f32 %v28_v41, %v28_v41  ;;  %v70_v51 = vmul.f32 %v29_v45, %v29_v45  ;;  %v31_v53 = vld [vmem:[%s189_s0 + $0x78] sm:$0xff] }
   0x7   :  { %v71_v55 = vmul.f32 %v30_v49, %v30_v49  ;;  %v72_v58 = vmul.f32 %v31_v53, %v31_v53 }
   0x8   :  { %v36_v18 = vadd.f32 %v35_v14, %v20_v9  ;;  %v75_v20 = vadd.f32 %v74_v16, %v60_v11  ;;  %v32_v7 = vld [vmem:[%s187_s1] sm:$0x1] }
   0x9   :  { %v56_v12 = vld [vmem:[%s188_s2] sm:$0x1] }
   0xa   :  { %v37_v22 = vadd.f32 %v36_v18, %v21_v13  ;;  %v76_v24 = vadd.f32 %v75_v20, %v61_v15 }
   0xc   :  { %v38_v26 = vadd.f32 %v37_v22, %v22_v17  ;;  %v77_v28 = vadd.f32 %v76_v24, %v62_v19 }
   0xe   :  { %v39_v30 = vadd.f32 %v38_v26, %v23_v21  ;;  %v78_v32 = vadd.f32 %v77_v28, %v63_v23 }
  0x10   :  { %v40_v34 = vadd.f32 %v39_v30, %v24_v25  ;;  %v79_v36 = vadd.f32 %v78_v32, %v64_v27 }
  0x12   :  { %v41_v38 = vadd.f32 %v40_v34, %v25_v29  ;;  %v80_v40 = vadd.f32 %v79_v36, %v65_v31 }
  0x14   :  { %v42_v42 = vadd.f32 %v41_v38, %v26_v33  ;;  %v81_v44 = vadd.f32 %v80_v40, %v66_v35 }
  0x16   :  { %v43_v46 = vadd.f32 %v42_v42, %v27_v37  ;;  %v82_v48 = vadd.f32 %v81_v44, %v67_v39 }
  0x18   :  { %v44_v50 = vadd.f32 %v43_v46, %v28_v41  ;;  %v83_v52 = vadd.f32 %v82_v48, %v68_v43 }
  0x1a   :  { %v45_v54 = vadd.f32 %v44_v50, %v29_v45  ;;  %v84_v56 = vadd.f32 %v83_v52, %v69_v47 }
  0x1c   :  { %v46_v57 = vadd.f32 %v45_v54, %v30_v49  ;;  %v85_v59 = vadd.f32 %v84_v56, %v70_v51 }
  0x1e   :  { %v47_v60 = vadd.f32 %v46_v57, %v31_v53  ;;  %v86_v61 = vadd.f32 %v85_v59, %v71_v55 }
  0x20   :  { %v48_v62 = vrot.slane %v47_v60, 4  ;;  %v87_v63 = vadd.f32 %v86_v61, %v72_v58 }
  0x22   :  { %v49_v0 = vadd.f32 %v48_v62, %v47_v60  ;;  %v88_v1 = vrot.slane %v87_v63, 4 }
  0x24   :  { %v50_v2 = vrot.slane %v49_v0, 2  ;;  %v89_v3 = vadd.f32 %v88_v1, %v87_v63 }
  0x26   :  { %v51_v4 = vadd.f32 %v50_v2, %v49_v0  ;;  %v90_v5 = vrot.slane %v89_v3, 2 }
  0x28   :  { %v52_v6 = vrot.slane %v51_v4, 1  ;;  %v91_v8 = vadd.f32 %v90_v5, %v89_v3 }
  0x2a   :  { %v53_v9 = vadd.f32 %v52_v6, %v51_v4  ;;  %v92_v10 = vrot.slane %v91_v8, 1 }
  0x2c   :  { %v54_v11 = vadd.f32 %v53_v9, %v32_v7  ;;  %v93_v13 = vadd.f32 %v92_v10, %v91_v8 }
  0x2e   :  { %55 = vst [vmem:[%s187_s1] sm:$0x1] %v54_v11  ;;  %v94_v14 = vadd.f32 %v93_v13, %v56_v12 }
  0x30   :  { %95 = vst [vmem:[%s188_s2] sm:$0x1] %v94_v14 }

// kernel: res_block_forward.4
= control target key start
LH: loop header
LB: loop body
LE: loop exit
PB: predicated region body
PF: predicated region fallthrough
CT: control target
= control target key end

     0   :  { %vm14_vm0 = vcmask 24576   ;;  %vm82_vm1 = vcmask 31744   ;;  %v428_v0 = vmov 0.0   ;;  %s786_s0 = inlined_call_operand.vmem [shape: f32[512,4], index: 0, kind: input, shape index: {}]   ;;  %s787_s1 = inlined_call_operand.vmem [shape: f32[1,4], index: 1, kind: output, shape index: {0}]   ;;  %s788_s2 = inlined_call_operand.vmem [shape: f32[1,4], index: 2, kind: output, shape index: {1}]  }
   0x1   :  { %15 = vst.msk [vmem:[%s787_s1] sm:$0x1] %vm14_vm0, %v428_v0  ;;  %v17_v1 = vld [vmem:[%s786_s0] sm:$0xff]  ;;  %v18_v2 = vld [vmem:[%s786_s0 + $0x8] sm:$0xff]  ;;  %v19_v3 = vld [vmem:[%s786_s0 + $0x10] sm:$0xff] }
   0x2   :  { %16 = vst.msk [vmem:[%s788_s2] sm:$0x1] %vm14_vm0, %v428_v0  ;;  %v83_v4 = vsel %vm82_vm1, %v17_v1, 0.0  ;;  %v84_v5 = vsel %vm82_vm1, %v18_v2, 0.0  ;;  %v86_v6 = vsel %vm82_vm1, %v19_v3, 0.0  ;;  %v20_v7 = vld [vmem:[%s786_s0 + $0x18] sm:$0xff]  ;;  %v220_v19 = vmul.f32 %v17_v1, %v17_v1 }
   0x3   :  { %v85_v8 = vadd.f32 %v84_v5, %v83_v4  ;;  %v88_v9 = vsel %vm82_vm1, %v20_v7, 0.0  ;;  %v21_v10 = vld [vmem:[%s786_s0 + $0x20] sm:$0xff]  ;;  %v22_v13 = vld [vmem:[%s786_s0 + $0x28] sm:$0xff]  ;;  %v23_v16 = vld [vmem:[%s786_s0 + $0x30] sm:$0xff]  ;;  %v221_v20 = vmul.f32 %v18_v2, %v18_v2  ;;  %v222_v24 = vmul.f32 %v19_v3, %v19_v3 }
   0x4   :  { %v90_v12 = vsel %vm82_vm1, %v21_v10, 0.0  ;;  %v92_v15 = vsel %vm82_vm1, %v22_v13, 0.0  ;;  %v94_v18 = vsel %vm82_vm1, %v23_v16, 0.0  ;;  %v24_v21 = vld [vmem:[%s786_s0 + $0x38] sm:$0xff]  ;;  %v223_v25 = vmul.f32 %v20_v7, %v20_v7  ;;  %v25_v26 = vld [vmem:[%s786_s0 + $0x40] sm:$0xff]  ;;  %v26_v32 = vld [vmem:[%s786_s0 + $0x48] sm:$0xff] }
   0x5   :  { %v87_v11 = vadd.f32 %v86_v6, %v85_v8  ;;  %v96_v23 = vsel %vm82_vm1, %v24_v21, 0.0  ;;  %v98_v28 = vsel %vm82_vm1, %v25_v26, 0.0  ;;  %v224_v29 = vmul.f32 %v21_v10, %v21_v10  ;;  %v27_v39 = vld [vmem:[%s786_s0 + $0x50] sm:$0xff]  ;;  %v28_v45 = vld [vmem:[%s786_s0 + $0x58] sm:$0xff]  ;;  %v29_v51 = vld [vmem:[%s786_s0 + $0x60] sm:$0xff] }
   0x6   :  { %v284_v30 = vsel %vm82_vm1, %v220_v19, 0.0  ;;  %v285_v31 = vsel %vm82_vm1, %v221_v20, 0.0  ;;  %v100_v35 = vsel %vm82_vm1, %v26_v32, 0.0  ;;  %v225_v36 = vmul.f32 %v22_v13, %v22_v13  ;;  %v30_v57 = vld [vmem:[%s786_s0 + $0x68] sm:$0xff]  ;;  %v31_v63 = vld [vmem:[%s786_s0 + $0x70] sm:$0xff]  ;;  %v32_v5 = vld [vmem:[%s786_s0 + $0x78] sm:$0xff] }
   0x7   :  { %v89_v14 = vadd.f32 %v88_v9, %v87_v11  ;;  %v286_v34 = vadd.f32 %v285_v31, %v284_v30  ;;  %v287_v37 = vsel %vm82_vm1, %v222_v24, 0.0  ;;  %v289_v38 = vsel %vm82_vm1, %v223_v25, 0.0  ;;  %v33_v11 = vld [vmem:[%s786_s0 + $0x80] sm:$0xff] }
   0x8   :  { %v102_v42 = vsel %vm82_vm1, %v27_v39, 0.0  ;;  %v226_v43 = vmul.f32 %v23_v16, %v23_v16  ;;  %v291_v44 = vsel %vm82_vm1, %v224_v29, 0.0  ;;  %v104_v48 = vsel %vm82_vm1, %v28_v45, 0.0  ;;  %v36_v29 = vld [vmem:[%s786_s0 + $0x98] sm:$0xff] }
   0x9   :  { %v91_v17 = vadd.f32 %v90_v12, %v89_v14  ;;  %v288_v41 = vadd.f32 %v287_v37, %v286_v34  ;;  %v227_v49 = vmul.f32 %v24_v21, %v24_v21  ;;  %v293_v50 = vsel %vm82_vm1, %v225_v36, 0.0 }
   0xa   :  { %v106_v54 = vsel %vm82_vm1, %v29_v51, 0.0  ;;  %v228_v55 = vmul.f32 %v25_v26, %v25_v26  ;;  %v295_v56 = vsel %vm82_vm1, %v226_v43, 0.0  ;;  %v108_v60 = vsel %vm82_vm1, %v30_v57, 0.0 }
   0xb   :  { %v93_v22 = vadd.f32 %v92_v15, %v91_v17  ;;  %v290_v47 = vadd.f32 %v289_v38, %v288_v41  ;;  %v229_v61 = vmul.f32 %v26_v32, %v26_v32  ;;  %v297_v62 = vsel %vm82_vm1, %v227_v49, 0.0  ;;  %v34_v17 = vld [vmem:[%s786_s0 + $0x88] sm:$0xff] }
   0xc   :  { %v110_v2 = vsel %vm82_vm1, %v31_v63, 0.0  ;;  %v230_v3 = vmul.f32 %v27_v39, %v27_v39  ;;  %v299_v4 = vsel %vm82_vm1, %v228_v55, 0.0  ;;  %v112_v8 = vsel %vm82_vm1, %v32_v5, 0.0  ;;  %v38_v41 = vld [vmem:[%s786_s0 + $0xa8] sm:$0xff] }
   0xd   :  { %v95_v27 = vadd.f32 %v94_v18, %v93_v22  ;;  %v292_v53 = vadd.f32 %v291_v44, %v290_v47  ;;  %v231_v9 = vmul.f32 %v28_v45, %v28_v45  ;;  %v301_v10 = vsel %vm82_vm1, %v229_v61, 0.0  ;;  %v39_v47 = vld [vmem:[%s786_s0 + $0xb0] sm:$0xff] }
   0xe   :  { %v114_v14 = vsel %vm82_vm1, %v33_v11, 0.0  ;;  %v232_v15 = vmul.f32 %v29_v51, %v29_v51  ;;  %v303_v16 = vsel %vm82_vm1, %v230_v3, 0.0  ;;  %v116_v20 = vsel %vm82_vm1, %v34_v17, 0.0 }
   0xf   :  { %v97_v33 = vadd.f32 %v96_v23, %v95_v27  ;;  %v294_v59 = vadd.f32 %v293_v50, %v292_v53  ;;  %v233_v21 = vmul.f32 %v30_v57, %v30_v57  ;;  %v305_v22 = vsel %vm82_vm1, %v231_v9, 0.0  ;;  %v35_v23 = vld [vmem:[%s786_s0 + $0x90] sm:$0xff]  ;;  %v40_v53 = vld [vmem:[%s786_s0 + $0xb8] sm:$0xff] }
  0x10   :  { %v118_v26 = vsel %vm82_vm1, %v35_v23, 0.0  ;;  %v234_v27 = vmul.f32 %v31_v63, %v31_v63  ;;  %v120_v32 = vsel %vm82_vm1, %v36_v29, 0.0  ;;  %v236_v39 = vmul.f32 %v33_v11, %v33_v11 }
  0x11   :  { %v99_v40 = vadd.f32 %v98_v28, %v97_v33  ;;  %v296_v1 = vadd.f32 %v295_v56, %v294_v59  ;;  %v307_v28 = vsel %vm82_vm1, %v232_v15, 0.0  ;;  %v235_v33 = vmul.f32 %v32_v5, %v32_v5  ;;  %v41_v59 = vld [vmem:[%s786_s0 + $0xc0] sm:$0xff] }
  0x12   :  { %v309_v34 = vsel %vm82_vm1, %v233_v21, 0.0  ;;  %v124_v44 = vsel %vm82_vm1, %v38_v41, 0.0  ;;  %v237_v45 = vmul.f32 %v34_v17, %v34_v17  ;;  %v126_v50 = vsel %vm82_vm1, %v39_v47, 0.0 }
  0x13   :  { %v101_v46 = vadd.f32 %v100_v35, %v99_v40  ;;  %v298_v7 = vadd.f32 %v297_v62, %v296_v1  ;;  %v37_v35 = vld [vmem:[%s786_s0 + $0xa0] sm:$0xff]  ;;  %v311_v40 = vsel %vm82_vm1, %v234_v27, 0.0  ;;  %v238_v51 = vmul.f32 %v35_v23, %v35_v23  ;;  %v42_v1 = vld [vmem:[%s786_s0 + $0xc8] sm:$0xff] }
  0x14   :  { %v122_v38 = vsel %vm82_vm1, %v37_v35, 0.0  ;;  %v128_v56 = vsel %vm82_vm1, %v40_v53, 0.0  ;;  %v239_v57 = vmul.f32 %v36_v29, %v36_v29  ;;  %v130_v62 = vsel %vm82_vm1, %v41_v59, 0.0 }
  0x15   :  { %v103_v52 = vadd.f32 %v102_v42, %v101_v46  ;;  %v300_v13 = vadd.f32 %v299_v4, %v298_v7  ;;  %v313_v46 = vsel %vm82_vm1, %v235_v33, 0.0  ;;  %v240_v63 = vmul.f32 %v37_v35, %v37_v35  ;;  %v43_v7 = vld [vmem:[%s786_s0 + $0xd0] sm:$0xff] }
  0x16   :  { %v132_v4 = vsel %vm82_vm1, %v42_v1, 0.0  ;;  %v241_v5 = vmul.f32 %v38_v41, %v38_v41  ;;  %v242_v11 = vmul.f32 %v39_v47, %v39_v47  ;;  %v243_v17 = vmul.f32 %v40_v53, %v40_v53 }
  0x17   :  { %v105_v58 = vadd.f32 %v104_v48, %v103_v52  ;;  %v302_v19 = vadd.f32 %v301_v10, %v300_v13  ;;  %v315_v52 = vsel %vm82_vm1, %v236_v39, 0.0  ;;  %v134_v10 = vsel %vm82_vm1, %v43_v7, 0.0  ;;  %v44_v13 = vld [vmem:[%s786_s0 + $0xd8] sm:$0xff] }
  0x18   :  { %v244_v23 = vmul.f32 %v41_v59, %v41_v59  ;;  %v245_v29 = vmul.f32 %v42_v1, %v42_v1  ;;  %v246_v35 = vmul.f32 %v43_v7, %v43_v7  ;;  %v247_v41 = vmul.f32 %v44_v13, %v44_v13 }
  0x19   :  { %v107_v0 = vadd.f32 %v106_v54, %v105_v58  ;;  %v304_v25 = vadd.f32 %v303_v16, %v302_v19  ;;  %v317_v58 = vsel %vm82_vm1, %v237_v45, 0.0  ;;  %v136_v16 = vsel %vm82_vm1, %v44_v13, 0.0  ;;  %v45_v19 = vld [vmem:[%s786_s0 + $0xe0] sm:$0xff] }
  0x1a   :  { %v248_v47 = vmul.f32 %v45_v19, %v45_v19 }
  0x1b   :  { %v109_v6 = vadd.f32 %v108_v60, %v107_v0  ;;  %v306_v31 = vadd.f32 %v305_v22, %v304_v25  ;;  %v319_v0 = vsel %vm82_vm1, %v238_v51, 0.0  ;;  %v138_v22 = vsel %vm82_vm1, %v45_v19, 0.0  ;;  %v46_v25 = vld [vmem:[%s786_s0 + $0xe8] sm:$0xff] }
  0x1c   :  { %v249_v53 = vmul.f32 %v46_v25, %v46_v25 }
  0x1d   :  { %v111_v12 = vadd.f32 %v110_v2, %v109_v6  ;;  %v308_v37 = vadd.f32 %v307_v28, %v306_v31  ;;  %v321_v6 = vsel %vm82_vm1, %v239_v57, 0.0  ;;  %v140_v28 = vsel %vm82_vm1, %v46_v25, 0.0  ;;  %v47_v31 = vld [vmem:[%s786_s0 + $0xf0] sm:$0xff] }
  0x1e   :  { %v250_v59 = vmul.f32 %v47_v31, %v47_v31 }
  0x1f   :  { %v113_v18 = vadd.f32 %v112_v8, %v111_v12  ;;  %v310_v43 = vadd.f32 %v309_v34, %v308_v37  ;;  %v323_v12 = vsel %vm82_vm1, %v240_v63, 0.0  ;;  %v142_v34 = vsel %vm82_vm1, %v47_v31, 0.0  ;;  %v48_v37 = vld [vmem:[%s786_s0 + $0xf8] sm:$0xff] }
  0x20   :  { %v251_v1 = vmul.f32 %v48_v37, %v48_v37 }
  0x21   :  { %v115_v24 = vadd.f32 %v114_v14, %v113_v18  ;;  %v312_v49 = vadd.f32 %v311_v40, %v310_v43  ;;  %v325_v18 = vsel %vm82_vm1, %v241_v5, 0.0  ;;  %v144_v40 = vsel %vm82_vm1, %v48_v37, 0.0  ;;  %v49_v43 = vld [vmem:[%s786_s0 + $0x100] sm:$0xff] }
  0x22   :  { %v252_v7 = vmul.f32 %v49_v43, %v49_v43 }
  0x23   :  { %v117_v30 = vadd.f32 %v116_v20, %v115_v24  ;;  %v314_v55 = vadd.f32 %v313_v46, %v312_v49  ;;  %v327_v24 = vsel %vm82_vm1, %v242_v11, 0.0  ;;  %v146_v46 = vsel %vm82_vm1, %v49_v43, 0.0  ;;  %v50_v49 = vld [vmem:[%s786_s0 + $0x108] sm:$0xff] }
  0x24   :  { %v253_v13 = vmul.f32 %v50_v49, %v50_v49 }
  0x25   :  { %v119_v36 = vadd.f32 %v118_v26, %v117_v30  ;;  %v316_v61 = vadd.f32 %v315_v52, %v314_v55  ;;  %v329_v30 = vsel %vm82_vm1, %v243_v17, 0.0  ;;  %v148_v52 = vsel %vm82_vm1, %v50_v49, 0.0  ;;  %v51_v55 = vld [vmem:[%s786_s0 + $0x110] sm:$0xff] }
  0x26   :  { %v254_v19 = vmul.f32 %v51_v55, %v51_v55 }
  0x27   :  { %v121_v42 = vadd.f32 %v120_v32, %v119_v36  ;;  %v318_v3 = vadd.f32 %v317_v58, %v316_v61  ;;  %v331_v36 = vsel %vm82_vm1, %v244_v23, 0.0  ;;  %v150_v58 = vsel %vm82_vm1, %v51_v55, 0.0  ;;  %v52_v61 = vld [vmem:[%s786_s0 + $0x118] sm:$0xff] }
  0x28   :  { %v255_v25 = vmul.f32 %v52_v61, %v52_v61 }
  0x29   :  { %v123_v48 = vadd.f32 %v122_v38, %v121_v42  ;;  %v320_v9 = vadd.f32 %v319_v0, %v318_v3  ;;  %v333_v42 = vsel %vm82_vm1, %v245_v29, 0.0  ;;  %v152_v0 = vsel %vm82_vm1, %v52_v61, 0.0  ;;  %v53_v3 = vld [vmem:[%s786_s0 + $0x120] sm:$0xff] }
  0x2a   :  { %v256_v31 = vmul.f32 %v53_v3, %v53_v3 }
  0x2b   :  { %v125_v54 = vadd.f32 %v124_v44, %v123_v48  ;;  %v322_v15 = vadd.f32 %v321_v6, %v320_v9  ;;  %v335_v48 = vsel %vm82_vm1, %v246_v35, 0.0  ;;  %v154_v6 = vsel %vm82_vm1, %v53_v3, 0.0  ;;  %v54_v9 = vld [vmem:[%s786_s0 + $0x128] sm:$0xff] }
  0x2c   :  { %v257_v37 = vmul.f32 %v54_v9, %v54_v9 }
  0x2d   :  { %v127_v60 = vadd.f32 %v126_v50, %v125_v54  ;;  %v324_v21 = vadd.f32 %v323_v12, %v322_v15  ;;  %v337_v54 = vsel %vm82_vm1, %v247_v41, 0.0  ;;  %v156_v12 = vsel %vm82_vm1, %v54_v9, 0.0  ;;  %v55_v15 = vld [vmem:[%s786_s0 + $0x130] sm:$0xff] }
  0x2e   :  { %v258_v43 = vmul.f32 %v55_v15, %v55_v15 }
  0x2f   :  { %v129_v2 = vadd.f32 %v128_v56, %v127_v60  ;;  %v326_v27 = vadd.f32 %v325_v18, %v324_v21  ;;  %v339_v60 = vsel %vm82_vm1, %v248_v47, 0.0  ;;  %v158_v18 = vsel %vm82_vm1, %v55_v15, 0.0  ;;  %v56_v21 = vld [vmem:[%s786_s0 + $0x138] sm:$0xff] }
  0x30   :  { %v259_v49 = vmul.f32 %v56_v21, %v56_v21 }
  0x31   :  { %v131_v8 = vadd.f32 %v130_v62, %v129_v2  ;;  %v328_v33 = vadd.f32 %v327_v24, %v326_v27  ;;  %v341_v2 = vsel %vm82_vm1, %v249_v53, 0.0  ;;  %v160_v24 = vsel %vm82_vm1, %v56_v21, 0.0  ;;  %v57_v27 = vld [vmem:[%s786_s0 + $0x140] sm:$0xff] }
  0x32   :  { %v260_v55 = vmul.f32 %v57_v27, %v57_v27 }
  0x33   :  { %v133_v14 = vadd.f32 %v132_v4, %v131_v8  ;;  %v330_v39 = vadd.f32 %v329_v30, %v328_v33  ;;  %v343_v8 = vsel %vm82_vm1, %v250_v59, 0.0  ;;  %v162_v30 = vsel %vm82_vm1, %v57_v27, 0.0  ;;  %v58_v33 = vld [vmem:[%s786_s0 + $0x148] sm:$0xff] }
  0x34   :  { %v261_v61 = vmul.f32 %v58_v33, %v58_v33 }
  0x35   :  { %v135_v20 = vadd.f32 %v134_v10, %v133_v14  ;;  %v332_v45 = vadd.f32 %v331_v36, %v330_v39  ;;  %v345_v14 = vsel %vm82_vm1, %v251_v1, 0.0  ;;  %v164_v36 = vsel %vm82_vm1, %v58_v33, 0.0  ;;  %v59_v39 = vld [vmem:[%s786_s0 + $0x150] sm:$0xff] }
  0x36   :  { %v262_v3 = vmul.f32 %v59_v39, %v59_v39 }
  0x37   :  { %v137_v26 = vadd.f32 %v136_v16, %v135_v20  ;;  %v334_v51 = vadd.f32 %v333_v42, %v332_v45  ;;  %v347_v20 = vsel %vm82_vm1, %v252_v7, 0.0  ;;  %v166_v42 = vsel %vm82_vm1, %v59_v39, 0.0  ;;  %v60_v45 = vld [vmem:[%s786_s0 + $0x158] sm:$0xff] }
  0x38   :  { %v263_v9 = vmul.f32 %v60_v45, %v60_v45 }
  0x39   :  { %v139_v32 = vadd.f32 %v138_v22, %v137_v26  ;;  %v336_v57 = vadd.f32 %v335_v48, %v334_v51  ;;  %v349_v26 = vsel %vm82_vm1, %v253_v13, 0.0  ;;  %v168_v48 = vsel %vm82_vm1, %v60_v45, 0.0  ;;  %v61_v51 = vld [vmem:[%s786_s0 + $0x160] sm:$0xff] }
  0x3a   :  { %v264_v15 = vmul.f32 %v61_v51, %v61_v51 }
  0x3b   :  { %v141_v38 = vadd.f32 %v140_v28, %v139_v32  ;;  %v338_v63 = vadd.f32 %v337_v54, %v336_v57  ;;  %v351_v32 = vsel %vm82_vm1, %v254_v19, 0.0  ;;  %v170_v54 = vsel %vm82_vm1, %v61_v51, 0.0  ;;  %v62_v57 = vld [vmem:[%s786_s0 + $0x168] sm:$0xff] }
  0x3c   :  { %v265_v21 = vmul.f32 %v62_v57, %v62_v57 }
  0x3d   :  { %v143_v44 = vadd.f32 %v142_v34, %v141_v38  ;;  %v340_v5 = vadd.f32 %v339_v60, %v338_v63  ;;  %v353_v38 = vsel %vm82_vm1, %v255_v25, 0.0  ;;  %v172_v60 = vsel %vm82_vm1, %v62_v57, 0.0  ;;  %v63_v63 = vld [vmem:[%s786_s0 + $0x170] sm:$0xff] }
  0x3e   :  { %v266_v27 = vmul.f32 %v63_v63, %v63_v63 }
  0x3f   :  { %v145_v50 = vadd.f32 %v144_v40, %v143_v44  ;;  %v342_v11 = vadd.f32 %v341_v2, %v340_v5  ;;  %v355_v44 = vsel %vm82_vm1, %v256_v31, 0.0  ;;  %v174_v2 = vsel %vm82_vm1, %v63_v63, 0.0  ;;  %v64_v5 = vld [vmem:[%s786_s0 + $0x178] sm:$0xff] }
  0x40   :  { %v267_v33 = vmul.f32 %v64_v5, %v64_v5 }
  0x41   :  { %v147_v56 = vadd.f32 %v146_v46, %v145_v50  ;;  %v344_v17 = vadd.f32 %v343_v8, %v342_v11  ;;  %v357_v50 = vsel %vm82_vm1, %v257_v37, 0.0  ;;  %v176_v8 = vsel %vm82_vm1, %v64_v5, 0.0  ;;  %v65_v11 = vld [vmem:[%s786_s0 + $0x180] sm:$0xff] }
  0x42   :  { %v268_v39 = vmul.f32 %v65_v11, %v65_v11 }
  0x43   :  { %v149_v62 = vadd.f32 %v148_v52, %v147_v56  ;;  %v346_v23 = vadd.f32 %v345_v14, %v344_v17  ;;  %v359_v56 = vsel %vm82_vm1, %v258_v43, 0.0  ;;  %v178_v14 = vsel %vm82_vm1, %v65_v11, 0.0  ;;  %v66_v17 = vld [vmem:[%s786_s0 + $0x188] sm:$0xff] }
  0x44   :  { %v269_v45 = vmul.f32 %v66_v17, %v66_v17 }
  0x45   :  { %v151_v4 = vadd.f32 %v150_v58, %v149_v62  ;;  %v348_v29 = vadd.f32 %v347_v20, %v346_v23  ;;  %v361_v62 = vsel %vm82_vm1, %v259_v49, 0.0  ;;  %v180_v20 = vsel %vm82_vm1, %v66_v17, 0.0  ;;  %v67_v23 = vld [vmem:[%s786_s0 + $0x190] sm:$0xff] }
  0x46   :  { %v270_v51 = vmul.f32 %v67_v23, %v67_v23 }
  0x47   :  { %v153_v10 = vadd.f32 %v152_v0, %v151_v4  ;;  %v350_v35 = vadd.f32 %v349_v26, %v348_v29  ;;  %v363_v4 = vsel %vm82_vm1, %v260_v55, 0.0  ;;  %v182_v26 = vsel %vm82_vm1, %v67_v23, 0.0  ;;  %v68_v29 = vld [vmem:[%s786_s0 + $0x198] sm:$0xff] }
  0x48   :  { %v271_v57 = vmul.f32 %v68_v29, %v68_v29 }
  0x49   :  { %v155_v16 = vadd.f32 %v154_v6, %v153_v10  ;;  %v352_v41 = vadd.f32 %v351_v32, %v350_v35  ;;  %v365_v10 = vsel %vm82_vm1, %v261_v61, 0.0  ;;  %v184_v32 = vsel %vm82_vm1, %v68_v29, 0.0  ;;  %v69_v35 = vld [vmem:[%s786_s0 + $0x1a0] sm:$0xff] }
  0x4a   :  { %v272_v63 = vmul.f32 %v69_v35, %v69_v35 }
  0x4b   :  { %v157_v22 = vadd.f32 %v156_v12, %v155_v16  ;;  %v354_v47 = vadd.f32 %v353_v38, %v352_v41  ;;  %v367_v16 = vsel %vm82_vm1, %v262_v3, 0.0  ;;  %v186_v38 = vsel %vm82_vm1, %v69_v35, 0.0  ;;  %v70_v41 = vld [vmem:[%s786_s0 + $0x1a8] sm:$0xff] }
  0x4c   :  { %v273_v5 = vmul.f32 %v70_v41, %v70_v41 }
  0x4d   :  { %v159_v28 = vadd.f32 %v158_v18, %v157_v22  ;;  %v356_v53 = vadd.f32 %v355_v44, %v354_v47  ;;  %v369_v22 = vsel %vm82_vm1, %v263_v9, 0.0  ;;  %v188_v44 = vsel %vm82_vm1, %v70_v41, 0.0  ;;  %v71_v47 = vld [vmem:[%s786_s0 + $0x1b0] sm:$0xff] }
  0x4e   :  { %v274_v11 = vmul.f32 %v71_v47, %v71_v47 }
  0x4f   :  { %v161_v34 = vadd.f32 %v160_v24, %v159_v28  ;;  %v358_v59 = vadd.f32 %v357_v50, %v356_v53  ;;  %v371_v28 = vsel %vm82_vm1, %v264_v15, 0.0  ;;  %v190_v50 = vsel %vm82_vm1, %v71_v47, 0.0  ;;  %v72_v53 = vld [vmem:[%s786_s0 + $0x1b8] sm:$0xff] }
  0x50   :  { %v275_v17 = vmul.f32 %v72_v53, %v72_v53 }
  0x51   :  { %v163_v40 = vadd.f32 %v162_v30, %v161_v34  ;;  %v360_v1 = vadd.f32 %v359_v56, %v358_v59  ;;  %v373_v34 = vsel %vm82_vm1, %v265_v21, 0.0  ;;  %v192_v56 = vsel %vm82_vm1, %v72_v53, 0.0  ;;  %v73_v59 = vld [vmem:[%s786_s0 + $0x1c0] sm:$0xff] }
  0x52   :  { %v276_v23 = vmul.f32 %v73_v59, %v73_v59 }
  0x53   :  { %v165_v46 = vadd.f32 %v164_v36, %v163_v40  ;;  %v362_v7 = vadd.f32 %v361_v62, %v360_v1  ;;  %v375_v40 = vsel %vm82_vm1, %v266_v27, 0.0  ;;  %v194_v62 = vsel %vm82_vm1, %v73_v59, 0.0  ;;  %v74_v1 = vld [vmem:[%s786_s0 + $0x1c8] sm:$0xff] }
  0x54   :  { %v277_v29 = vmul.f32 %v74_v1, %v74_v1 }
  0x55   :  { %v167_v52 = vadd.f32 %v166_v42, %v165_v46  ;;  %v364_v13 = vadd.f32 %v363_v4, %v362_v7  ;;  %v377_v46 = vsel %vm82_vm1, %v267_v33, 0.0  ;;  %v196_v4 = vsel %vm82_vm1, %v74_v1, 0.0  ;;  %v75_v7 = vld [vmem:[%s786_s0 + $0x1d0] sm:$0xff] }
  0x56   :  { %v278_v35 = vmul.f32 %v75_v7, %v75_v7 }
  0x57   :  { %v169_v58 = vadd.f32 %v168_v48, %v167_v52  ;;  %v366_v19 = vadd.f32 %v365_v10, %v364_v13  ;;  %v379_v52 = vsel %vm82_vm1, %v268_v39, 0.0  ;;  %v198_v10 = vsel %vm82_vm1, %v75_v7, 0.0  ;;  %v76_v13 = vld [vmem:[%s786_s0 + $0x1d8] sm:$0xff] }
  0x58   :  { %v279_v41 = vmul.f32 %v76_v13, %v76_v13 }
  0x59   :  { %v171_v0 = vadd.f32 %v170_v54, %v169_v58  ;;  %v368_v25 = vadd.f32 %v367_v16, %v366_v19  ;;  %v381_v58 = vsel %vm82_vm1, %v269_v45, 0.0  ;;  %v200_v16 = vsel %vm82_vm1, %v76_v13, 0.0  ;;  %v77_v19 = vld [vmem:[%s786_s0 + $0x1e0] sm:$0xff] }
  0x5a   :  { %v280_v45 = vmul.f32 %v77_v19, %v77_v19 }
  0x5b   :  { %v173_v6 = vadd.f32 %v172_v60, %v171_v0  ;;  %v370_v31 = vadd.f32 %v369_v22, %v368_v25  ;;  %v383_v0 = vsel %vm82_vm1, %v270_v51, 0.0  ;;  %v202_v22 = vsel %vm82_vm1, %v77_v19, 0.0  ;;  %v78_v25 = vld [vmem:[%s786_s0 + $0x1e8] sm:$0xff] }
  0x5d   :  { %v175_v12 = vadd.f32 %v174_v2, %v173_v6  ;;  %v372_v37 = vadd.f32 %v371_v28, %v370_v31  ;;  %v385_v6 = vsel %vm82_vm1, %v271_v57, 0.0  ;;  %v204_v28 = vsel %vm82_vm1, %v78_v25, 0.0  ;;  %v79_v31 = vld [vmem:[%s786_s0 + $0x1f0] sm:$0xff] }
  0x5e   :  { %v282_v53 = vmul.f32 %v79_v31, %v79_v31 }
  0x5f   :  { %v177_v18 = vadd.f32 %v176_v8, %v175_v12  ;;  %v374_v43 = vadd.f32 %v373_v34, %v372_v37  ;;  %v387_v12 = vsel %vm82_vm1, %v272_v63, 0.0  ;;  %v206_v34 = vsel %vm82_vm1, %v79_v31, 0.0  ;;  %v80_v37 = vld [vmem:[%s786_s0 + $0x1f8] sm:$0xff] }
  0x60   :  { %v283_v57 = vmul.f32 %v80_v37, %v80_v37 }
  0x61   :  { %v179_v24 = vadd.f32 %v178_v14, %v177_v18  ;;  %v376_v49 = vadd.f32 %v375_v40, %v374_v43  ;;  %v389_v18 = vsel %vm82_vm1, %v273_v5, 0.0  ;;  %v208_v40 = vsel %vm82_vm1, %v80_v37, 0.0 }
  0x63   :  { %v181_v30 = vadd.f32 %v180_v20, %v179_v24  ;;  %v378_v55 = vadd.f32 %v377_v46, %v376_v49  ;;  %v391_v24 = vsel %vm82_vm1, %v274_v11, 0.0  ;;  %v399_v46 = vsel %vm82_vm1, %v278_v35, 0.0 }
  0x64   :  { %v281_v49 = vmul.f32 %v78_v25, %v78_v25 }
  0x65   :  { %v183_v36 = vadd.f32 %v182_v26, %v181_v30  ;;  %v380_v61 = vadd.f32 %v379_v52, %v378_v55  ;;  %v393_v30 = vsel %vm82_vm1, %v275_v17, 0.0 }
  0x67   :  { %v185_v42 = vadd.f32 %v184_v32, %v183_v36  ;;  %v382_v3 = vadd.f32 %v381_v58, %v380_v61  ;;  %v395_v36 = vsel %vm82_vm1, %v276_v23, 0.0  ;;  %v405_v58 = vsel %vm82_vm1, %v281_v49, 0.0 }
  0x68   :  { %v407_v61 = vsel %vm82_vm1, %v282_v53, 0.0 }
  0x69   :  { %v187_v48 = vadd.f32 %v186_v38, %v185_v42  ;;  %v384_v9 = vadd.f32 %v383_v0, %v382_v3  ;;  %v397_v42 = vsel %vm82_vm1, %v277_v29, 0.0  ;;  %v409_v0 = vsel %vm82_vm1, %v283_v57, 0.0  ;;  %v81_v3 = vld [vmem:[%s787_s1] sm:$0x1] }
  0x6b   :  { %v189_v54 = vadd.f32 %v188_v44, %v187_v48  ;;  %v386_v15 = vadd.f32 %v385_v6, %v384_v9 }
  0x6d   :  { %v191_v60 = vadd.f32 %v190_v50, %v189_v54  ;;  %v388_v21 = vadd.f32 %v387_v12, %v386_v15  ;;  %v401_v50 = vsel %vm82_vm1, %v279_v41, 0.0  ;;  %v403_v54 = vsel %vm82_vm1, %v280_v45, 0.0  ;;  %v219_v12 = vld [vmem:[%s788_s2] sm:$0x1] }
  0x6f   :  { %v193_v2 = vadd.f32 %v192_v56, %v191_v60  ;;  %v390_v27 = vadd.f32 %v389_v18, %v388_v21 }
  0x71   :  { %v195_v8 = vadd.f32 %v194_v62, %v193_v2  ;;  %v392_v33 = vadd.f32 %v391_v24, %v390_v27 }
  0x73   :  { %v197_v14 = vadd.f32 %v196_v4, %v195_v8  ;;  %v394_v39 = vadd.f32 %v393_v30, %v392_v33 }
  0x75   :  { %v199_v20 = vadd.f32 %v198_v10, %v197_v14  ;;  %v396_v44 = vadd.f32 %v395_v36, %v394_v39 }
  0x77   :  { %v201_v26 = vadd.f32 %v200_v16, %v199_v20  ;;  %v398_v48 = vadd.f32 %v397_v42, %v396_v44 }
  0x79   :  { %v203_v32 = vadd.f32 %v202_v22, %v201_v26  ;;  %v400_v52 = vadd.f32 %v399_v46, %v398_v48 }
  0x7b   :  { %v205_v38 = vadd.f32 %v204_v28, %v203_v32  ;;  %v402_v56 = vadd.f32 %v401_v50, %v400_v52 }
  0x7d   :  { %v207_v43 = vadd.f32 %v206_v34, %v205_v38  ;;  %v404_v60 = vadd.f32 %v403_v54, %v402_v56 }
  0x7f   :  { %v209_v47 = vadd.f32 %v208_v40, %v207_v43  ;;  %v406_v63 = vadd.f32 %v405_v58, %v404_v60 }
  0x81   :  { %v210_v51 = vrot.slane %v209_v47, 4  ;;  %v408_v2 = vadd.f32 %v407_v61, %v406_v63 }
  0x83   :  { %v211_v55 = vadd.f32 %v210_v51, %v209_v47  ;;  %v410_v5 = vadd.f32 %v409_v0, %v408_v2 }
  0x85   :  { %v212_v59 = vrot.slane %v211_v55, 2  ;;  %v411_v7 = vrot.slane %v410_v5, 4 }
  0x87   :  { %v213_v62 = vadd.f32 %v212_v59, %v211_v55  ;;  %v412_v8 = vadd.f32 %v411_v7, %v410_v5 }
  0x89   :  { %v214_v1 = vrot.slane %v213_v62, 1  ;;  %v413_v9 = vrot.slane %v412_v8, 2 }
  0x8b   :  { %v215_v4 = vadd.f32 %v214_v1, %v213_v62  ;;  %v414_v10 = vadd.f32 %v413_v9, %v412_v8 }
  0x8d   :  { %v216_v6 = vadd.f32 %v215_v4, %v81_v3  ;;  %v415_v11 = vrot.slane %v414_v10, 1 }
  0x8f   :  { %218 = vst.msk [vmem:[%s787_s1] sm:$0x1] %vm14_vm0, %v216_v6  ;;  %v416_v13 = vadd.f32 %v415_v11, %v414_v10 }
  0x91   :  { %v417_v14 = vadd.f32 %v416_v13, %v219_v12 }
  0x93   :  { %418 = vst.msk [vmem:[%s788_s2] sm:$0x1] %vm14_vm0, %v417_v14 }

// kernel: res_block_forward.7
= control target key start
LH: loop header
LB: loop body
LE: loop exit
PB: predicated region body
PF: predicated region fallthrough
CT: control target
= control target key end

     0   :  { %s1036_s21 = smov 0   ;;  %s1438_s0 = inlined_call_operand.vmem [shape: f32[2,8,8,128], index: 0, kind: input, shape index: {}]   ;;  %s1439_s1 = inlined_call_operand.vmem [shape: f32[1,8], index: 1, kind: input, shape index: {}]   ;;  %s1440_s2 = inlined_call_operand.vmem [shape: f32[1,8], index: 2, kind: input, shape index: {}]   ;;  %s1441_s3 = inlined_call_operand.vmem [shape: f32[72,128], index: 3, kind: input, shape index: {}]   ;;  %s1442_s4 = inlined_call_operand.vmem [shape: f32[1,128], index: 4, kind: input, shape index: {}]   ;;  %s1443_s5 = inlined_call_operand.vmem [shape: f32[2,64,128], index: 5, kind: input, shape index: {}]   ;;  %s1444_s6 = inlined_call_operand.vmem [shape: f32[2,64,128], index: 6, kind: output, shape index: {}]  }
   0x1 LB: > { %s913_s22 = sadd.s32 4294967295, %s990_s21   ;;  %p917_p0 = scmp.ge.s32.totalorder %s990_s21, 1  ;;  %s990_s21 = sphi %s1036_s21, %s16_s21  }
   0x2   : > { %p222_p1 = scmp.lt.s32.totalorder %s990_s21, 3 }
   0x4   : > { %p223_p2 = pnand %p917_p0, %p222_p1 }
   0x5   : > { %p257_p3 = scmp.lt.s32.totalorder (!%p223_p2), %s913_s22, 1  ;;  %s993_s7 = smov (!%p223_p2), 16  }
   0x6   : > { %226 = sbr.rel (%p223_p2) target bundleno = 450 (0x1c2), region = 44  ;;  %s994_s8 = smov (!%p223_p2), 8  }
   0x7   : > { %s995_s9 = smov (!%p223_p2), 24   ;;  %s996_s10 = smov (!%p223_p2), 32  }
   0x8   : > { %s997_s11 = smov (!%p223_p2), 40   ;;  %s998_s12 = smov (!%p223_p2), 48  }
   0x9   : > { %s999_s13 = smov (!%p223_p2), 56   ;;  %s1000_s14 = smov (!%p223_p2), 64  }
   0xb   : > { %vm312_vm0 = vcmask 64512   ;;  %vm314_vm1 = vcmask 58368   ;;  %s1446_s22 = smov (!%p257_p3, %s913_s22), 1  ;;  %v992_v0 = vmov 0.0   ;;  %v1048_v1 = vld [vmem:[%s1439_s1] ss:$0 sm:$0xff] }
   0xc   : > { %322 = vst.msk [vmem:[#allocation2 + $0x40] sm:$0xff] %vm312_vm0, %v992_v0  ;;  %s1051_s25 = sshll.u32 %s1446_s22, 6  ;;  %v1063_v2 = vld [vmem:[%s1440_s2] ss:$0 sm:$0xff]  ;;  %vm680_vm2 = vcmask 130048   ;;  %vm689_vm3 = vcmask 195584  }
   0xd   : > { %323 = vst.msk [vmem:[#allocation2 + $0x48] sm:$0x3] %vm314_vm1, %v992_v0  ;;  %s1058_s28 = scalar_lea.vmem %s1438_s0, %s1051_s25  ;;  %vm698_vm4 = vcmask 261120   ;;  %vm707_vm5 = vcmask 326656   ;;  %vm716_vm6 = vcmask 392192   ;;  %vm725_vm7 = vcmask 457728   ;;  %s1419_s18 = scalar_lea.vmem %s1444_s6, %s1051_s25 }
   0xe   : > { %313 = vst.msk [vmem:[#allocation2] sm:$0xff] %vm312_vm0, %v992_v0  ;;  %v275_v3 = vld [vmem:[%s1058_s28 + $0x18] sm:$0xff]  ;;  %v276_v5 = vld [vmem:[%s1058_s28 + $0x20] sm:$0xff]  ;;  %v277_v7 = vld [vmem:[%s1058_s28 + $0x28] sm:$0xff]  ;;  %vm734_vm8 = vcmask 523264   ;;  %vm756_vm9 = vcmask 588800  }
   0xf   : > { %315 = vst.msk [vmem:[#allocation2 + $0x8] sm:$0x3] %vm314_vm1, %v992_v0  ;;  %v287_v4 = vmul.f32 %v1048_v1, %v275_v3  ;;  %v278_v8 = vld [vmem:[%s1058_s28 + $0x30] sm:$0xff]  ;;  %v288_v10 = vmul.f32 %v1048_v1, %v276_v5  ;;  %v279_v11 = vld [vmem:[%s1058_s28 + $0x38] sm:$0xff]  ;;  %v289_v12 = vmul.f32 %v1048_v1, %v277_v7  ;;  %v273_v15 = vld [vmem:[%s1058_s28 + $0x8] sm:$0xff] }
  0x10   : > { %316 = vst.msk [vmem:[#allocation2 + $0x10] sm:$0xff] %vm312_vm0, %v992_v0  ;;  %v290_v13 = vmul.f32 %v1048_v1, %v278_v8  ;;  %v291_v14 = vmul.f32 %v1048_v1, %v279_v11  ;;  %v285_v17 = vmul.f32 %v1048_v1, %v273_v15  ;;  %v272_v35 = vld [vmem:[%s1058_s28] sm:$0xff]  ;;  %v274_v37 = vld [vmem:[%s1058_s28 + $0x10] sm:$0xff]  ;;  %v750_v5 = vld [vmem:[%s1441_s3 + $0x38] sm:$0xff] }
  0x11   : > { %317 = vst.msk [vmem:[#allocation2 + $0x18] sm:$0x3] %vm314_vm1, %v992_v0  ;;  %v299_v6 = vadd.f32 %v1063_v2, %v287_v4  ;;  %v300_v16 = vadd.f32 %v1063_v2, %v288_v10  ;;  %v301_v18 = vadd.f32 %v1063_v2, %v289_v12  ;;  %v284_v36 = vmul.f32 %v1048_v1, %v272_v35  ;;  %v751_v3 = vld [vmem:[%s1441_s3 + $0x40] sm:$0xff]  ;;  %v749_v8 = vld [vmem:[%s1441_s3 + $0x30] sm:$0xff] }
  0x12   : > { %318 = vst.msk [vmem:[#allocation2 + $0x20] sm:$0xff] %vm312_vm0, %v992_v0  ;;  %v302_v19 = vadd.f32 %v1063_v2, %v290_v13  ;;  %v303_v20 = vadd.f32 %v1063_v2, %v291_v14  ;;  %v297_v22 = vadd.f32 %v1063_v2, %v285_v17  ;;  %v286_v39 = vmul.f32 %v1048_v1, %v274_v37  ;;  %v747_v11 = vld [vmem:[%s1441_s3 + $0x20] sm:$0xff]  ;;  %v746_v13 = vld [vmem:[%s1441_s3 + $0x18] sm:$0xff]  ;;  %v744_v17 = vld [vmem:[%s1441_s3 + $0x8] sm:$0xff] }
  0x13   : > { %319 = vst.msk [vmem:[#allocation2 + $0x28] sm:$0x3] %vm314_vm1, %v992_v0  ;;  %v307_v9 = vmax.f32 %v299_v6, 0.0  ;;  %v308_v21 = vmax.f32 %v300_v16, 0.0  ;;  %v309_v25 = vmax.f32 %v301_v18, 0.0  ;;  %v296_v38 = vadd.f32 %v1063_v2, %v284_v36  ;;  %938 = vmatpush.msra.mxu2 %v751_v3  ;;  %939 = vmatpush.msra.mxu3 %v751_v3  ;;  %v745_v16 = vld [vmem:[%s1441_s3 + $0x10] sm:$0xff] }
  0x14   : > { %320 = vst.msk [vmem:[#allocation2 + $0x30] sm:$0xff] %vm312_vm0, %v992_v0  ;;  %v310_v26 = vmax.f32 %v302_v19, 0.0  ;;  %v311_v27 = vmax.f32 %v303_v20, 0.0  ;;  %v305_v28 = vmax.f32 %v297_v22, 0.0  ;;  %v298_v41 = vadd.f32 %v1063_v2, %v286_v39  ;;  %788 = vmatpush.msra.mxu0 %v751_v3  ;;  %937 = vmatpush.msra.mxu1 %v751_v3  ;;  %v743_v19 = vld [vmem:[%s1441_s3] sm:$0xff] }
  0x15   : > { %321 = vst.msk [vmem:[#allocation2 + $0x38] sm:$0x3] %vm314_vm1, %v992_v0  ;;  %v304_v40 = vmax.f32 %v296_v38, 0.0  ;;  %941 = vmatpush.msra.mxu2 %v750_v5  ;;  %942 = vmatpush.msra.mxu3 %v750_v5  ;;  %v343_v35 = vld [vmem:[#allocation2] sm:$0xff] }
  0x16   : > { %324 = vst.msk [vmem:[#allocation2 + $0x50] sm:$0xff] %vm312_vm0, %v992_v0  ;;  %v306_v45 = vmax.f32 %v298_v41, 0.0  ;;  %v351_v47 = vld [vmem:[#allocation2 + $0x1] sm:$0xff]  ;;  %789 = vmatpush.msra.mxu0 %v750_v5  ;;  %940 = vmatpush.msra.mxu1 %v750_v5 }
  0x17   : > { %338 = vst.msk [vmem:[#allocation2 + $0x41] sm:$0xff] %vm312_vm0, %v307_v9  ;;  %v359_v50 = vld [vmem:[#allocation2 + $0x2] sm:$0xff]  ;;  %944 = vmatpush.msra.mxu2 %v749_v8  ;;  %945 = vmatpush.msra.mxu3 %v749_v8 }
  0x18   : > { %325 = vst.msk [vmem:[#allocation2 + $0x58] sm:$0x3] %vm314_vm1, %v992_v0  ;;  %v748_v9 = vld [vmem:[%s1441_s3 + $0x28] sm:$0xff]  ;;  %790 = vmatpush.msra.mxu0 %v749_v8  ;;  %943 = vmatpush.msra.mxu1 %v749_v8 }
  0x19   : > { %326 = vst.msk [vmem:[#allocation2 + $0x60] sm:$0xff] %vm312_vm0, %v992_v0  ;;  %947 = vmatpush.msra.mxu2 %v748_v9  ;;  %948 = vmatpush.msra.mxu3 %v748_v9 }
  0x1a   : > { %327 = vst.msk [vmem:[#allocation2 + $0x68] sm:$0x3] %vm314_vm1, %v992_v0  ;;  %791 = vmatpush.msra.mxu0 %v748_v9  ;;  %946 = vmatpush.msra.mxu1 %v748_v9 }
  0x1b   : > { %328 = vst.msk [vmem:[#allocation2 + $0x70] sm:$0xff] %vm312_vm0, %v992_v0  ;;  %950 = vmatpush.msra.mxu2 %v747_v11  ;;  %951 = vmatpush.msra.mxu3 %v747_v11 }
  0x1c   : > { %329 = vst.msk [vmem:[#allocation2 + $0x78] sm:$0x3] %vm314_vm1, %v992_v0  ;;  %792 = vmatpush.msra.mxu0 %v747_v11  ;;  %949 = vmatpush.msra.mxu1 %v747_v11 }
  0x1d   : > { %330 = vst.msk [vmem:[#allocation2 + $0x80] sm:$0xff] %vm312_vm0, %v992_v0  ;;  %953 = vmatpush.msra.mxu2 %v746_v13  ;;  %954 = vmatpush.msra.mxu3 %v746_v13 }
  0x1e   : > { %v1098_v23 = vld [vmem:[#allocation2 + $0x42] sm:$0xff]  ;;  %331 = vst.msk [vmem:[#allocation2 + $0x88] sm:$0x3] %vm314_vm1, %v992_v0  ;;  %793 = vmatpush.msra.mxu0 %v746_v13  ;;  %952 = vmatpush.msra.mxu1 %v746_v13 }
  0x1f   : > { %v1101_v24 = vld [vmem:[#allocation2 + $0x41] sm:$0xff]  ;;  %464 = vrot.lane.b32.xlu1 %v1098_v23, %s993_s7  ;;  %332 = vst.msk [vmem:[#allocation2 + $0x90] sm:$0xff] %vm312_vm0, %v992_v0  ;;  %956 = vmatpush.msra.mxu2 %v745_v16 }
  0x20   : > { %432 = vrot.lane.b32.xlu0 %v1101_v24, %s994_s8  ;;  %333 = vst.msk [vmem:[#allocation2 + $0x98] sm:$0x3] %vm314_vm1, %v992_v0  ;;  %v1211_v60 = vld [vmem:[#allocation2 + $0x40] sm:$0xff]  ;;  %957 = vmatpush.msra.mxu3 %v745_v16 }
  0x21   : > { %339 = vst.msk [vmem:[#allocation2 + $0x51] sm:$0xff] %vm312_vm0, %v308_v21  ;;  %794 = vmatpush.msra.mxu0 %v745_v16  ;;  %959 = vmatpush.msra.mxu2 %v744_v17 }
  0x22   : > { %340 = vst.msk [vmem:[#allocation2 + $0x61] sm:$0xff] %vm312_vm0, %v309_v25  ;;  %960 = vmatpush.msra.mxu3 %v744_v17  ;;  %955 = vmatpush.msra.mxu1 %v745_v16 }
  0x23   : > { %341 = vst.msk [vmem:[#allocation2 + $0x71] sm:$0xff] %vm312_vm0, %v310_v26  ;;  %962 = vmatpush.msra.mxu2 %v743_v19  ;;  %795 = vmatpush.msra.mxu0 %v744_v17 }
  0x24   : > { %342 = vst.msk [vmem:[#allocation2 + $0x81] sm:$0xff] %vm312_vm0, %v311_v27  ;;  %963 = vmatpush.msra.mxu3 %v743_v19  ;;  %958 = vmatpush.msra.mxu1 %v744_v17 }
  0x25   : > { %336 = vst.msk [vmem:[#allocation2 + $0x21] sm:$0xff] %vm312_vm0, %v305_v28  ;;  %796 = vmatpush.msra.mxu0 %v743_v19 }
  0x26   : > { %335 = vst.msk [vmem:[#allocation2 + $0x11] sm:$0xff] %vm312_vm0, %v304_v40  ;;  %v399_v63 = vld [vmem:[#allocation2 + $0x90] sm:$0xff]  ;;  %961 = vmatpush.msra.mxu1 %v743_v19 }
  0x27   : > { %337 = vst.msk [vmem:[#allocation2 + $0x31] sm:$0xff] %vm312_vm0, %v306_v45  ;;  %v407_v10 = vld [vmem:[#allocation2 + $0x91] sm:$0xff] }
  0x28   : > { %v1114_v29 = vld [vmem:[#allocation2 + $0x50] sm:$0xff] }
  0x29   : > { %496 = vrot.lane.b32.xlu2 %v1114_v29, %s995_s9  ;;  %v1118_v30 = vld [vmem:[#allocation2 + $0x62] sm:$0xff]  ;;  %v1130_v34 = vld [vmem:[#allocation2 + $0x51] sm:$0xff] }
  0x2a   : > { %v1120_v31 = vld [vmem:[#allocation2 + $0x61] sm:$0xff]  ;;  %468 = vrot.lane.b32.xlu1 %v1118_v30, %s993_s7  ;;  %v1126_v32 = vld [vmem:[#allocation2 + $0x70] sm:$0xff] }
  0x2b   : > { %436 = vrot.lane.b32.xlu0 %v1120_v31, %s994_s8  ;;  %v1128_v33 = vld [vmem:[#allocation2 + $0x71] sm:$0xff]  ;;  %v1146_v43 = vld [vmem:[#allocation2 + $0x60] sm:$0xff] }
  0x2c   : > { %v1144_v42 = vld [vmem:[#allocation2 + $0x52] sm:$0xff]  ;;  %v398_v46 = vld [vmem:[#allocation2 + $0x80] sm:$0xff] }
  0x2d   : > { %v1148_v44 = vld [vmem:[#allocation2 + $0x72] sm:$0xff]  ;;  %v1158_v48 = vld [vmem:[#allocation2 + $0x21] sm:$0xff] }
  0x2e   : > { %v406_v49 = vld [vmem:[#allocation2 + $0x81] sm:$0xff]  ;;  %v1175_v53 = vld [vmem:[#allocation2 + $0x10] sm:$0xff] }
  0x2f   : > { %v1168_v51 = vld [vmem:[#allocation2 + $0x22] sm:$0xff]  ;;  %v1183_v54 = vld [vmem:[#allocation2 + $0x30] sm:$0xff] }
  0x30   : > { %v414_v52 = vld [vmem:[#allocation2 + $0x82] sm:$0xff]  ;;  %v375_v55 = vld [vmem:[#allocation2 + $0x11] sm:$0xff] }
  0x31   : > { %500 = vrot.lane.b32.xlu2 %v1126_v32, %s995_s9  ;;  %v1191_v56 = vld [vmem:[#allocation2 + $0x31] sm:$0xff]  ;;  %v1204_v59 = vld [vmem:[#allocation2 + $0x20] sm:$0xff] }
  0x32   : > { %532 = vrot.lane.b32.xlu1 %v1128_v33, %s996_s10  ;;  %v383_v57 = vld [vmem:[#allocation2 + $0x12] sm:$0xff] }
  0x33   : > { %528 = vrot.lane.b32.xlu0 %v1130_v34, %s996_s10  ;;  %v1198_v58 = vld [vmem:[#allocation2 + $0x32] sm:$0xff] }
  0x34   : > { %v415_v18 = vld [vmem:[#allocation2 + $0x92] sm:$0xff] }
  0x39   : > { %560 = vrot.lane.b32.xlu2 %v1144_v42, %s997_s11 }
  0x3a   : > { %592 = vrot.lane.b32.xlu1 %v1146_v43, %s998_s12 }
  0x3b   : > { %564 = vrot.lane.b32.xlu0 %v1148_v44, %s997_s11 }
  0x41   : > { %596 = vrot.lane.b32.xlu2 %v398_v46, %s998_s12 }
  0x42   : > { %428 = vrot.lane.b32.xlu1 %v1158_v48, %s994_s8 }
  0x43   : > { %424 = vrot.lane.b32.xlu0 %v351_v47, %s994_s8 }
  0x49   : > { %624 = vrot.lane.b32.xlu2 %v1120_v31, %s999_s13 }
  0x4a   : > { %456 = vrot.lane.b32.xlu1 %v359_v50, %s993_s7 }
  0x4b   : > { %628 = vrot.lane.b32.xlu0 %v406_v49, %s999_s13 }
  0x51   : > { %460 = vrot.lane.b32.xlu2 %v1168_v51, %s993_s7 }
  0x52   : > { %660 = vrot.lane.b32.xlu1 %v414_v52, %s1000_s14 }
  0x53   : > { %656 = vrot.lane.b32.xlu0 %v1118_v30, %s1000_s14 }
  0x59   : > { %434 = vrot.lane.b32.xlu2 %v1130_v34, %s994_s8 }
  0x5a   : > { %488 = vrot.lane.b32.xlu1 %v1175_v53, %s995_s9 }
  0x5b   : > { %438 = vrot.lane.b32.xlu0 %v1128_v33, %s994_s8 }
  0x61   : > { %492 = vrot.lane.b32.xlu2 %v1183_v54, %s995_s9 }
  0x62   : > { %470 = vrot.lane.b32.xlu1 %v1148_v44, %s993_s7 }
  0x63   : > { %466 = vrot.lane.b32.xlu0 %v1144_v42, %s993_s7 }
  0x69   : > { %520 = vrot.lane.b32.xlu2 %v375_v55, %s996_s10 }
  0x6a   : > { %498 = vrot.lane.b32.xlu1 %v1146_v43, %s995_s9 }
  0x6b   : > { %524 = vrot.lane.b32.xlu0 %v1191_v56, %s996_s10 }
  0x71   : > { %502 = vrot.lane.b32.xlu2 %v398_v46, %s995_s9 }
  0x72   : > { %556 = vrot.lane.b32.xlu1 %v1198_v58, %s997_s11 }
  0x73   : > { %552 = vrot.lane.b32.xlu0 %v383_v57, %s997_s11 }
  0x79   : > { %530 = vrot.lane.b32.xlu2 %v1120_v31, %s996_s10 }
  0x7a   : > { %584 = vrot.lane.b32.xlu1 %v1204_v59, %s998_s12 }
  0x7b   : > { %534 = vrot.lane.b32.xlu0 %v406_v49, %s996_s10 }
  0x81   : > { %588 = vrot.lane.b32.xlu2 %v1211_v60, %s998_s12 }
  0x82   : > { %566 = vrot.lane.b32.xlu1 %v414_v52, %s997_s11 }
  0x83   : > { %562 = vrot.lane.b32.xlu0 %v1118_v30, %s997_s11  ;;  %v1218_v61 = vpop.permute.xlu2 %496 }
  0x89   : > { %616 = vrot.lane.b32.xlu2 %v1158_v48, %s999_s13 }
  0x8a   : > { %594 = vrot.lane.b32.xlu1 %v1126_v32, %s998_s12 }
  0x8b   : > { %620 = vrot.lane.b32.xlu0 %v1101_v24, %s999_s13  ;;  %v1226_v62 = vpop.permute.xlu2 %500 }
  0x91   : > { %598 = vrot.lane.b32.xlu2 %v399_v63, %s998_s12  ;;  %v1233_v0 = vpop.permute.xlu1 %464 }
  0x92   : > { %652 = vrot.lane.b32.xlu1 %v1098_v23, %s1000_s14  ;;  %v1235_v1 = vpop.permute.xlu0 %432 }
  0x93   : > { %648 = vrot.lane.b32.xlu0 %v1168_v51, %s1000_s14  ;;  %v1237_v2 = vpop.permute.xlu2 %560  ;;  %v676_v30 = vsel %vm312_vm0, %v1211_v60, %v1235_v1 }
  0x99   : > { %426 = vrot.lane.b32.xlu2 %v375_v55, %s994_s8 }
  0x9a   : > { %626 = vrot.lane.b32.xlu1 %v1128_v33, %s999_s13  ;;  %v685_v33 = vsel %vm680_vm2, %v676_v30, %v1233_v0 }
  0x9b   : > { %430 = vrot.lane.b32.xlu0 %v1191_v56, %s994_s8  ;;  %v1247_v4 = vpop.permute.xlu2 %596  ;;  %v694_v38 = vsel %vm689_vm3, %v685_v33, %v1218_v61 }
  0x9c   : > { %v1252_v6 = vpop.permute.xlu1 %468 }
  0x9d   : > { %v1254_v7 = vpop.permute.xlu0 %436 }
  0xa1   : > { %630 = vrot.lane.b32.xlu2 %v407_v10, %s999_s13 }
  0xa2   : > { %462 = vrot.lane.b32.xlu1 %v1198_v58, %s993_s7 }
  0xa3   : > { %458 = vrot.lane.b32.xlu0 %v383_v57, %s993_s7  ;;  %v1269_v12 = vpop.permute.xlu2 %624 }
  0xa4   : > { %v533_v14 = vpop.permute.xlu1 %532 }
  0xa5   : > { %v529_v15 = vpop.permute.xlu0 %528 }
  0xa9   : > { %658 = vrot.lane.b32.xlu2 %v1148_v44, %s1000_s14 }
  0xaa   : > { %490 = vrot.lane.b32.xlu1 %v1204_v59, %s995_s9 }
  0xab   : > { %662 = vrot.lane.b32.xlu0 %v415_v18, %s1000_s14  ;;  %v461_v20 = vpop.permute.xlu2 %460 }
  0xac   : > { %v593_v21 = vpop.permute.xlu1 %592 }
  0xad   : > { %v565_v22 = vpop.permute.xlu0 %564 }
  0xb1   : > { %494 = vrot.lane.b32.xlu2 %v1211_v60, %s995_s9 }
  0xb2   : > { %526 = vrot.lane.b32.xlu1 %v1101_v24, %s996_s10  ;;  %v678_v24 = vsel %vm312_vm0, %v1146_v43, %v1254_v7  ;;  %v703_v43 = vsel %vm698_vm4, %v694_v38, %v529_v15 }
  0xb3   : > { %522 = vrot.lane.b32.xlu0 %v1158_v48, %s996_s10  ;;  %v1294_v25 = vpop.permute.xlu2 %434  ;;  %v687_v36 = vsel %vm680_vm2, %v678_v24, %v1252_v6  ;;  %v712_v46 = vsel %vm707_vm5, %v703_v43, %v1237_v2 }
  0xb4   : > { %v429_v27 = vpop.permute.xlu1 %428  ;;  %v696_v45 = vsel %vm689_vm3, %v687_v36, %v1226_v62  ;;  %v721_v48 = vsel %vm716_vm6, %v712_v46, %v593_v21 }
  0xb5   : > { %v425_v26 = vpop.permute.xlu0 %424  ;;  %v674_v28 = vsel %vm312_vm0, %v1204_v59, %v429_v27  ;;  %v730_v57 = vsel %vm725_vm7, %v721_v48, %v1269_v12 }
  0xb6   : > { %v1302_v31 = vsel %vm680_vm2, %v674_v28, %v461_v20  ;;  %v672_v39 = vsel %vm312_vm0, %v343_v35, %v425_v26 }
  0xb9   : > { %554 = vrot.lane.b32.xlu2 %v1168_v51, %s997_s11 }
  0xba   : > { %586 = vrot.lane.b32.xlu1 %v1183_v54, %s998_s12 }
  0xbb   : > { %558 = vrot.lane.b32.xlu0 %v1098_v23, %s997_s11  ;;  %v493_v37 = vpop.permute.xlu2 %492  ;;  %v705_v23 = vsel %vm698_vm4, %v696_v45, %v533_v14  ;;  %s1408_s11 = scalar_lea.vmem %s1443_s5, %s1051_s25 }
  0xbc   : > { %v457_v41 = vpop.permute.xlu1 %456  ;;  %v714_v47 = vsel %vm707_vm5, %v705_v23, %v565_v22  ;;  %v692_v16 = vsel %vm689_vm3, %v1302_v31, %v493_v37  ;;  %v677_v31 = vsel %vm312_vm0, %v1114_v29, %v1294_v25 }
  0xbd   : > { %v629_v40 = vpop.permute.xlu0 %628  ;;  %v681_v44 = vsel %vm680_vm2, %v672_v39, %v457_v41  ;;  %v723_v49 = vsel %vm716_vm6, %v714_v47, %v1247_v4 }
  0xbe   : > { %v732_v51 = vsel %vm725_vm7, %v723_v49, %v629_v40 }
  0xc1   : > { %590 = vrot.lane.b32.xlu2 %v1114_v29, %s998_s12 }
  0xc2   : > { %622 = vrot.lane.b32.xlu1 %v1130_v34, %s999_s13 }
  0xc3   : > { %618 = vrot.lane.b32.xlu0 %v1191_v56, %s999_s13  ;;  %v521_v50 = vpop.permute.xlu2 %520 }
  0xc4   : > { %v661_v55 = vpop.permute.xlu1 %660 }
  0xc5   : > { %v657_v52 = vpop.permute.xlu0 %656  ;;  %v741_v34 = vsel %vm734_vm8, %v732_v51, %v661_v55 }
  0xc6   : > { %v739_v59 = vsel %vm734_vm8, %v730_v57, %v657_v52  ;;  %930 = vmatmul.msk.f32.vlgmr.msra.gmra.mxu3 %vm756_vm9, %v741_v34 }
  0xc7   : > { %928 = vmatmul.msk.f32.vlgmr.msra.gmra.mxu2 %vm756_vm9, %v739_v59 }
  0xc9   : > { %650 = vrot.lane.b32.xlu2 %v1198_v58, %s1000_s14 }
  0xcb   : > { %654 = vrot.lane.b32.xlu0 %v1144_v42, %s1000_s14  ;;  %v503_v56 = vpop.permute.xlu2 %502 }
  0xcc   : > { %v489_v61 = vpop.permute.xlu1 %488 }
  0xcd   : > { %v439_v60 = vpop.permute.xlu0 %438 }
  0xce   : > { %v679_v63 = vsel %vm312_vm0, %v1126_v32, %v439_v60  ;;  %v690_v32 = vsel %vm689_vm3, %v681_v44, %v489_v61 }
  0xcf   : > { %v699_v18 = vsel %vm698_vm4, %v690_v32, %v521_v50  ;;  %v983_v32 = vld [vmem:[%s1442_s4] ss:$0 sm:$0xff] }
  0xd3   : > { %v531_v62 = vpop.permute.xlu2 %530 }
  0xd4   : > { %v471_v1 = vpop.permute.xlu1 %470 }
  0xd5   : > { %v467_v0 = vpop.permute.xlu0 %466  ;;  %v688_v2 = vsel %vm680_vm2, %v679_v63, %v471_v1 }
  0xd6   : > { %v697_v3 = vsel %vm689_vm3, %v688_v2, %v503_v56  ;;  %v686_v36 = vsel %vm680_vm2, %v677_v31, %v467_v0 }
  0xdb   : > { %v589_v4 = vpop.permute.xlu2 %588 }
  0xdc   : > { %v499_v6 = vpop.permute.xlu1 %498 }
  0xdd   : > { %v525_v5 = vpop.permute.xlu0 %524  ;;  %v695_v37 = vsel %vm689_vm3, %v686_v36, %v499_v6  ;;  %v827_v36 = vld [vmem:[%s1408_s11 + $0x28] sm:$0xff] }
  0xde   : > { %v701_v17 = vsel %vm698_vm4, %v692_v16, %v525_v5  ;;  %v704_v38 = vsel %vm698_vm4, %v695_v37, %v531_v62 }
  0xe3   : > { %v617_v8 = vpop.permute.xlu2 %616 }
  0xe4   : > { %v557_v7 = vpop.permute.xlu1 %556 }
  0xe5   : > { %v553_v58 = vpop.permute.xlu0 %552  ;;  %v710_v20 = vsel %vm707_vm5, %v701_v17, %v557_v7  ;;  %v828_v17 = vld [vmem:[%s1408_s11 + $0x30] sm:$0xff] }
  0xe6   : > { %v708_v19 = vsel %vm707_vm5, %v699_v18, %v553_v58  ;;  %v719_v26 = vsel %vm716_vm6, %v710_v20, %v589_v4 }
  0xeb   : > { %v599_v10 = vpop.permute.xlu2 %598 }
  0xec   : > { %v585_v9 = vpop.permute.xlu1 %584 }
  0xed   : > { %v535_v42 = vpop.permute.xlu0 %534  ;;  %v717_v21 = vsel %vm716_vm6, %v708_v19, %v585_v9 }
  0xee   : > { %v726_v24 = vsel %vm725_vm7, %v717_v21, %v617_v8  ;;  %v706_v46 = vsel %vm698_vm4, %v697_v3, %v535_v42 }
  0xf3   : > { %v427_v13 = vpop.permute.xlu2 %426 }
  0xf4   : > { %v567_v12 = vpop.permute.xlu1 %566  ;;  %v673_v61 = vsel %vm312_vm0, %v1175_v53, %v427_v13 }
  0xf5   : > { %v563_v11 = vpop.permute.xlu0 %562  ;;  %v715_v47 = vsel %vm707_vm5, %v706_v46, %v567_v12  ;;  %v825_v46 = vld [vmem:[%s1408_s11 + $0x18] sm:$0xff] }
  0xf6   : > { %v713_v39 = vsel %vm707_vm5, %v704_v38, %v563_v11  ;;  %v724_v49 = vsel %vm716_vm6, %v715_v47, %v599_v10 }
  0xfb   : > { %v631_v22 = vpop.permute.xlu2 %630 }
  0xfc   : > { %v595_v15 = vpop.permute.xlu1 %594  ;;  %v733_v50 = vsel %vm725_vm7, %v724_v49, %v631_v22 }
  0xfd   : > { %v621_v14 = vpop.permute.xlu0 %620  ;;  %v722_v41 = vsel %vm716_vm6, %v713_v39, %v595_v15  ;;  %v826_v15 = vld [vmem:[%s1408_s11 + $0x20] sm:$0xff] }
  0xfe   : > { %v728_v27 = vsel %vm725_vm7, %v719_v26, %v621_v14  ;;  %v822_v26 = vld [vmem:[%s1408_s11] sm:$0xff] }
 0x103   : > { %v659_v40 = vpop.permute.xlu2 %658 }
 0x104   : > { %v653_v30 = vpop.permute.xlu1 %652 }
 0x105   : > { %v649_v28 = vpop.permute.xlu0 %648  ;;  %v737_v35 = vsel %vm734_vm8, %v728_v27, %v653_v30 }
 0x106   : > { %v735_v33 = vsel %vm734_vm8, %v726_v24, %v649_v28  ;;  %926 = vmatmul.msk.f32.vlgmr.msra.gmra.mxu1 %vm756_vm9, %v737_v35  ;;  %v824_v28 = vld [vmem:[%s1408_s11 + $0x10] sm:$0xff] }
 0x107   : > { %924 = vmatmul.msk.f32.vlgmr.msra.gmra.mxu0 %vm756_vm9, %v735_v33 }
 0x10b   : > { %v495_v48 = vpop.permute.xlu2 %494 }
 0x10c   : > { %v627_v25 = vpop.permute.xlu1 %626 }
 0x10d   : > { %v431_v29 = vpop.permute.xlu0 %430  ;;  %v731_v43 = vsel %vm725_vm7, %v722_v41, %v627_v25 }
 0x10e   : > { %v740_v44 = vsel %vm734_vm8, %v731_v43, %v659_v40  ;;  %v675_v2 = vsel %vm312_vm0, %v1183_v54, %v431_v29  ;;  %v829_v40 = vld [vmem:[%s1408_s11 + $0x38] sm:$0xff]  ;;  %v823_v43 = vld [vmem:[%s1408_s11 + $0x8] sm:$0xff] }
 0x10f   : > { %929 = vmatmul.msk.f32.gmra.mxu2 %vm756_vm9, %v740_v44 }
 0x113   : > { %v555_v57 = vpop.permute.xlu2 %554 }
 0x114   : > { %v463_v45 = vpop.permute.xlu1 %462 }
 0x115   : > { %v459_v23 = vpop.permute.xlu0 %458  ;;  %v684_v3 = vsel %vm680_vm2, %v675_v2, %v463_v45 }
 0x116   : > { %v682_v62 = vsel %vm680_vm2, %v673_v61, %v459_v23  ;;  %v693_v7 = vsel %vm689_vm3, %v684_v3, %v495_v48 }
 0x11b   : > { %v591_v56 = vpop.permute.xlu2 %590 }
 0x11c   : > { %v491_v51 = vpop.permute.xlu1 %490 }
 0x11d   : > { %v663_v52 = vpop.permute.xlu0 %662  ;;  %v691_v63 = vsel %vm689_vm3, %v682_v62, %v491_v51 }
 0x11e   : > { %v742_v55 = vsel %vm734_vm8, %v733_v50, %v663_v52 }
 0x11f   : > { %931 = vmatmul.msk.f32.gmra.mxu3 %vm756_vm9, %v742_v55 }
 0x123   : > { %v651_v5 = vpop.permute.xlu2 %650 }
 0x124   : > { %v527_v34 = vpop.permute.xlu1 %526 }
 0x125   : > { %v523_v59 = vpop.permute.xlu0 %522  ;;  %v702_v42 = vsel %vm698_vm4, %v693_v7, %v527_v34 }
 0x126   : > { %v700_v1 = vsel %vm698_vm4, %v691_v63, %v523_v59 }
 0x127   : > { %v709_v4 = vsel %vm707_vm5, %v700_v1, %v555_v57 }
 0x12c   : > { %v587_v0 = vpop.permute.xlu1 %586 }
 0x12d   : > { %v559_v60 = vpop.permute.xlu0 %558  ;;  %v718_v6 = vsel %vm716_vm6, %v709_v4, %v587_v0 }
 0x12e   : > { %v711_v54 = vsel %vm707_vm5, %v702_v42, %v559_v60 }
 0x12f   : > { %v720_v10 = vsel %vm716_vm6, %v711_v54, %v591_v56 }
 0x134   : > { %v623_v9 = vpop.permute.xlu1 %622 }
 0x135   : > { %v619_v58 = vpop.permute.xlu0 %618  ;;  %v729_v11 = vsel %vm725_vm7, %v720_v10, %v623_v9 }
 0x136   : > { %v727_v53 = vsel %vm725_vm7, %v718_v6, %v619_v58 }
 0x137   : > { %v736_v8 = vsel %vm734_vm8, %v727_v53, %v651_v5 }
 0x138   : > { %925 = vmatmul.msk.f32.gmra.mxu0 %vm756_vm9, %v736_v8 }
 0x13d   : > { %v655_v12 = vpop.permute.xlu0 %654 }
 0x13e   : > { %v738_v13 = vsel %vm734_vm8, %v729_v11, %v655_v12 }
 0x13f   : > { %927 = vmatmul.msk.f32.gmra.mxu1 %vm756_vm9, %v738_v13 }
 0x149   : > { %v816_v16 = vpop.f32.mrf.mxu3 }
 0x14a   : > { %v810_v14 = vpop.f32.mrf.mxu2  ;;  %v817_v19 = vadd.f32 %v983_v32, %v816_v16 }
 0x14b   : > { %v811_v18 = vadd.f32 %v983_v32, %v810_v14 }
 0x14c   : > { %v836_v21 = vadd.f32 %v828_v17, %v817_v19 }
 0x14d   : > { %v834_v20 = vadd.f32 %v826_v15, %v811_v18 }
 0x14e   : > { %844 = vst [vmem:[%s1419_s18 + $0x30] sm:$0xff] %v836_v21 }
 0x14f   : > { %842 = vst [vmem:[%s1419_s18 + $0x20] sm:$0xff] %v834_v20 }
 0x183   : > { %v804_v27 = vpop.f32.mrf.mxu1 }
 0x184   : > { %v798_v22 = vpop.f32.mrf.mxu0  ;;  %v805_v24 = vadd.f32 %v983_v32, %v804_v27 }
 0x185   : > { %v799_v30 = vadd.f32 %v983_v32, %v798_v22 }
 0x186   : > { %v832_v33 = vadd.f32 %v824_v28, %v805_v24 }
 0x187   : > { %v830_v31 = vadd.f32 %v822_v26, %v799_v30 }
 0x188   : > { %840 = vst [vmem:[%s1419_s18 + $0x10] sm:$0xff] %v832_v33 }
 0x189   : > { %838 = vst [vmem:[%s1419_s18] sm:$0xff] %v830_v31 }
 0x192   : > { %v813_v35 = vpop.f32.mrf.mxu2 }
 0x193   : > { %v814_v37 = vadd.f32 %v983_v32, %v813_v35 }
 0x195   : > { %v835_v38 = vadd.f32 %v827_v36, %v814_v37 }
 0x197   : > { %843 = vst [vmem:[%s1419_s18 + $0x28] sm:$0xff] %v835_v38 }
 0x1a2   : > { %v819_v39 = vpop.f32.mrf.mxu3 }
 0x1a3   : > { %v820_v41 = vadd.f32 %v983_v32, %v819_v39 }
 0x1a5   : > { %v837_v29 = vadd.f32 %v829_v40, %v820_v41 }
 0x1a7   : > { %845 = vst [vmem:[%s1419_s18 + $0x38] sm:$0xff] %v837_v29 }
 0x1b5   : > { %v801_v25 = vpop.f32.mrf.mxu0 }
 0x1b6   : > { %v802_v44 = vadd.f32 %v983_v32, %v801_v25 }
 0x1b8   : > { %v831_v45 = vadd.f32 %v823_v43, %v802_v44 }
 0x1ba   : > { %839 = vst [vmem:[%s1419_s18 + $0x8] sm:$0xff] %v831_v45 }
 0x1bc   : > { %v807_v23 = vpop.f32.mrf.mxu1 }
 0x1bd   : > { %v808_v47 = vadd.f32 %v983_v32, %v807_v23 }
 0x1bf   : > { %v833_v48 = vadd.f32 %v825_v46, %v808_v47 }
 0x1c1   : > { %841 = vst [vmem:[%s1419_s18 + $0x18] sm:$0xff] %v833_v48 }
 0x1c2 PF: > { %s16_s21 = sadd.s32 1, %s990_s21  }
 0x1c3   : > { %p13_p4 = scmp.ge.s32.totalorder %s16_s21, 4  }
 0x1c5   :  { %15 = sbr.rel (!%p13_p4) target bundleno = 1 (0x1), region = 79 }

// kernel: res_block_forward.5
= control target key start
LH: loop header
LB: loop body
LE: loop exit
PB: predicated region body
PF: predicated region fallthrough
CT: control target
= control target key end

     0   :  { %s1448_s27 = smov 0   ;;  %s1952_s0 = inlined_call_operand.vmem [shape: f32[2,16,16,4], index: 0, kind: input, shape index: {}]   ;;  %s1953_s1 = inlined_call_operand.vmem [shape: f32[1,4], index: 1, kind: input, shape index: {}]   ;;  %s1954_s2 = inlined_call_operand.vmem [shape: f32[1,4], index: 2, kind: input, shape index: {}]   ;;  %s1955_s3 = inlined_call_operand.vmem [shape: f32[36,128], index: 3, kind: input, shape index: {}]   ;;  %s1956_s4 = inlined_call_operand.vmem [shape: f32[1,128], index: 4, kind: input, shape index: {}]   ;;  %s1957_s5 = inlined_call_operand.vmem [shape: f32[4,128], index: 5, kind: input, shape index: {}]   ;;  %s1958_s6 = inlined_call_operand.vmem [shape: f32[1,128], index: 6, kind: input, shape index: {}]   ;;  %s1959_s7 = inlined_call_operand.vmem [shape: f32[2,64,128], index: 7, kind: output, shape index: {0}]   ;;  %s1960_s8 = inlined_call_operand.vmem [shape: f32[2,64,128], index: 8, kind: output, shape index: {1}]  }
   0x1 LB: > { %s1323_s28 = sadd.s32 4294967295, %s1391_s27   ;;  %p1327_p0 = scmp.ge.s32.totalorder %s1391_s27, 1  ;;  %s1391_s27 = sphi %s1448_s27, %s19_s27  }
   0x2   : > { %p265_p1 = scmp.lt.s32.totalorder %s1391_s27, 3 }
   0x4   : > { %p266_p2 = pnand %p1327_p0, %p265_p1 }
   0x5   : > { %s1394_s29 = smov (!%p266_p2), 4   ;;  %p304_p3 = scmp.lt.s32.totalorder (!%p266_p2), %s1323_s28, 1 }
   0x6   : > { %269 = sbr.rel (%p266_p2) target bundleno = 584 (0x248), region = 48  ;;  %s1395_s16 = smov (!%p266_p2), 8  }
   0x7   : > { %s1396_s17 = smov (!%p266_p2), 20   ;;  %s1397_s18 = smov (!%p266_p2), 12  }
   0x8   : > { %s1398_s19 = smov (!%p266_p2), 28   ;;  %s1399_s20 = smov (!%p266_p2), 24  }
   0x9   : > { %s1400_s21 = smov (!%p266_p2), 16   ;;  %s1401_s22 = smov (!%p266_p2), 32  }
   0xb   : > { %vm455_vm0 = vcmask 31744   ;;  %v1393_v0 = vmov 0.0   ;;  %s1962_s28 = smov (!%p304_p3, %s1323_s28), 1  ;;  %vm458_vm1 = vcmask 25600   ;;  %v1544_v2 = vld [vmem:[%s1953_s1] ss:$0 sm:$0xff] }
   0xc   : > { %456 = vst.msk [vmem:[#allocation2] sm:$0xff] %vm455_vm0, %v1393_v0  ;;  %s1354_s30 = sshll.u32 %s1962_s28, 8  ;;  %v1561_v7 = vld [vmem:[%s1954_s2] ss:$0 sm:$0xff]  ;;  %vm1047_vm2 = vcmask 1043456   ;;  %vm950_vm3 = vcmask 64512  }
   0xd   : > { %457 = vst.msk [vmem:[#allocation2 + $0x8] sm:$0xff] %vm455_vm0, %v1393_v0  ;;  %s1537_s11 = scalar_lea.vmem %s1952_s0, %s1354_s30  ;;  %vm959_vm4 = vcmask 97280   ;;  %vm968_vm5 = vcmask 130048   ;;  %vm977_vm6 = vcmask 162816   ;;  %vm986_vm7 = vcmask 195584  }
   0xe   : > { %460 = vst.msk [vmem:[#allocation2 + $0x18] sm:$0xff] %vm455_vm0, %v1393_v0  ;;  %v319_v3 = vld [vmem:[%s1537_s11] sm:$0xff]  ;;  %v320_v4 = vld [vmem:[%s1537_s11 + $0x8] sm:$0xff]  ;;  %v321_v5 = vld [vmem:[%s1537_s11 + $0x10] sm:$0xff]  ;;  %vm995_vm8 = vcmask 228352   ;;  %vm1004_vm9 = vcmask 261120  }
   0xf   : > { %461 = vst.msk [vmem:[#allocation2 + $0x20] sm:$0xff] %vm455_vm0, %v1393_v0  ;;  %v355_v6 = vmul.f32 %v1544_v2, %v319_v3  ;;  %v322_v8 = vld [vmem:[%s1537_s11 + $0x18] sm:$0xff]  ;;  %v356_v10 = vmul.f32 %v1544_v2, %v320_v4  ;;  %v337_v11 = vld [vmem:[%s1537_s11 + $0x90] sm:$0xff]  ;;  %v357_v12 = vmul.f32 %v1544_v2, %v321_v5  ;;  %v323_v15 = vld [vmem:[%s1537_s11 + $0x20] sm:$0xff]  ;;  %vm1022_vm10 = vcmask 293888  }
  0x10   : > { %463 = vst.msk [vmem:[#allocation2 + $0x30] sm:$0xff] %vm455_vm0, %v1393_v0  ;;  %v338_v13 = vld [vmem:[%s1537_s11 + $0x98] sm:$0xff]  ;;  %v358_v14 = vmul.f32 %v1544_v2, %v322_v8  ;;  %v373_v17 = vmul.f32 %v1544_v2, %v337_v11  ;;  %v324_v18 = vld [vmem:[%s1537_s11 + $0x28] sm:$0xff]  ;;  %v359_v22 = vmul.f32 %v1544_v2, %v323_v15  ;;  %v339_v23 = vld [vmem:[%s1537_s11 + $0xa0] sm:$0xff] }
  0x11   : > { %464 = vst.msk [vmem:[#allocation2 + $0x38] sm:$0xff] %vm455_vm0, %v1393_v0  ;;  %v391_v16 = vadd.f32 %v1561_v7, %v355_v6  ;;  %v392_v19 = vadd.f32 %v1561_v7, %v356_v10  ;;  %v374_v20 = vmul.f32 %v1544_v2, %v338_v13  ;;  %v393_v21 = vadd.f32 %v1561_v7, %v357_v12  ;;  %v340_v28 = vld [vmem:[%s1537_s11 + $0xa8] sm:$0xff]  ;;  %v325_v41 = vld [vmem:[%s1537_s11 + $0x30] sm:$0xff]  ;;  %v326_v42 = vld [vmem:[%s1537_s11 + $0x38] sm:$0xff] }
  0x12   : > { %466 = vst.msk [vmem:[#allocation2 + $0x48] sm:$0xff] %vm455_vm0, %v1393_v0  ;;  %v394_v24 = vadd.f32 %v1561_v7, %v358_v14  ;;  %v360_v25 = vmul.f32 %v1544_v2, %v324_v18  ;;  %v409_v27 = vadd.f32 %v1561_v7, %v373_v17  ;;  %v375_v31 = vmul.f32 %v1544_v2, %v339_v23  ;;  %v341_v56 = vld [vmem:[%s1537_s11 + $0xb0] sm:$0xff]  ;;  %v342_v57 = vld [vmem:[%s1537_s11 + $0xb8] sm:$0xff]  ;;  %v327_v6 = vld [vmem:[%s1537_s11 + $0x40] sm:$0xff] }
  0x13   : > { %467 = vst.msk [vmem:[#allocation2 + $0x50] sm:$0xff] %vm455_vm0, %v1393_v0  ;;  %v423_v26 = vmax.f32 %v391_v16, 0.0  ;;  %v424_v29 = vmax.f32 %v392_v19, 0.0  ;;  %v410_v30 = vadd.f32 %v1561_v7, %v374_v20  ;;  %v425_v32 = vmax.f32 %v393_v21, 0.0  ;;  %v328_v8 = vld [vmem:[%s1537_s11 + $0x48] sm:$0xff]  ;;  %v343_v18 = vld [vmem:[%s1537_s11 + $0xc0] sm:$0xff] }
  0x14   : > { %v560_v1 = vld [vmem:[#allocation2 + $0x1] ss:$2 sm:$0xff]  ;;  %469 = vst.msk [vmem:[#allocation2 + $0x60] sm:$0xff] %vm455_vm0, %v1393_v0  ;;  %v395_v33 = vadd.f32 %v1561_v7, %v359_v22  ;;  %v426_v34 = vmax.f32 %v394_v24, 0.0  ;;  %v396_v35 = vadd.f32 %v1561_v7, %v360_v25  ;;  %v376_v36 = vmul.f32 %v1544_v2, %v340_v28 }
  0x15   : > { %694 = vrot.lane.b32.xlu0 %v560_v1, %s1394_s29  ;;  %470 = vst.msk [vmem:[#allocation2 + $0x68] sm:$0xff] %vm455_vm0, %v1393_v0  ;;  %v441_v37 = vmax.f32 %v409_v27, 0.0  ;;  %v442_v38 = vmax.f32 %v410_v30, 0.0  ;;  %v411_v39 = vadd.f32 %v1561_v7, %v375_v31  ;;  %v361_v45 = vmul.f32 %v1544_v2, %v325_v41  ;;  %v344_v19 = vld [vmem:[%s1537_s11 + $0xc8] sm:$0xff]  ;;  %v330_v30 = vld [vmem:[%s1537_s11 + $0x58] sm:$0xff] }
  0x16   : > { %472 = vst.msk [vmem:[#allocation2 + $0x78] sm:$0xff] %vm455_vm0, %v1393_v0  ;;  %v427_v40 = vmax.f32 %v395_v33, 0.0  ;;  %v428_v43 = vmax.f32 %v396_v35, 0.0  ;;  %v412_v44 = vadd.f32 %v1561_v7, %v376_v36  ;;  %v362_v46 = vmul.f32 %v1544_v2, %v326_v42  ;;  %v346_v41 = vld [vmem:[%s1537_s11 + $0xd8] sm:$0xff] }
  0x17   : > { %473 = vst.msk [vmem:[#allocation2 + $0x80] sm:$0xff] %vm455_vm0, %v1393_v0  ;;  %v443_v47 = vmax.f32 %v411_v39, 0.0  ;;  %v397_v48 = vadd.f32 %v1561_v7, %v361_v45  ;;  %v377_v58 = vmul.f32 %v1544_v2, %v341_v56  ;;  %v378_v59 = vmul.f32 %v1544_v2, %v342_v57 }
  0x18   : > { %475 = vst.msk [vmem:[#allocation2 + $0x90] sm:$0xff] %vm455_vm0, %v1393_v0  ;;  %v398_v49 = vadd.f32 %v1561_v7, %v362_v46  ;;  %v444_v50 = vmax.f32 %v412_v44, 0.0  ;;  %v364_v10 = vmul.f32 %v1544_v2, %v328_v8  ;;  %v379_v20 = vmul.f32 %v1544_v2, %v343_v18  ;;  %v348_v8 = vld [vmem:[%s1537_s11 + $0xe8] sm:$0xff]  ;;  %v333_v18 = vld [vmem:[%s1537_s11 + $0x70] sm:$0xff] }
  0x19   : > { %476 = vst.msk [vmem:[#allocation2 + $0x98] sm:$0xff] %vm455_vm0, %v1393_v0  ;;  %v429_v53 = vmax.f32 %v397_v48, 0.0  ;;  %v413_v62 = vadd.f32 %v1561_v7, %v377_v58  ;;  %v414_v63 = vadd.f32 %v1561_v7, %v378_v59  ;;  %v380_v21 = vmul.f32 %v1544_v2, %v344_v19  ;;  %v331_v58 = vld [vmem:[%s1537_s11 + $0x60] sm:$0xff]  ;;  %v332_v59 = vld [vmem:[%s1537_s11 + $0x68] sm:$0xff]  ;;  %v334_v19 = vld [vmem:[%s1537_s11 + $0x78] sm:$0xff] }
  0x1a   : > { %478 = vst.msk [vmem:[#allocation2 + $0xa8] sm:$0xff] %vm455_vm0, %v1393_v0  ;;  %v430_v54 = vmax.f32 %v398_v49, 0.0  ;;  %v400_v13 = vadd.f32 %v1561_v7, %v364_v10  ;;  %v415_v23 = vadd.f32 %v1561_v7, %v379_v20  ;;  %v384_v10 = vmul.f32 %v1544_v2, %v348_v8 }
  0x1b   : > { %479 = vst.msk [vmem:[#allocation2 + $0xb0] sm:$0xff] %vm455_vm0, %v1393_v0  ;;  %v445_v1 = vmax.f32 %v413_v62, 0.0  ;;  %v446_v3 = vmax.f32 %v414_v63, 0.0  ;;  %v416_v24 = vadd.f32 %v1561_v7, %v380_v21  ;;  %v369_v20 = vmul.f32 %v1544_v2, %v333_v18 }
  0x1c   : > { %481 = vst.msk [vmem:[#allocation2 + $0xc0] sm:$0xff] %vm455_vm0, %v1393_v0  ;;  %v432_v15 = vmax.f32 %v400_v13, 0.0  ;;  %v447_v25 = vmax.f32 %v415_v23, 0.0  ;;  %v370_v21 = vmul.f32 %v1544_v2, %v334_v19 }
  0x1d   : > { %482 = vst.msk [vmem:[#allocation2 + $0xc8] sm:$0xff] %vm455_vm0, %v1393_v0 }
  0x1e   : > { %484 = vst.msk [vmem:[#allocation2 + $0xd8] sm:$0xff] %vm455_vm0, %v1393_v0  ;;  %v406_v23 = vadd.f32 %v1561_v7, %v370_v21 }
  0x1f   : > { %485 = vst.msk [vmem:[#allocation2 + $0xe0] sm:$0xff] %vm455_vm0, %v1393_v0 }
  0x20   : > { %487 = vst.msk [vmem:[#allocation2 + $0xf0] sm:$0xff] %vm455_vm0, %v1393_v0 }
  0x21   : > { %488 = vst.msk [vmem:[#allocation2 + $0xf8] sm:$0xff] %vm455_vm0, %v1393_v0 }
  0x22   : > { %490 = vst.msk [vmem:[#allocation2 + $0x108] sm:$0xff] %vm455_vm0, %v1393_v0 }
  0x23   : > { %491 = vst.msk [vmem:[#allocation2 + $0x110] sm:$0xff] %vm455_vm0, %v1393_v0 }
  0x24   : > { %493 = vst.msk [vmem:[#allocation2 + $0x120] sm:$0xff] %vm455_vm0, %v1393_v0 }
  0x25   : > { %494 = vst.msk [vmem:[#allocation2 + $0x128] sm:$0xff] %vm455_vm0, %v1393_v0 }
  0x26   : > { %496 = vst.msk [vmem:[#allocation2 + $0x138] sm:$0xff] %vm455_vm0, %v1393_v0 }
  0x27   : > { %497 = vst.msk [vmem:[#allocation2 + $0x140] sm:$0xff] %vm455_vm0, %v1393_v0 }
  0x28   : > { %499 = vst.msk [vmem:[#allocation2 + $0x150] sm:$0xff] %vm455_vm0, %v1393_v0 }
  0x29   : > { %500 = vst.msk [vmem:[#allocation2 + $0x158] sm:$0xff] %vm455_vm0, %v1393_v0 }
  0x2a   : > { %502 = vst.msk [vmem:[#allocation2 + $0x168] sm:$0xff] %vm455_vm0, %v1393_v0 }
  0x2b   : > { %503 = vst.msk [vmem:[#allocation2 + $0x170] sm:$0xff] %vm455_vm0, %v1393_v0 }
  0x2c   : > { %505 = vst.msk [vmem:[#allocation2 + $0x180] sm:$0xff] %vm455_vm0, %v1393_v0 }
  0x2d   : > { %506 = vst.msk [vmem:[#allocation2 + $0x188] sm:$0xff] %vm455_vm0, %v1393_v0 }
  0x2e   : > { %459 = vst.msk [vmem:[#allocation2 + $0x10] sm:$0x3] %vm458_vm1, %v1393_v0 }
  0x2f   : > { %462 = vst.msk [vmem:[#allocation2 + $0x28] sm:$0x3] %vm458_vm1, %v1393_v0 }
  0x30   : > { %465 = vst.msk [vmem:[#allocation2 + $0x40] sm:$0x3] %vm458_vm1, %v1393_v0 }
  0x31   : > { %468 = vst.msk [vmem:[#allocation2 + $0x58] sm:$0x3] %vm458_vm1, %v1393_v0 }
  0x32   : > { %471 = vst.msk [vmem:[#allocation2 + $0x70] sm:$0x3] %vm458_vm1, %v1393_v0 }
  0x33   : > { %474 = vst.msk [vmem:[#allocation2 + $0x88] sm:$0x3] %vm458_vm1, %v1393_v0 }
  0x34   : > { %477 = vst.msk [vmem:[#allocation2 + $0xa0] sm:$0x3] %vm458_vm1, %v1393_v0 }
  0x35   : > { %v576_v9 = vld [vmem:[#allocation2 + $0x2] ss:$2 sm:$0xff]  ;;  %480 = vst.msk [vmem:[#allocation2 + $0xb8] sm:$0x3] %vm458_vm1, %v1393_v0 }
  0x36   : > { %726 = vrot.lane.b32.xlu0 %v576_v9, %s1395_s16  ;;  %483 = vst.msk [vmem:[#allocation2 + $0xd0] sm:$0x3] %vm458_vm1, %v1393_v0  ;;  %v363_v9 = vmul.f32 %v1544_v2, %v327_v6  ;;  %v347_v6 = vld [vmem:[%s1537_s11 + $0xe0] sm:$0xff] }
  0x37   : > { %486 = vst.msk [vmem:[#allocation2 + $0xe8] sm:$0x3] %vm458_vm1, %v1393_v0 }
  0x38   : > { %489 = vst.msk [vmem:[#allocation2 + $0x100] sm:$0x3] %vm458_vm1, %v1393_v0  ;;  %v399_v12 = vadd.f32 %v1561_v7, %v363_v9  ;;  %v383_v9 = vmul.f32 %v1544_v2, %v347_v6 }
  0x39   : > { %492 = vst.msk [vmem:[#allocation2 + $0x118] sm:$0x3] %vm458_vm1, %v1393_v0 }
  0x3a   : > { %495 = vst.msk [vmem:[#allocation2 + $0x130] sm:$0x3] %vm458_vm1, %v1393_v0  ;;  %v431_v14 = vmax.f32 %v399_v12, 0.0  ;;  %v420_v12 = vadd.f32 %v1561_v7, %v384_v10 }
  0x3b   : > { %498 = vst.msk [vmem:[#allocation2 + $0x148] sm:$0x3] %vm458_vm1, %v1393_v0 }
  0x3c   : > { %501 = vst.msk [vmem:[#allocation2 + $0x160] sm:$0x3] %vm458_vm1, %v1393_v0 }
  0x3d   : > { %504 = vst.msk [vmem:[#allocation2 + $0x178] sm:$0x3] %vm458_vm1, %v1393_v0 }
  0x3e   : > { %507 = vst.msk [vmem:[#allocation2 + $0x190] sm:$0x3] %vm458_vm1, %v1393_v0 }
  0x3f   : > { %512 = vst.msk [vmem:[#allocation2 + $0x19] sm:$0xff] %vm455_vm0, %v423_v26  ;;  %v448_v26 = vmax.f32 %v416_v24, 0.0 }
  0x40   : > { %513 = vst.msk [vmem:[#allocation2 + $0x21] sm:$0xff] %vm455_vm0, %v424_v29  ;;  %v329_v29 = vld [vmem:[%s1537_s11 + $0x50] sm:$0xff] }
  0x41   : > { %514 = vst.msk [vmem:[#allocation2 + $0x31] sm:$0xff] %vm455_vm0, %v425_v32  ;;  %v365_v31 = vmul.f32 %v1544_v2, %v329_v29  ;;  %v366_v32 = vmul.f32 %v1544_v2, %v330_v30  ;;  %v349_v29 = vld [vmem:[%s1537_s11 + $0xf0] sm:$0xff]  ;;  %v350_v30 = vld [vmem:[%s1537_s11 + $0xf8] sm:$0xff] }
  0x42   : > { %515 = vst.msk [vmem:[#allocation2 + $0x39] sm:$0xff] %vm455_vm0, %v426_v34 }
  0x43   : > { %530 = vst.msk [vmem:[#allocation2 + $0xf1] sm:$0xff] %vm455_vm0, %v441_v37  ;;  %v401_v34 = vadd.f32 %v1561_v7, %v365_v31  ;;  %v402_v35 = vadd.f32 %v1561_v7, %v366_v32  ;;  %v1017_v32 = vld [vmem:[%s1955_s3 + $0x20] sm:$0xf] }
  0x44   : > { %531 = vst.msk [vmem:[#allocation2 + $0xf9] sm:$0xff] %vm455_vm0, %v442_v38  ;;  %1334 = vmatpush.msk.msra.mxu0 %vm1047_vm2, %v1017_v32  ;;  %1357 = vmatpush.msk.msra.mxu2 %vm1047_vm2, %v1017_v32 }
  0x45   : > { %516 = vst.msk [vmem:[#allocation2 + $0x49] sm:$0xff] %vm455_vm0, %v427_v40  ;;  %v433_v36 = vmax.f32 %v401_v34, 0.0  ;;  %v434_v37 = vmax.f32 %v402_v35, 0.0  ;;  %v345_v40 = vld [vmem:[%s1537_s11 + $0xd0] sm:$0xff]  ;;  %v386_v34 = vmul.f32 %v1544_v2, %v350_v30  ;;  %v1016_v35 = vld [vmem:[%s1955_s3 + $0x18] sm:$0xff] }
  0x46   : > { %517 = vst.msk [vmem:[#allocation2 + $0x51] sm:$0xff] %vm455_vm0, %v428_v43  ;;  %v381_v42 = vmul.f32 %v1544_v2, %v345_v40  ;;  %v382_v43 = vmul.f32 %v1544_v2, %v346_v41  ;;  %1063 = vmatpush.msra.mxu0 %v1016_v35  ;;  %1358 = vmatpush.msra.mxu2 %v1016_v35 }
  0x47   : > { %v623_v51 = vld [vmem:[#allocation2 + $0x1a] ss:$2 sm:$0xff]  ;;  %532 = vst.msk [vmem:[#allocation2 + $0x109] sm:$0xff] %vm455_vm0, %v443_v47  ;;  %v607_v61 = vld [vmem:[#allocation2 + $0x19] ss:$2 sm:$0xff]  ;;  %v422_v40 = vadd.f32 %v1561_v7, %v386_v34 }
  0x48   : > { %v591_v52 = vld [vmem:[#allocation2 + $0x18] ss:$2 sm:$0xff]  ;;  %822 = vrot.lane.b32.xlu2 %v623_v51, %s1396_s17  ;;  %533 = vst.msk [vmem:[#allocation2 + $0x111] sm:$0xff] %vm455_vm0, %v444_v50  ;;  %v417_v45 = vadd.f32 %v1561_v7, %v381_v42  ;;  %v418_v46 = vadd.f32 %v1561_v7, %v382_v43 }
  0x49   : > { %758 = vrot.lane.b32.xlu1 %v591_v52, %s1397_s18  ;;  %v655_v55 = vld [vmem:[#allocation2 + $0x31] ss:$2 sm:$0xff]  ;;  %518 = vst.msk [vmem:[#allocation2 + $0x61] sm:$0xff] %vm455_vm0, %v429_v53  ;;  %v639_v60 = vld [vmem:[#allocation2 + $0x30] ss:$2 sm:$0xff]  ;;  %v454_v43 = vmax.f32 %v422_v40, 0.0 }
  0x4a   : > { %886 = vrot.lane.b32.xlu0 %v655_v55, %s1398_s19  ;;  %519 = vst.msk [vmem:[#allocation2 + $0x69] sm:$0xff] %vm455_vm0, %v430_v54  ;;  %v578_v0 = vld [vmem:[#allocation2 + $0x32] ss:$2 sm:$0xff]  ;;  %v562_v4 = vld [vmem:[#allocation2 + $0x31] ss:$2 sm:$0xff]  ;;  %v449_v47 = vmax.f32 %v417_v45, 0.0 }
  0x4b   : > { %534 = vst.msk [vmem:[#allocation2 + $0x121] sm:$0xff] %vm455_vm0, %v445_v1  ;;  %v671_v5 = vld [vmem:[#allocation2 + $0x32] ss:$2 sm:$0xff]  ;;  %v570_v16 = vld [vmem:[#allocation2 + $0xf1] ss:$2 sm:$0xff]  ;;  %v450_v48 = vmax.f32 %v418_v46, 0.0 }
  0x4c   : > { %535 = vst.msk [vmem:[#allocation2 + $0x129] sm:$0xff] %vm455_vm0, %v446_v3  ;;  %v586_v11 = vld [vmem:[#allocation2 + $0xf2] ss:$2 sm:$0xff]  ;;  %v1014_v45 = vld [vmem:[%s1955_s3 + $0x8] sm:$0xff] }
  0x4d   : > { %520 = vst.msk [vmem:[#allocation2 + $0x79] sm:$0xff] %vm455_vm0, %v431_v14  ;;  %v593_v17 = vld [vmem:[#allocation2 + $0x48] ss:$2 sm:$0xff]  ;;  %v609_v27 = vld [vmem:[#allocation2 + $0x49] ss:$2 sm:$0xff] }
  0x4e   : > { %521 = vst.msk [vmem:[#allocation2 + $0x81] sm:$0xff] %vm455_vm0, %v432_v15  ;;  %v625_v22 = vld [vmem:[#allocation2 + $0x4a] ss:$2 sm:$0xff] }
  0x4f   : > { %536 = vst.msk [vmem:[#allocation2 + $0x139] sm:$0xff] %vm455_vm0, %v447_v25  ;;  %v601_v28 = vld [vmem:[#allocation2 + $0x108] ss:$2 sm:$0xff]  ;;  %v617_v38 = vld [vmem:[#allocation2 + $0x109] ss:$2 sm:$0xff] }
  0x50   : > { %854 = vrot.lane.b32.xlu2 %v639_v60, %s1399_s20  ;;  %537 = vst.msk [vmem:[#allocation2 + $0x141] sm:$0xff] %vm455_vm0, %v448_v26  ;;  %v633_v33 = vld [vmem:[#allocation2 + $0x10a] ss:$2 sm:$0xff]  ;;  %v367_v60 = vmul.f32 %v1544_v2, %v331_v58 }
  0x51   : > { %790 = vrot.lane.b32.xlu1 %v607_v61, %s1400_s21  ;;  %522 = vst.msk [vmem:[#allocation2 + $0x91] sm:$0xff] %vm455_vm0, %v433_v36  ;;  %v641_v39 = vld [vmem:[#allocation2 + $0x60] ss:$2 sm:$0xff]  ;;  %v657_v50 = vld [vmem:[#allocation2 + $0x61] ss:$2 sm:$0xff]  ;;  %v368_v61 = vmul.f32 %v1544_v2, %v332_v59 }
  0x52   : > { %728 = vrot.lane.b32.xlu0 %v578_v0, %s1395_s16  ;;  %523 = vst.msk [vmem:[#allocation2 + $0x99] sm:$0xff] %vm455_vm0, %v434_v37  ;;  %v673_v44 = vld [vmem:[#allocation2 + $0x62] ss:$2 sm:$0xff]  ;;  %v564_v53 = vld [vmem:[#allocation2 + $0x61] ss:$2 sm:$0xff]  ;;  %v403_v62 = vadd.f32 %v1561_v7, %v367_v60 }
  0x53   : > { %538 = vst.msk [vmem:[#allocation2 + $0x151] sm:$0xff] %vm455_vm0, %v449_v47  ;;  %v649_v49 = vld [vmem:[#allocation2 + $0x120] ss:$2 sm:$0xff]  ;;  %v665_v52 = vld [vmem:[#allocation2 + $0x121] ss:$2 sm:$0xff]  ;;  %v404_v63 = vadd.f32 %v1561_v7, %v368_v61 }
  0x54   : > { %539 = vst.msk [vmem:[#allocation2 + $0x159] sm:$0xff] %vm455_vm0, %v450_v48  ;;  %v580_v51 = vld [vmem:[#allocation2 + $0x62] ss:$2 sm:$0xff]  ;;  %v572_v55 = vld [vmem:[#allocation2 + $0x121] ss:$2 sm:$0xff]  ;;  %v435_v3 = vmax.f32 %v403_v62, 0.0 }
  0x55   : > { %v595_v54 = vld [vmem:[#allocation2 + $0x78] ss:$2 sm:$0xff]  ;;  %v611_v0 = vld [vmem:[#allocation2 + $0x79] ss:$2 sm:$0xff]  ;;  %543 = vst.msk [vmem:[#allocation2 + $0x189] sm:$0xff] %vm455_vm0, %v454_v43 }
  0x56   : > { %v681_v56 = vld [vmem:[#allocation2 + $0x122] ss:$2 sm:$0xff]  ;;  %524 = vst.msk [vmem:[#allocation2 + $0xa9] sm:$0xff] %vm455_vm0, %v435_v3  ;;  %v679_v40 = vld [vmem:[#allocation2 + $0xf2] ss:$2 sm:$0xff] }
  0x57   : > { %v603_v57 = vld [vmem:[#allocation2 + $0x138] ss:$2 sm:$0xff]  ;;  %v619_v13 = vld [vmem:[#allocation2 + $0x139] ss:$2 sm:$0xff] }
  0x58   : > { %696 = vrot.lane.b32.xlu2 %v562_v4, %s1394_s29  ;;  %v588_v1 = vld [vmem:[#allocation2 + $0x122] ss:$2 sm:$0xff]  ;;  %v436_v4 = vmax.f32 %v404_v63, 0.0 }
  0x59   : > { %918 = vrot.lane.b32.xlu1 %v671_v5, %s1401_s22  ;;  %v643_v5 = vld [vmem:[#allocation2 + $0x90] ss:$2 sm:$0xff]  ;;  %v659_v24 = vld [vmem:[#allocation2 + $0x91] ss:$2 sm:$0xff]  ;;  %v1013_v47 = vld [vmem:[%s1955_s3] sm:$0xff] }
  0x5a   : > { %736 = vrot.lane.b32.xlu0 %v586_v11, %s1395_s16  ;;  %525 = vst.msk [vmem:[#allocation2 + $0xb1] sm:$0xff] %vm455_vm0, %v436_v4  ;;  %v419_v11 = vadd.f32 %v1561_v7, %v383_v9  ;;  %v627_v14 = vld [vmem:[#allocation2 + $0x7a] ss:$2 sm:$0xff]  ;;  %v566_v37 = vld [vmem:[#allocation2 + $0x91] ss:$2 sm:$0xff] }
  0x5b   : > { %v635_v25 = vld [vmem:[#allocation2 + $0x13a] ss:$2 sm:$0xff]  ;;  %v574_v42 = vld [vmem:[#allocation2 + $0x151] ss:$2 sm:$0xff] }
  0x5c   : > { %v451_v15 = vmax.f32 %v419_v11, 0.0  ;;  %v683_v48 = vld [vmem:[#allocation2 + $0x152] ss:$2 sm:$0xff] }
  0x5d   : > { %v590_v59 = vld [vmem:[#allocation2 + $0x152] ss:$2 sm:$0xff] }
  0x5e   : > { %540 = vst.msk [vmem:[#allocation2 + $0x169] sm:$0xff] %vm455_vm0, %v451_v15 }
  0x60   : > { %760 = vrot.lane.b32.xlu2 %v593_v17, %s1397_s18  ;;  %v651_v17 = vld [vmem:[#allocation2 + $0x150] ss:$2 sm:$0xff] }
  0x61   : > { %704 = vrot.lane.b32.xlu1 %v570_v16, %s1394_s29  ;;  %v452_v16 = vmax.f32 %v420_v12, 0.0  ;;  %v597_v60 = vld [vmem:[#allocation2 + $0xa8] ss:$2 sm:$0xff] }
  0x62   : > { %824 = vrot.lane.b32.xlu0 %v625_v22, %s1396_s17  ;;  %v405_v22 = vadd.f32 %v1561_v7, %v369_v20  ;;  %v629_v3 = vld [vmem:[#allocation2 + $0xaa] ss:$2 sm:$0xff] }
  0x63   : > { %541 = vst.msk [vmem:[#allocation2 + $0x171] sm:$0xff] %vm455_vm0, %v452_v16 }
  0x64   : > { %v437_v26 = vmax.f32 %v405_v22, 0.0 }
  0x66   : > { %526 = vst.msk [vmem:[#allocation2 + $0xc1] sm:$0xff] %vm455_vm0, %v437_v26 }
  0x68   : > { %768 = vrot.lane.b32.xlu2 %v601_v28, %s1397_s18  ;;  %v667_v28 = vld [vmem:[#allocation2 + $0x151] ss:$2 sm:$0xff] }
  0x69   : > { %792 = vrot.lane.b32.xlu1 %v609_v27, %s1400_s21  ;;  %v438_v27 = vmax.f32 %v406_v23, 0.0 }
  0x6a   : > { %832 = vrot.lane.b32.xlu0 %v633_v33, %s1396_s17  ;;  %v385_v33 = vmul.f32 %v1544_v2, %v349_v29  ;;  %v621_v63 = vld [vmem:[#allocation2 + $0x169] ss:$2 sm:$0xff]  ;;  %v605_v4 = vld [vmem:[#allocation2 + $0x168] ss:$2 sm:$0xff] }
  0x6b   : > { %527 = vst.msk [vmem:[#allocation2 + $0xc9] sm:$0xff] %vm455_vm0, %v438_v27  ;;  %v637_v15 = vld [vmem:[#allocation2 + $0x16a] ss:$2 sm:$0xff] }
  0x6c   : > { %v421_v36 = vadd.f32 %v1561_v7, %v385_v33  ;;  %v546_v33 = vld [vmem:[#allocation2 + $0x30] ss:$2 sm:$0xff] }
  0x6e   : > { %v453_v41 = vmax.f32 %v421_v36, 0.0 }
  0x70   : > { %856 = vrot.lane.b32.xlu2 %v641_v39, %s1399_s20  ;;  %v1015_v39 = vld [vmem:[%s1955_s3 + $0x10] sm:$0xff]  ;;  %542 = vst.msk [vmem:[#allocation2 + $0x181] sm:$0xff] %vm455_vm0, %v453_v41 }
  0x71   : > { %800 = vrot.lane.b32.xlu1 %v617_v38, %s1400_s21  ;;  %v675_v38 = vld [vmem:[#allocation2 + $0x92] ss:$2 sm:$0xff]  ;;  %1064 = vmatpush.msra.mxu0 %v1015_v39 }
  0x72   : > { %920 = vrot.lane.b32.xlu0 %v673_v44, %s1401_s22  ;;  %1359 = vmatpush.msra.mxu2 %v1015_v39  ;;  %v645_v16 = vld [vmem:[#allocation2 + $0xc0] ss:$2 sm:$0xff]  ;;  %v568_v18 = vld [vmem:[#allocation2 + $0xc1] ss:$2 sm:$0xff] }
  0x73   : > { %1065 = vmatpush.msra.mxu0 %v1014_v45  ;;  %v584_v30 = vld [vmem:[#allocation2 + $0xc2] ss:$2 sm:$0xff] }
  0x74   : > { %1360 = vmatpush.msra.mxu2 %v1014_v45 }
  0x75   : > { %1066 = vmatpush.msra.mxu0 %v1013_v47 }
  0x76   : > { %1361 = vmatpush.msra.mxu2 %v1013_v47  ;;  %v663_v47 = vld [vmem:[#allocation2 + $0xf1] ss:$2 sm:$0xff] }
  0x77   : > { %v685_v26 = vld [vmem:[#allocation2 + $0x182] ss:$2 sm:$0xff] }
  0x78   : > { %864 = vrot.lane.b32.xlu2 %v649_v49, %s1399_s20  ;;  %v582_v49 = vld [vmem:[#allocation2 + $0x92] ss:$2 sm:$0xff] }
  0x79   : > { %888 = vrot.lane.b32.xlu1 %v657_v50, %s1398_s19  ;;  %v613_v50 = vld [vmem:[#allocation2 + $0xa9] ss:$2 sm:$0xff] }
  0x7a   : > { %730 = vrot.lane.b32.xlu0 %v580_v51, %s1395_s16  ;;  %v335_v51 = vld [vmem:[%s1537_s11 + $0x80] sm:$0xff] }
  0x80   : > { %896 = vrot.lane.b32.xlu2 %v665_v52, %s1398_s19  ;;  %v336_v52 = vld [vmem:[%s1537_s11 + $0x88] sm:$0xff] }
  0x81   : > { %698 = vrot.lane.b32.xlu1 %v564_v53, %s1394_s29 }
  0x82   : > { %762 = vrot.lane.b32.xlu0 %v595_v54, %s1397_s18 }
  0x87   : > { %v695_v44 = vpop.permute.xlu0 %694 }
  0x88   : > { %706 = vrot.lane.b32.xlu2 %v572_v55, %s1394_s29  ;;  %v371_v55 = vmul.f32 %v1544_v2, %v335_v51 }
  0x89   : > { %928 = vrot.lane.b32.xlu1 %v681_v56, %s1401_s22  ;;  %v372_v56 = vmul.f32 %v1544_v2, %v336_v52 }
  0x8a   : > { %770 = vrot.lane.b32.xlu0 %v603_v57, %s1397_s18  ;;  %v407_v57 = vadd.f32 %v1561_v7, %v371_v55 }
  0x8b   : > { %v408_v58 = vadd.f32 %v1561_v7, %v372_v56  ;;  %v544_v7 = vld [vmem:[#allocation2] ss:$2 sm:$0xff] }
  0x8c   : > { %v439_v61 = vmax.f32 %v407_v57, 0.0  ;;  %v942_v6 = vsel %vm455_vm0, %v544_v7, %v695_v44 }
  0x8d   : > { %v440_v62 = vmax.f32 %v408_v58, 0.0 }
  0x8e   : > { %528 = vst.msk [vmem:[#allocation2 + $0xd9] sm:$0xff] %vm455_vm0, %v439_v61 }
  0x8f   : > { %529 = vst.msk [vmem:[#allocation2 + $0xe1] sm:$0xff] %vm455_vm0, %v440_v62 }
  0x90   : > { %794 = vrot.lane.b32.xlu2 %v611_v0, %s1400_s21 }
  0x91   : > { %738 = vrot.lane.b32.xlu1 %v588_v1, %s1395_s16 }
  0x92   : > { %858 = vrot.lane.b32.xlu0 %v643_v5, %s1399_s20  ;;  %v661_v5 = vld [vmem:[#allocation2 + $0xc1] ss:$2 sm:$0xff] }
  0x96   : > { %v631_v32 = vld [vmem:[#allocation2 + $0xda] ss:$2 sm:$0xff] }
  0x97   : > { %v599_v39 = vld [vmem:[#allocation2 + $0xd8] ss:$2 sm:$0xff] }
  0x98   : > { %802 = vrot.lane.b32.xlu2 %v619_v13, %s1400_s21 }
  0x99   : > { %826 = vrot.lane.b32.xlu1 %v627_v14, %s1396_s17 }
  0x9a   : > { %866 = vrot.lane.b32.xlu0 %v651_v17, %s1399_s20 }
  0xa0   : > { %890 = vrot.lane.b32.xlu2 %v659_v24, %s1398_s19  ;;  %v677_v24 = vld [vmem:[#allocation2 + $0xc2] ss:$2 sm:$0xff] }
  0xa1   : > { %834 = vrot.lane.b32.xlu1 %v635_v25, %s1396_s17  ;;  %v653_v25 = vld [vmem:[#allocation2 + $0x180] ss:$2 sm:$0xff] }
  0xa2   : > { %v1731_v31 = vpop.permute.xlu2 %822  ;;  %898 = vrot.lane.b32.xlu0 %v667_v28, %s1398_s19 }
  0xa8   : > { %700 = vrot.lane.b32.xlu2 %v566_v37, %s1394_s29  ;;  %v727_v54 = vpop.permute.xlu0 %726 }
  0xa9   : > { %922 = vrot.lane.b32.xlu1 %v675_v38, %s1401_s22  ;;  %v951_v8 = vsel %vm950_vm3, %v942_v6, %v727_v54  ;;  %v615_v38 = vld [vmem:[#allocation2 + $0xd9] ss:$2 sm:$0xff] }
  0xaa   : > { %v855_v46 = vpop.permute.xlu2 %854  ;;  %708 = vrot.lane.b32.xlu0 %v574_v42, %s1394_s29 }
  0xb0   : > { %930 = vrot.lane.b32.xlu2 %v683_v48, %s1401_s22  ;;  %v647_v48 = vld [vmem:[#allocation2 + $0xf0] ss:$2 sm:$0xff] }
  0xb1   : > { %732 = vrot.lane.b32.xlu1 %v582_v49, %s1395_s16  ;;  %v554_v49 = vld [vmem:[#allocation2 + $0xf0] ss:$2 sm:$0xff] }
  0xb2   : > { %v1764_v53 = vpop.permute.xlu2 %696  ;;  %796 = vrot.lane.b32.xlu0 %v613_v50, %s1400_s21 }
  0xb3   : > { %v943_v37 = vsel %vm455_vm0, %v546_v33, %v1764_v53 }
  0xb8   : > { %740 = vrot.lane.b32.xlu2 %v590_v59, %s1395_s16 }
  0xb9   : > { %764 = vrot.lane.b32.xlu1 %v597_v60, %s1397_s18 }
  0xba   : > { %v1775_v0 = vpop.permute.xlu2 %760  ;;  %804 = vrot.lane.b32.xlu0 %v621_v63, %s1400_s21 }
  0xbb   : > { %v759_v2 = vpop.permute.xlu1 %758 }
  0xbc   : > { %v887_v1 = vpop.permute.xlu0 %886  ;;  %v960_v9 = vsel %vm959_vm4, %v951_v8, %v759_v2 }
  0xc0   : > { %828 = vrot.lane.b32.xlu2 %v629_v3, %s1396_s17 }
  0xc1   : > { %772 = vrot.lane.b32.xlu1 %v605_v4, %s1397_s18 }
  0xc2   : > { %v1783_v10 = vpop.permute.xlu2 %768  ;;  %892 = vrot.lane.b32.xlu0 %v661_v5, %s1398_s19 }
  0xc3   : > { %v791_v11 = vpop.permute.xlu1 %790 }
  0xc4   : > { %v969_v12 = vsel %vm968_vm5, %v960_v9, %v791_v11  ;;  %v729_v14 = vpop.permute.xlu0 %728  ;;  %v556_v9 = vld [vmem:[#allocation2 + $0x120] ss:$2 sm:$0xff] }
  0xc5   : > { %v978_v13 = vsel %vm977_vm6, %v969_v12, %v1731_v31  ;;  %v669_v31 = vld [vmem:[#allocation2 + $0x181] ss:$2 sm:$0xff]  ;;  %v952_v41 = vsel %vm950_vm3, %v943_v37, %v729_v14  ;;  %v548_v11 = vld [vmem:[#allocation2 + $0x60] ss:$2 sm:$0xff] }
  0xc6   : > { %v987_v17 = vsel %vm986_vm7, %v978_v13, %v855_v46  ;;  %v961_v44 = vsel %vm959_vm4, %v952_v41, %v1775_v0  ;;  %v550_v41 = vld [vmem:[#allocation2 + $0x90] ss:$2 sm:$0xff] }
  0xc7   : > { %v996_v21 = vsel %vm995_vm8, %v987_v17, %v887_v1 }
  0xc8   : > { %836 = vrot.lane.b32.xlu2 %v637_v15, %s1396_s17 }
  0xc9   : > { %860 = vrot.lane.b32.xlu1 %v645_v16, %s1399_s20 }
  0xca   : > { %v857_v19 = vpop.permute.xlu2 %856  ;;  %702 = vrot.lane.b32.xlu0 %v568_v18, %s1394_s29  ;;  %s1402_s29 = smov 112  }
  0xcb   : > { %v919_v20 = vpop.permute.xlu1 %918 }
  0xcc   : > { %v1005_v22 = vsel %vm1004_vm9, %v996_v21, %v919_v20  ;;  %v737_v23 = vpop.permute.xlu0 %736 }
  0xcd   : > { %1335 = vmatmul.msk.f32.vlgmr.msra.gmra.mxu0 %vm1022_vm10, %v1005_v22 }
  0xd0   : > { %924 = vrot.lane.b32.xlu2 %v677_v24, %s1401_s22 }
  0xd1   : > { %868 = vrot.lane.b32.xlu1 %v653_v25, %s1399_s20 }
  0xd2   : > { %v865_v27 = vpop.permute.xlu2 %864  ;;  %932 = vrot.lane.b32.xlu0 %v685_v26, %s1401_s22 }
  0xd3   : > { %v705_v28 = vpop.permute.xlu1 %704 }
  0xd4   : > { %v825_v29 = vpop.permute.xlu0 %824  ;;  %v947_v51 = vsel %vm455_vm0, %v554_v49, %v705_v28 }
  0xd5   : > { %v956_v58 = vsel %vm950_vm3, %v947_v51, %v737_v23 }
  0xd6   : > { %v965_v59 = vsel %vm959_vm4, %v956_v58, %v1783_v10 }
  0xd8   : > { %734 = vrot.lane.b32.xlu2 %v584_v30, %s1395_s16  ;;  %s1355_s16 = sshll.u32 %s1962_s28, 6 }
  0xd9   : > { %900 = vrot.lane.b32.xlu1 %v669_v31, %s1398_s19  ;;  %s1931_s26 = scalar_lea.vmem %s1960_s8, %s1355_s16 }
  0xda   : > { %v897_v34 = vpop.permute.xlu2 %896  ;;  %830 = vrot.lane.b32.xlu0 %v631_v32, %s1396_s17 }
  0xdb   : > { %v793_v35 = vpop.permute.xlu1 %792 }
  0xdc   : > { %v833_v36 = vpop.permute.xlu0 %832  ;;  %v970_v45 = vsel %vm968_vm5, %v961_v44, %v793_v35 }
  0xdd   : > { %v979_v50 = vsel %vm977_vm6, %v970_v45, %v825_v29 }
  0xde   : > { %v988_v52 = vsel %vm986_vm7, %v979_v50, %v857_v19 }
  0xe0   : > { %798 = vrot.lane.b32.xlu2 %v615_v38, %s1400_s21  ;;  %s1886_s21 = scalar_lea.vmem %s1959_s7, %s1355_s16 }
  0xe1   : > { %766 = vrot.lane.b32.xlu1 %v599_v39, %s1397_s18 }
  0xe2   : > { %v707_v42 = vpop.permute.xlu2 %706  ;;  %926 = vrot.lane.b32.xlu0 %v679_v40, %s1401_s22 }
  0xe3   : > { %v801_v43 = vpop.permute.xlu1 %800  ;;  %v948_v10 = vsel %vm455_vm0, %v556_v9, %v707_v42 }
  0xe4   : > { %v921_v46 = vpop.permute.xlu0 %920  ;;  %v974_v60 = vsel %vm968_vm5, %v965_v59, %v801_v43 }
  0xe5   : > { %v983_v62 = vsel %vm977_vm6, %v974_v60, %v833_v36 }
  0xe6   : > { %v992_v2 = vsel %vm986_vm7, %v983_v62, %v865_v27 }
  0xe7   : > { %v1001_v7 = vsel %vm995_vm8, %v992_v2, %v897_v34 }
  0xe8   : > { %894 = vrot.lane.b32.xlu2 %v663_v47, %s1398_s19 }
  0xe9   : > { %862 = vrot.lane.b32.xlu1 %v647_v48, %s1399_s20 }
  0xea   : > { %v795_v55 = vpop.permute.xlu2 %794 }
  0xeb   : > { %v889_v53 = vpop.permute.xlu1 %888 }
  0xec   : > { %v997_v54 = vsel %vm995_vm8, %v988_v52, %v889_v53  ;;  %v731_v57 = vpop.permute.xlu0 %730  ;;  %v558_v52 = vld [vmem:[#allocation2 + $0x150] ss:$2 sm:$0xff] }
  0xed   : > { %v1006_v56 = vsel %vm1004_vm9, %v997_v54, %v921_v46 }
  0xee   : > { %1336 = vmatmul.msk.f32.gmra.mxu0 %vm1022_vm10, %v1006_v56 }
  0xf0   : > { %1107 = vrot.lane.b32.xlu2 %v1006_v56, %s1402_s29 }
  0xf1   : > { %1105 = vrot.lane.b32.xlu1 %v1005_v22, %s1402_s29 }
  0xf2   : > { %v803_v0 = vpop.permute.xlu2 %802 }
  0xf3   : > { %v699_v61 = vpop.permute.xlu1 %698 }
  0xf4   : > { %v763_v63 = vpop.permute.xlu0 %762  ;;  %v944_v14 = vsel %vm455_vm0, %v548_v11, %v699_v61 }
  0xf5   : > { %v953_v17 = vsel %vm950_vm3, %v944_v14, %v731_v57  ;;  %v1100_v57 = vld [vmem:[%s1957_s5] sm:$0xf] }
  0xf6   : > { %v962_v19 = vsel %vm959_vm4, %v953_v17, %v763_v63  ;;  %1343 = vmatpush.msk.msra.mxu1 %vm1047_vm2, %v1100_v57  ;;  %1362 = vmatpush.msk.msra.mxu3 %vm1047_vm2, %v1100_v57  ;;  %v1878_v63 = vld [vmem:[%s1956_s4] ss:$0 sm:$0xff] }
  0xf7   : > { %v971_v22 = vsel %vm968_vm5, %v962_v19, %v795_v55 }
  0xfa   : > { %v891_v5 = vpop.permute.xlu2 %890 }
  0xfb   : > { %v929_v1 = vpop.permute.xlu1 %928 }
  0xfc   : > { %v1829_v3 = vsel %vm1004_vm9, %v1001_v7, %v929_v1  ;;  %v771_v4 = vpop.permute.xlu0 %770 }
  0xfd   : > { %1115 = vrot.lane.b32.xlu0 %v1829_v3, %s1402_s29 }
 0x102   : > { %v701_v12 = vpop.permute.xlu2 %700 }
 0x103   : > { %v739_v6 = vpop.permute.xlu1 %738  ;;  %v945_v42 = vsel %vm455_vm0, %v550_v41, %v701_v12 }
 0x104   : > { %v859_v8 = vpop.permute.xlu0 %858  ;;  %v957_v15 = vsel %vm950_vm3, %v948_v10, %v739_v6  ;;  %v552_v10 = vld [vmem:[#allocation2 + $0xc0] ss:$2 sm:$0xff] }
 0x105   : > { %v966_v18 = vsel %vm959_vm4, %v957_v15, %v771_v4 }
 0x106   : > { %v975_v20 = vsel %vm968_vm5, %v966_v18, %v803_v0 }
 0x10a   : > { %v931_v24 = vpop.permute.xlu2 %930 }
 0x10b   : > { %v827_v13 = vpop.permute.xlu1 %826 }
 0x10c   : > { %v867_v16 = vpop.permute.xlu0 %866  ;;  %v980_v25 = vsel %vm977_vm6, %v971_v22, %v827_v13 }
 0x10d   : > { %v989_v30 = vsel %vm986_vm7, %v980_v25, %v859_v8 }
 0x10e   : > { %v998_v32 = vsel %vm995_vm8, %v989_v30, %v891_v5 }
 0x112   : > { %v741_v35 = vpop.permute.xlu2 %740 }
 0x113   : > { %v835_v21 = vpop.permute.xlu1 %834 }
 0x114   : > { %v984_v23 = vsel %vm977_vm6, %v975_v20, %v835_v21  ;;  %v899_v26 = vpop.permute.xlu0 %898 }
 0x115   : > { %v993_v27 = vsel %vm986_vm7, %v984_v23, %v867_v16 }
 0x116   : > { %v1002_v28 = vsel %vm995_vm8, %v993_v27, %v899_v26 }
 0x117   : > { %v1846_v29 = vsel %vm1004_vm9, %v1002_v28, %v931_v24 }
 0x118   : > { %1117 = vrot.lane.b32.xlu2 %v1846_v29, %s1402_s29 }
 0x11a   : > { %v829_v38 = vpop.permute.xlu2 %828 }
 0x11b   : > { %v923_v31 = vpop.permute.xlu1 %922 }
 0x11c   : > { %v1007_v33 = vsel %vm1004_vm9, %v998_v32, %v923_v31  ;;  %v709_v34 = vpop.permute.xlu0 %708 }
 0x11d   : > { %1109 = vrot.lane.b32.xlu1 %v1007_v33, %s1402_s29  ;;  %1337 = vmatmul.msk.f32.gmra.mxu0 %vm1022_vm10, %v1007_v33  ;;  %v949_v58 = vsel %vm455_vm0, %v558_v52, %v709_v34 }
 0x11e   : > { %v958_v59 = vsel %vm950_vm3, %v949_v58, %v741_v35 }
 0x122   : > { %v837_v43 = vpop.permute.xlu2 %836 }
 0x123   : > { %v733_v36 = vpop.permute.xlu1 %732 }
 0x124   : > { %v797_v37 = vpop.permute.xlu0 %796  ;;  %v954_v45 = vsel %vm950_vm3, %v945_v42, %v733_v36 }
 0x12a   : > { %v925_v53 = vpop.permute.xlu2 %924 }
 0x12b   : > { %v765_v39 = vpop.permute.xlu1 %764 }
 0x12c   : > { %v805_v40 = vpop.permute.xlu0 %804  ;;  %v963_v46 = vsel %vm959_vm4, %v954_v45, %v765_v39 }
 0x12d   : > { %v972_v48 = vsel %vm968_vm5, %v963_v46, %v797_v37 }
 0x12e   : > { %v981_v49 = vsel %vm977_vm6, %v972_v48, %v829_v38  ;;  %v1384_v38 = vld [vmem:[%s1958_s6] ss:$0 sm:$0xff] }
 0x132   : > { %v735_v2 = vpop.permute.xlu2 %734 }
 0x133   : > { %v773_v44 = vpop.permute.xlu1 %772 }
 0x134   : > { %v893_v47 = vpop.permute.xlu0 %892  ;;  %v967_v61 = vsel %vm959_vm4, %v958_v59, %v773_v44 }
 0x135   : > { %v976_v62 = vsel %vm968_vm5, %v967_v61, %v805_v40 }
 0x136   : > { %v985_v1 = vsel %vm977_vm6, %v976_v62, %v837_v43 }
 0x13a   : > { %v799_v13 = vpop.permute.xlu2 %798 }
 0x13b   : > { %v861_v50 = vpop.permute.xlu1 %860 }
 0x13c   : > { %v990_v51 = vsel %vm986_vm7, %v981_v49, %v861_v50  ;;  %v703_v55 = vpop.permute.xlu0 %702 }
 0x13d   : > { %v999_v54 = vsel %vm995_vm8, %v990_v51, %v893_v47  ;;  %v946_v11 = vsel %vm455_vm0, %v552_v10, %v703_v55 }
 0x13e   : > { %v1008_v56 = vsel %vm1004_vm9, %v999_v54, %v925_v53  ;;  %v955_v15 = vsel %vm950_vm3, %v946_v11, %v735_v2 }
 0x13f   : > { %1111 = vrot.lane.b32.xlu0 %v1008_v56, %s1402_s29  ;;  %1338 = vmatmul.msk.f32.gmra.mxu0 %vm1022_vm10, %v1008_v56 }
 0x142   : > { %v895_v21 = vpop.permute.xlu2 %894 }
 0x143   : > { %v869_v60 = vpop.permute.xlu1 %868 }
 0x144   : > { %v933_v0 = vpop.permute.xlu0 %932  ;;  %v994_v4 = vsel %vm986_vm7, %v985_v1, %v869_v60 }
 0x14a   : > { %v1068_v7 = vpop.f32.mrf.mxu0  ;;  %v1108_v26 = vpop.permute.xlu2 %1107 }
 0x14b   : > { %v1069_v5 = vadd.f32 %v1878_v63, %v1068_v7  ;;  %v901_v6 = vpop.permute.xlu1 %900 }
 0x14c   : > { %v1003_v8 = vsel %vm995_vm8, %v994_v4, %v901_v6  ;;  %v831_v12 = vpop.permute.xlu0 %830 }
 0x14d   : > { %1092 = vst [vmem:[%s1886_s21] sm:$0xff] %v1069_v5  ;;  %v1012_v9 = vsel %vm1004_vm9, %v1003_v8, %v933_v0 }
 0x14e   : > { %1119 = vrot.lane.b32.xlu1 %v1012_v9, %s1402_s29 }
 0x153   : > { %v767_v14 = vpop.permute.xlu1 %766 }
 0x154   : > { %v964_v16 = vsel %vm959_vm4, %v955_v15, %v767_v14  ;;  %v927_v20 = vpop.permute.xlu0 %926 }
 0x155   : > { %v973_v17 = vsel %vm968_vm5, %v964_v16, %v799_v13 }
 0x156   : > { %v982_v18 = vsel %vm977_vm6, %v973_v17, %v831_v12 }
 0x15b   : > { %v863_v19 = vpop.permute.xlu1 %862 }
 0x15c   : > { %v991_v22 = vsel %vm986_vm7, %v982_v18, %v863_v19 }
 0x15d   : > { %v1000_v23 = vsel %vm995_vm8, %v991_v22, %v895_v21 }
 0x15e   : > { %v1009_v24 = vsel %vm1004_vm9, %v1000_v23, %v927_v20 }
 0x15f   : > { %1113 = vrot.lane.b32.xlu2 %v1009_v24, %s1402_s29  ;;  %1339 = vmatmul.msk.f32.vlgmr.msra.gmra.mxu2 %vm1022_vm10, %v1009_v24 }
 0x163   : > { %v1106_v25 = vpop.permute.xlu1 %1105 }
 0x164   : > { %1344 = vmatmul.msk.f32.vlgmr.msra.gmra.mxu1 %vm455_vm0, %v1106_v25 }
 0x167   : > { %1340 = vmatmul.msk.f32.gmra.mxu2 %vm1022_vm10, %v1829_v3 }
 0x16b   : > { %v1071_v27 = vpop.f32.mrf.mxu0 }
 0x16c   : > { %v1072_v28 = vadd.f32 %v1878_v63, %v1071_v27  ;;  %1345 = vmatmul.msk.f32.gmra.mxu1 %vm455_vm0, %v1108_v26 }
 0x16e   : > { %1093 = vst [vmem:[%s1886_s21 + $0x8] sm:$0xff] %v1072_v28 }
 0x16f   : > { %v1116_v30 = vpop.permute.xlu0 %1115  ;;  %1341 = vmatmul.msk.f32.gmra.mxu2 %vm1022_vm10, %v1846_v29 }
 0x170   : > { %1349 = vmatmul.msk.f32.vlgmr.msra.gmra.mxu3 %vm455_vm0, %v1116_v30 }
 0x172   : > { %v1118_v31 = vpop.permute.xlu2 %1117 }
 0x177   : > { %1342 = vmatmul.msk.f32.gmra.mxu2 %vm1022_vm10, %v1012_v9 }
 0x178   : > { %1350 = vmatmul.msk.f32.gmra.mxu3 %vm455_vm0, %v1118_v31 }
 0x18f   : > { %v1110_v3 = vpop.permute.xlu1 %1109 }
 0x190   : > { %1346 = vmatmul.msk.f32.gmra.mxu1 %vm455_vm0, %v1110_v3 }
 0x19a   : > { %v1074_v32 = vpop.f32.mrf.mxu0 }
 0x19b   : > { %v1075_v33 = vadd.f32 %v1878_v63, %v1074_v32 }
 0x19d   : > { %1094 = vst [vmem:[%s1886_s21 + $0x10] sm:$0xff] %v1075_v33 }
 0x1b1   : > { %v1112_v34 = vpop.permute.xlu0 %1111 }
 0x1b2   : > { %1347 = vmatmul.msk.f32.gmra.mxu1 %vm455_vm0, %v1112_v34 }
 0x1b9   : > { %v1114_v29 = vpop.permute.xlu2 %1113 }
 0x1ba   : > { %1348 = vmatmul.msk.f32.gmra.mxu1 %vm455_vm0, %v1114_v29 }
 0x1bc   : > { %v1077_v35 = vpop.f32.mrf.mxu0 }
 0x1bd   : > { %v1078_v36 = vadd.f32 %v1878_v63, %v1077_v35 }
 0x1bf   : > { %1095 = vst [vmem:[%s1886_s21 + $0x18] sm:$0xff] %v1078_v36 }
 0x1c0   : > { %v1120_v37 = vpop.permute.xlu1 %1119 }
 0x1c1   : > { %1351 = vmatmul.msk.f32.gmra.mxu3 %vm455_vm0, %v1120_v37 }
 0x1e1   : > { %v1157_v39 = vpop.f32.mrf.mxu1 }
 0x1e2   : > { %v1158_v40 = vadd.f32 %v1384_v38, %v1157_v39  ;;  %v1080_v41 = vpop.f32.mrf.mxu2 }
 0x1e3   : > { %v1081_v42 = vadd.f32 %v1878_v63, %v1080_v41 }
 0x1e4   : > { %1181 = vst [vmem:[%s1931_s26] sm:$0xff] %v1158_v40 }
 0x1e5   : > { %1096 = vst [vmem:[%s1886_s21 + $0x20] sm:$0xff] %v1081_v42 }
 0x1e9   : > { %v1160_v43 = vpop.f32.mrf.mxu1 }
 0x1ea   : > { %v1161_v44 = vadd.f32 %v1384_v38, %v1160_v43  ;;  %v1083_v45 = vpop.f32.mrf.mxu2 }
 0x1eb   : > { %v1084_v46 = vadd.f32 %v1878_v63, %v1083_v45 }
 0x1ec   : > { %1182 = vst [vmem:[%s1931_s26 + $0x8] sm:$0xff] %v1161_v44 }
 0x1ed   : > { %1097 = vst [vmem:[%s1886_s21 + $0x28] sm:$0xff] %v1084_v46 }
 0x1f2   : > { %v1086_v47 = vpop.f32.mrf.mxu2 }
 0x1f3   : > { %v1087_v48 = vadd.f32 %v1878_v63, %v1086_v47  ;;  %v1172_v49 = vpop.f32.mrf.mxu3 }
 0x1f4   : > { %v1173_v50 = vadd.f32 %v1384_v38, %v1172_v49 }
 0x1f5   : > { %1098 = vst [vmem:[%s1886_s21 + $0x30] sm:$0xff] %v1087_v48 }
 0x1f6   : > { %1186 = vst [vmem:[%s1931_s26 + $0x28] sm:$0xff] %v1173_v50 }
 0x1fa   : > { %v1089_v51 = vpop.f32.mrf.mxu2 }
 0x1fb   : > { %v1090_v52 = vadd.f32 %v1878_v63, %v1089_v51  ;;  %v1175_v53 = vpop.f32.mrf.mxu3 }
 0x1fc   : > { %v1176_v54 = vadd.f32 %v1384_v38, %v1175_v53 }
 0x1fd   : > { %1099 = vst [vmem:[%s1886_s21 + $0x38] sm:$0xff] %v1090_v52 }
 0x1fe   : > { %1187 = vst [vmem:[%s1931_s26 + $0x30] sm:$0xff] %v1176_v54 }
 0x20d   : > { %v1163_v55 = vpop.f32.mrf.mxu1 }
 0x20e   : > { %v1164_v56 = vadd.f32 %v1384_v38, %v1163_v55 }
 0x210   : > { %1183 = vst [vmem:[%s1931_s26 + $0x10] sm:$0xff] %v1164_v56 }
 0x22f   : > { %v1166_v57 = vpop.f32.mrf.mxu1 }
 0x230   : > { %v1167_v58 = vadd.f32 %v1384_v38, %v1166_v57 }
 0x232   : > { %1184 = vst [vmem:[%s1931_s26 + $0x18] sm:$0xff] %v1167_v58 }
 0x237   : > { %v1169_v59 = vpop.f32.mrf.mxu1 }
 0x238   : > { %v1170_v60 = vadd.f32 %v1384_v38, %v1169_v59 }
 0x23a   : > { %1185 = vst [vmem:[%s1931_s26 + $0x20] sm:$0xff] %v1170_v60 }
 0x244   : > { %v1178_v61 = vpop.f32.mrf.mxu3 }
 0x245   : > { %v1179_v62 = vadd.f32 %v1384_v38, %v1178_v61 }
 0x247   : > { %1188 = vst [vmem:[%s1931_s26 + $0x38] sm:$0xff] %v1179_v62 }
 0x248 PF: > { %s19_s27 = sadd.s32 1, %s1391_s27  }
 0x249   : > { %p16_p4 = scmp.ge.s32.totalorder %s19_s27, 4  }
 0x24b   :  { %18 = sbr.rel (!%p16_p4) target bundleno = 1 (0x1), region = 161 }

</bundles_post_ra>
